<compile_context>
chip_gen: v7x
topology: tpu7x:2x2x1
jax: 0.10.0
libtpu: 0.0.40
codegen_flags: <defaults>
</compile_context>

<pallas_src>
import functools

import jax
import jax.numpy as jnp
from jax.experimental import pallas as pl
from jax.experimental.pallas import tpu as pltpu


def encoder_kernel(x_ref,
                   w1_ref, b1_ref,
                   w2_ref, b2_ref,
                   w23_ref, w3g_ref, b3_ref,
                   w4_ref, b4_ref,
                   o_ref):
    gb, c = o_ref.shape                 # groups per step, encoder_channel
    rows = x_ref.shape[0]               # Gb * N points
    n = rows // gb                      # points per group (padded to mult of 8)
    c2 = w2_ref.shape[1]                # 256
    c3 = w3g_ref.shape[1]               # 512

    x = x_ref[...]                                                       # (rows, 8) bf16

    # first_conv: Conv1d(Din,128,1) + folded BN(128) + ReLU
    h = jnp.dot(x, w1_ref[...], preferred_element_type=jnp.float32) + b1_ref[...]
    h = jnp.maximum(h, 0.0)                                              # (rows, 128) f32
    hb = h.astype(jnp.bfloat16)

    # first_conv tail: Conv1d(128,256,1) -> local feature f (needed for pooling)
    f = jnp.dot(hb, w2_ref[...], preferred_element_type=jnp.float32) + b2_ref[...]

    # per-group global max-pool over the n points of each group
    g = jnp.max(f.reshape(gb, n, c2), axis=1)                            # (gb, 256)

    # second_conv: Conv1d(512,512,1) + folded BN(512) + ReLU, with w3 split
    # into [global | local] halves matching torch.cat([global, local], dim=1);
    # the local half is pre-folded through w2, so K=128 here.
    h2_loc = jnp.dot(hb, w23_ref[...], preferred_element_type=jnp.float32)        # (rows, 512)
    h2_glb = jnp.dot(g.astype(jnp.bfloat16), w3g_ref[...],
                     preferred_element_type=jnp.float32) + b3_ref[...]            # (gb, 512)
    h2 = jnp.maximum(h2_loc.reshape(gb, n, c3) + h2_glb[:, None, :], 0.0)         # (gb, n, 512)

    # second_conv tail: Conv1d(512,C,1); bias added after the max (equivalent)
    out = jnp.dot(h2.reshape(rows, c3).astype(jnp.bfloat16), w4_ref[...],
                  preferred_element_type=jnp.float32)                             # (rows, C)
    o_ref[...] = jnp.max(out.reshape(gb, n, c), axis=1) + b4_ref[...]             # (gb, C)


def _full_spec(shape):
    # Whole (small) parameter array resident in VMEM; constant index_map
    # => fetched once and reused across grid steps.
    return pl.BlockSpec(shape, lambda i, _z=tuple(0 for _ in shape): _z)


def _ceil_div(a, b):
    return -(-a // b)


def _round_up(a, m):
    return _ceil_div(a, m) * m


@functools.partial(jax.jit, static_argnames=("encoder_channel", "group_block"))
def encoder_forward(point_groups, params, encoder_channel, group_block=64):
    """point_groups: (B, G, N, 3) float32  ->  (B, G, encoder_channel)."""
    B, G, N, Din = point_groups.shape
    BG = B * G
    C = encoder_channel

    (w1, b1, s1, t1, w2, b2, w3, b3, s2, t2, w4, b4) = params

    # ---- fold eval-mode BatchNorm into the adjacent conv weights ----
    w1f = w1 * s1
    b1f = b1 * s1 + t1
    w3f = w3 * s2
    b3f = b3 * s2 + t2

    # ---- split w3 into global/local halves; fold local half through w2 ----
    # f @ w3l == h @ (w2 @ w3l) + b2 @ w3l   (no nonlinearity between w2, w3l)
    half = w3f.shape[0] // 2                         # 256
    w3g_f = w3f[:half]                               # multiplies broadcast global feat
    w3l_f = w3f[half:]                               # multiplies per-point local feat
    w23 = w2 @ w3l_f                                 # (128, 512), f32 product
    b3fold = b3f + b2 @ w3l_f                        # (1, 512)

    # ---- bf16 MXU operands (f32 accumulation) ----
    w2b = w2.astype(jnp.bfloat16)
    w23b = w23.astype(jnp.bfloat16)
    w3gb = w3g_f.astype(jnp.bfloat16)
    w4b = w4.astype(jnp.bfloat16)

    # ---- pad the tiny Din contraction to K=8; w1 in bf16 ----
    Dpad = 8
    w1p = (jnp.zeros((Dpad, w1f.shape[1]), jnp.float32)
           .at[:Din].set(w1f).astype(jnp.bfloat16))

    # ---- pad N to a multiple of 8 by replicating the last point ----
    # (replication keeps both max-pools exact; keeps reshapes tile-aligned)
    N_eff = _round_up(N, 8)
    x = point_groups.reshape(BG, N, Din).astype(jnp.float32)
    if N_eff != N:
        x = jnp.concatenate(
            [x, jnp.broadcast_to(x[:, -1:, :], (BG, N_eff - N, Din))], axis=1)

    # ---- choose groups-per-step (multiple of 8, ~2048 rows/step target,
    #      and >= 2 grid steps whenever BG allows it so v7x megacore shards) --
    target_rows = 2048
    Gb = max(8, _round_up(min(group_block, max(1, target_rows // N_eff)), 8))
    BG8 = _round_up(BG, 8)
    if BG8 > 8:
        Gb = min(Gb, _round_up(_ceil_div(BG8, 2), 8))   # guarantee >= 2 steps
    Gb = min(Gb, BG8)
    steps = _ceil_div(BG8, Gb)
    BG_pad = steps * Gb

    x = jnp.pad(x, ((0, BG_pad - BG), (0, 0), (0, Dpad - Din)))
    x = x.astype(jnp.bfloat16).reshape(BG_pad * N_eff, Dpad)

    # ---- advisory cost estimate ----
    rows = BG_pad * N_eff
    H1, H2, H3 = w1p.shape[1], w2.shape[1], w3f.shape[1]       # 128, 256, 512
    flops = 2 * rows * (Dpad * H1 + H1 * H2 + H1 * H3 + H3 * C) \
        + 2 * BG_pad * half * H3
    bytes_accessed = (x.size * 2 + w1p.size * 2 + b1f.size * 4
                      + w2b.size * 2 + b2.size * 4
                      + w23b.size * 2 + w3gb.size * 2 + b3fold.size * 4
                      + w4b.size * 2 + b4.size * 4 + BG_pad * C * 4)
    cost = pl.CostEstimate(flops=int(flops), transcendentals=0,
                           bytes_accessed=int(bytes_accessed))

    out = pl.pallas_call(
        encoder_kernel,
        out_shape=jax.ShapeDtypeStruct((BG_pad, C), jnp.float32),
        grid=(steps,),
        in_specs=[
            pl.BlockSpec((Gb * N_eff, Dpad), lambda i: (i, 0)),   # points of Gb groups
            _full_spec(w1p.shape), _full_spec(b1f.shape),
            _full_spec(w2b.shape), _full_spec(b2.shape),
            _full_spec(w23b.shape), _full_spec(w3gb.shape), _full_spec(b3fold.shape),
            _full_spec(w4b.shape), _full_spec(b4.shape),
        ],
        out_specs=pl.BlockSpec((Gb, C), lambda i: (i, 0)),
        compiler_params=pltpu.CompilerParams(
            dimension_semantics=("parallel",),
            vmem_limit_bytes=48 * 1024 * 1024),
        cost_estimate=cost,
    )(x, w1p, b1f, w2b, b2, w23b, w3gb, b3fold, w4b, b4)

    return out[:BG].reshape(B, G, C)


def init_params(key, encoder_channel, input_dim=3):
    """Deterministic synthetic parameters matching the nn.Module shapes.

    Conv1d(kernel=1) weights are stored transposed as (Cin, Cout) so the
    kernel can do x @ W.  BatchNorm is kept as eval-mode scale/shift
    (scale = gamma/sqrt(var+eps), shift = beta - mean*scale); the wrapper
    folds it into the conv weights.
    """
    ks = jax.random.split(key, 12)
    eps = 1e-5

    def lin(k, cin, cout):
        return jax.random.normal(k, (cin, cout), jnp.float32) * (1.0 / jnp.sqrt(cin))

    w1 = lin(ks[0], input_dim, 128)
    b1 = jax.random.normal(ks[1], (1, 128), jnp.float32) * 0.02
    w2 = lin(ks[2], 128, 256)
    b2 = jax.random.normal(ks[3], (1, 256), jnp.float32) * 0.02
    w3 = lin(ks[4], 512, 512)
    b3 = jax.random.normal(ks[5], (1, 512), jnp.float32) * 0.02
    w4 = lin(ks[6], 512, encoder_channel)
    b4 = jax.random.normal(ks[7], (1, encoder_channel), jnp.float32) * 0.02

    gamma1 = 1.0 + 0.1 * jax.random.normal(ks[8], (1, 128), jnp.float32)
    beta1 = 0.1 * jax.random.normal(ks[9], (1, 128), jnp.float32)
    mean1 = jnp.zeros((1, 128), jnp.float32)
    var1 = jnp.ones((1, 128), jnp.float32)
    s1 = gamma1 / jnp.sqrt(var1 + eps)
    t1 = beta1 - mean1 * s1

    gamma2 = 1.0 + 0.1 * jax.random.normal(ks[10], (1, 512), jnp.float32)
    beta2 = 0.1 * jax.random.normal(ks[11], (1, 512), jnp.float32)
    mean2 = jnp.zeros((1, 512), jnp.float32)
    var2 = jnp.ones((1, 512), jnp.float32)
    s2 = gamma2 / jnp.sqrt(var2 + eps)
    t2 = beta2 - mean2 * s2

    return (w1, b1, s1, t1, w2, b2, w3, b3, s2, t2, w4, b4)


def encoder_reference(point_groups, params, encoder_channel):
    """Pure-JAX f32 reference of the PyTorch forward (BN in eval mode)."""
    B, G, N, Din = point_groups.shape
    (w1, b1, s1, t1, w2, b2, w3, b3, s2, t2, w4, b4) = params
    x = point_groups.reshape(B * G, N, Din)
    h = jnp.maximum((x @ w1 + b1) * s1 + t1, 0.0)
    f = h @ w2 + b2                                     # (BG, N, 256)
    g = jnp.max(f, axis=1, keepdims=True)               # (BG, 1, 256)
    feat = jnp.concatenate([jnp.broadcast_to(g, f.shape), f], axis=-1)
    h2 = jnp.maximum((feat @ w3 + b3) * s2 + t2, 0.0)
    out = h2 @ w4 + b4                                  # (BG, N, C)
    return jnp.max(out, axis=1).reshape(B, G, encoder_channel)


if __name__ == "__main__":
    encoder_channel = 256
    key = jax.random.PRNGKey(0)
    k_x, k_x2, k_p = jax.random.split(key, 3)
    params = init_params(k_p, encoder_channel, input_dim=3)

    # Case 1: small, single grid step (B=2, G=4, N=32).
    pg1 = jax.random.normal(k_x, (2, 4, 32, 3), jnp.float32)
    out1 = jax.block_until_ready(encoder_forward(pg1, params, encoder_channel))
    assert out1.shape == (2, 4, encoder_channel), out1.shape
    ref1 = encoder_reference(pg1, params, encoder_channel)
    err1 = float(jnp.max(jnp.abs(out1 - ref1)))
    assert jnp.allclose(out1, ref1, atol=5e-2, rtol=5e-2), err1

    # Case 2: exercises BG / N padding and the multi-step (>=2) grid path
    # (B=2, G=9 -> BG=18 padded to 24; N=20 padded to 24 by point replication).
    pg2 = jax.random.normal(k_x2, (2, 9, 20, 3), jnp.float32)
    out2 = jax.block_until_ready(encoder_forward(pg2, params, encoder_channel))
    assert out2.shape == (2, 9, encoder_channel), out2.shape
    ref2 = encoder_reference(pg2, params, encoder_channel)
    err2 = float(jnp.max(jnp.abs(out2 - ref2)))
    assert jnp.allclose(out2, ref2, atol=5e-2, rtol=5e-2), err2

    print("KERNEL_OK")
</pallas_src>

<mosaic_0001>
module attributes {stable_mosaic.version = 11 : i64} {
  func.func @encoder_kernel(%arg0: i32, %arg1: memref<256x8xbf16, #tpu.memory_space<vmem>>, %arg2: memref<8x128xbf16, #tpu.memory_space<vmem>>, %arg3: memref<1x128xf32, #tpu.memory_space<vmem>>, %arg4: memref<128x256xbf16, #tpu.memory_space<vmem>>, %arg5: memref<1x256xf32, #tpu.memory_space<vmem>>, %arg6: memref<128x512xbf16, #tpu.memory_space<vmem>>, %arg7: memref<256x512xbf16, #tpu.memory_space<vmem>>, %arg8: memref<1x512xf32, #tpu.memory_space<vmem>>, %arg9: memref<512x256xbf16, #tpu.memory_space<vmem>>, %arg10: memref<1x256xf32, #tpu.memory_space<vmem>>, %arg11: memref<8x256xf32, #tpu.memory_space<vmem>>) attributes {dimension_semantics = [#tpu.dimension_semantics<parallel>], iteration_bounds = array<i64: 1>, scalar_prefetch = 0 : i64, scratch_operands = 0 : i64, tpu.core_type = #tpu.core_type<tc>, window_params = [{transform_indices = @transform_0, window_bounds = array<i64: 256, 8>}, {pipeline_mode = #tpu.pipeline_mode<synchronous>, transform_indices = @transform_1, window_bounds = array<i64: 8, 128>}, {pipeline_mode = #tpu.pipeline_mode<synchronous>, transform_indices = @transform_2, window_bounds = array<i64: 1, 128>}, {pipeline_mode = #tpu.pipeline_mode<synchronous>, transform_indices = @transform_3, window_bounds = array<i64: 128, 256>}, {pipeline_mode = #tpu.pipeline_mode<synchronous>, transform_indices = @transform_4, window_bounds = array<i64: 1, 256>}, {pipeline_mode = #tpu.pipeline_mode<synchronous>, transform_indices = @transform_5, window_bounds = array<i64: 128, 512>}, {pipeline_mode = #tpu.pipeline_mode<synchronous>, transform_indices = @transform_6, window_bounds = array<i64: 256, 512>}, {pipeline_mode = #tpu.pipeline_mode<synchronous>, transform_indices = @transform_7, window_bounds = array<i64: 1, 512>}, {pipeline_mode = #tpu.pipeline_mode<synchronous>, transform_indices = @transform_8, window_bounds = array<i64: 512, 256>}, {pipeline_mode = #tpu.pipeline_mode<synchronous>, transform_indices = @transform_9, window_bounds = array<i64: 1, 256>}, {transform_indices = @transform_10, window_bounds = array<i64: 8, 256>}]} {
    %c0 = arith.constant 0 : index
    %c0_0 = arith.constant 0 : index
    %0 = vector.load %arg1[%c0, %c0_0] : memref<256x8xbf16, #tpu.memory_space<vmem>>, vector<256x8xbf16>
    %c0_1 = arith.constant 0 : index
    %c0_2 = arith.constant 0 : index
    %1 = vector.load %arg2[%c0_1, %c0_2] : memref<8x128xbf16, #tpu.memory_space<vmem>>, vector<8x128xbf16>
    %cst = arith.constant dense<0.000000e+00> : vector<256x128xf32>
    %2 = tpu.matmul %0, %1, %cst {dimension_numbers = #tpu.dot_dimension_numbers<[1], [0], [0], [1], [0, 0, 1, 1], [], []>} : vector<256x8xbf16>, vector<8x128xbf16>, vector<256x128xf32> -> vector<256x128xf32>
    %c0_3 = arith.constant 0 : index
    %c0_4 = arith.constant 0 : index
    %3 = vector.load %arg3[%c0_3, %c0_4] : memref<1x128xf32, #tpu.memory_space<vmem>>, vector<1x128xf32>
    %4 = vector.broadcast %3 : vector<1x128xf32> to vector<256x128xf32>
    %5 = arith.addf %2, %4 : vector<256x128xf32>
    %cst_5 = arith.constant 0.000000e+00 : f32
    %6 = vector.broadcast %cst_5 : f32 to vector<256x128xf32>
    %7 = arith.maximumf %5, %6 : vector<256x128xf32>
    %8 = arith.truncf %7 : vector<256x128xf32> to vector<256x128xbf16>
    %c0_6 = arith.constant 0 : index
    %c0_7 = arith.constant 0 : index
    %9 = vector.load %arg4[%c0_6, %c0_7] : memref<128x256xbf16, #tpu.memory_space<vmem>>, vector<128x256xbf16>
    %cst_8 = arith.constant dense<0.000000e+00> : vector<256x256xf32>
    %10 = tpu.matmul %8, %9, %cst_8 {dimension_numbers = #tpu.dot_dimension_numbers<[1], [0], [0], [1], [0, 0, 1, 1], [], []>} : vector<256x128xbf16>, vector<128x256xbf16>, vector<256x256xf32> -> vector<256x256xf32>
    %c0_9 = arith.constant 0 : index
    %c0_10 = arith.constant 0 : index
    %11 = vector.load %arg5[%c0_9, %c0_10] : memref<1x256xf32, #tpu.memory_space<vmem>>, vector<1x256xf32>
    %12 = vector.broadcast %11 : vector<1x256xf32> to vector<256x256xf32>
    %13 = arith.addf %10, %12 : vector<256x256xf32>
    %14 = vector.shape_cast %13 : vector<256x256xf32> to vector<8x32x256xf32>
    %cst_11 = arith.constant dense<0xFF800000> : vector<8x256xf32>
    %15 = vector.multi_reduction <maximumf>, %14, %cst_11 [1] : vector<8x32x256xf32> to vector<8x256xf32>
    %c0_12 = arith.constant 0 : index
    %c0_13 = arith.constant 0 : index
    %16 = vector.load %arg6[%c0_12, %c0_13] : memref<128x512xbf16, #tpu.memory_space<vmem>>, vector<128x512xbf16>
    %cst_14 = arith.constant dense<0.000000e+00> : vector<256x512xf32>
    %17 = tpu.matmul %8, %16, %cst_14 {dimension_numbers = #tpu.dot_dimension_numbers<[1], [0], [0], [1], [0, 0, 1, 1], [], []>} : vector<256x128xbf16>, vector<128x512xbf16>, vector<256x512xf32> -> vector<256x512xf32>
    %18 = arith.truncf %15 : vector<8x256xf32> to vector<8x256xbf16>
    %c0_15 = arith.constant 0 : index
    %c0_16 = arith.constant 0 : index
    %19 = vector.load %arg7[%c0_15, %c0_16] : memref<256x512xbf16, #tpu.memory_space<vmem>>, vector<256x512xbf16>
    %cst_17 = arith.constant dense<0.000000e+00> : vector<8x512xf32>
    %20 = tpu.matmul %18, %19, %cst_17 {dimension_numbers = #tpu.dot_dimension_numbers<[1], [0], [0], [1], [0, 0, 1, 1], [], []>} : vector<8x256xbf16>, vector<256x512xbf16>, vector<8x512xf32> -> vector<8x512xf32>
    %c0_18 = arith.constant 0 : index
    %c0_19 = arith.constant 0 : index
    %21 = vector.load %arg8[%c0_18, %c0_19] : memref<1x512xf32, #tpu.memory_space<vmem>>, vector<1x512xf32>
    %22 = vector.broadcast %21 : vector<1x512xf32> to vector<8x512xf32>
    %23 = arith.addf %20, %22 : vector<8x512xf32>
    %24 = vector.shape_cast %17 : vector<256x512xf32> to vector<8x32x512xf32>
    %25 = vector.shape_cast %23 : vector<8x512xf32> to vector<8x1x512xf32>
    %26 = vector.broadcast %25 : vector<8x1x512xf32> to vector<8x32x512xf32>
    %27 = arith.addf %24, %26 : vector<8x32x512xf32>
    %cst_20 = arith.constant 0.000000e+00 : f32
    %28 = vector.broadcast %cst_20 : f32 to vector<8x32x512xf32>
    %29 = arith.maximumf %27, %28 : vector<8x32x512xf32>
    %30 = vector.shape_cast %29 : vector<8x32x512xf32> to vector<256x512xf32>
    %31 = arith.truncf %30 : vector<256x512xf32> to vector<256x512xbf16>
    %c0_21 = arith.constant 0 : index
    %c0_22 = arith.constant 0 : index
    %32 = vector.load %arg9[%c0_21, %c0_22] : memref<512x256xbf16, #tpu.memory_space<vmem>>, vector<512x256xbf16>
    %cst_23 = arith.constant dense<0.000000e+00> : vector<256x256xf32>
    %33 = tpu.matmul %31, %32, %cst_23 {dimension_numbers = #tpu.dot_dimension_numbers<[1], [0], [0], [1], [0, 0, 1, 1], [], []>} : vector<256x512xbf16>, vector<512x256xbf16>, vector<256x256xf32> -> vector<256x256xf32>
    %34 = vector.shape_cast %33 : vector<256x256xf32> to vector<8x32x256xf32>
    %cst_24 = arith.constant dense<0xFF800000> : vector<8x256xf32>
    %35 = vector.multi_reduction <maximumf>, %34, %cst_24 [1] : vector<8x32x256xf32> to vector<8x256xf32>
    %c0_25 = arith.constant 0 : index
    %c0_26 = arith.constant 0 : index
    %36 = vector.load %arg10[%c0_25, %c0_26] : memref<1x256xf32, #tpu.memory_space<vmem>>, vector<1x256xf32>
    %37 = vector.broadcast %36 : vector<1x256xf32> to vector<8x256xf32>
    %38 = arith.addf %35, %37 : vector<8x256xf32>
    %c0_27 = arith.constant 0 : index
    %c0_28 = arith.constant 0 : index
    %39 = vector.load %arg11[%c0_27, %c0_28] : memref<8x256xf32, #tpu.memory_space<vmem>>, vector<8x256xf32>
    tpu.vector_store %arg11[%c0_27, %c0_28], %38 {strides = array<i32>} : memref<8x256xf32, #tpu.memory_space<vmem>>, vector<8x256xf32>,
    return
  }
  func.func @transform_0(%arg0: i32) -> (i32, i32) {
    %c0_i32 = arith.constant 0 : i32
    %c0_i32_0 = arith.constant 0 : i32
    return %arg0, %c0_i32 : i32, i32
  }
  func.func @transform_1(%arg0: i32) -> (i32, i32) {
    %c0_i32 = arith.constant 0 : i32
    %c0_i32_0 = arith.constant 0 : i32
    %c0_i32_1 = arith.constant 0 : i32
    return %c0_i32, %c0_i32_0 : i32, i32
  }
  func.func @transform_2(%arg0: i32) -> (i32, i32) {
    %c0_i32 = arith.constant 0 : i32
    %c0_i32_0 = arith.constant 0 : i32
    %c0_i32_1 = arith.constant 0 : i32
    return %c0_i32, %c0_i32_0 : i32, i32
  }
  func.func @transform_3(%arg0: i32) -> (i32, i32) {
    %c0_i32 = arith.constant 0 : i32
    %c0_i32_0 = arith.constant 0 : i32
    %c0_i32_1 = arith.constant 0 : i32
    return %c0_i32, %c0_i32_0 : i32, i32
  }
  func.func @transform_4(%arg0: i32) -> (i32, i32) {
    %c0_i32 = arith.constant 0 : i32
    %c0_i32_0 = arith.constant 0 : i32
    %c0_i32_1 = arith.constant 0 : i32
    return %c0_i32, %c0_i32_0 : i32, i32
  }
  func.func @transform_5(%arg0: i32) -> (i32, i32) {
    %c0_i32 = arith.constant 0 : i32
    %c0_i32_0 = arith.constant 0 : i32
    %c0_i32_1 = arith.constant 0 : i32
    return %c0_i32, %c0_i32_0 : i32, i32
  }
  func.func @transform_6(%arg0: i32) -> (i32, i32) {
    %c0_i32 = arith.constant 0 : i32
    %c0_i32_0 = arith.constant 0 : i32
    %c0_i32_1 = arith.constant 0 : i32
    return %c0_i32, %c0_i32_0 : i32, i32
  }
  func.func @transform_7(%arg0: i32) -> (i32, i32) {
    %c0_i32 = arith.constant 0 : i32
    %c0_i32_0 = arith.constant 0 : i32
    %c0_i32_1 = arith.constant 0 : i32
    return %c0_i32, %c0_i32_0 : i32, i32
  }
  func.func @transform_8(%arg0: i32) -> (i32, i32) {
    %c0_i32 = arith.constant 0 : i32
    %c0_i32_0 = arith.constant 0 : i32
    %c0_i32_1 = arith.constant 0 : i32
    return %c0_i32, %c0_i32_0 : i32, i32
  }
  func.func @transform_9(%arg0: i32) -> (i32, i32) {
    %c0_i32 = arith.constant 0 : i32
    %c0_i32_0 = arith.constant 0 : i32
    %c0_i32_1 = arith.constant 0 : i32
    return %c0_i32, %c0_i32_0 : i32, i32
  }
  func.func @transform_10(%arg0: i32) -> (i32, i32) {
    %c0_i32 = arith.constant 0 : i32
    %c0_i32_0 = arith.constant 0 : i32
    return %arg0, %c0_i32 : i32, i32
  }
}

</mosaic_0001>

<bundles_post_ra>
// kernel: encoder_forward.1
= control target key start
LH: loop header
LB: loop body
LE: loop exit
PB: predicated region body
PF: predicated region fallthrough
CT: control target
= control target key end

     0   :  { %vm205_vm0 = vcmask 1043456   ;;  %vm156_vm1 = vcmask 64512   ;;  %v4155_v50 = vmov 0   ;;  %vm1575_vm2 = vcmask 1041409   ;;  %s5776_s1 = inlined_call_operand.vmem [shape: bf16[8,128], index: 1, kind: input, shape index: {}]   ;;  %s5777_s0 = inlined_call_operand.vmem [shape: bf16[256,8], index: 0, kind: input, shape index: {}]   ;;  %s5778_s3 = inlined_call_operand.vmem [shape: bf16[128,256], index: 3, kind: input, shape index: {}]   ;;  %s5779_s5 = inlined_call_operand.vmem [shape: bf16[128,512], index: 5, kind: input, shape index: {}]   ;;  %s5780_s2 = inlined_call_operand.vmem [shape: f32[1,128], index: 2, kind: input, shape index: {}]   ;;  %s5781_s6 = inlined_call_operand.vmem [shape: bf16[256,512], index: 6, kind: input, shape index: {}]   ;;  %s5782_s4 = inlined_call_operand.vmem [shape: f32[1,256], index: 4, kind: input, shape index: {}]   ;;  %s5783_s8 = inlined_call_operand.vmem [shape: bf16[512,256], index: 8, kind: input, shape index: {}]   ;;  %s5784_s7 = inlined_call_operand.vmem [shape: f32[1,512], index: 7, kind: input, shape index: {}]   ;;  %s5785_s9 = inlined_call_operand.vmem [shape: f32[1,256], index: 9, kind: input, shape index: {}]   ;;  %s5786_s10 = inlined_call_operand.vmem [shape: f32[8,256], index: 10, kind: output, shape index: {}]  }
   0x1   :  { %v68_v0 = vld [vmem:[%s5776_s1] sm:$0xf]  ;;  %v3876_v3 = vld [vmem:[%s5777_s0 + $0x8] sm:$0xff]   ;;  %v3877_v4 = vld [vmem:[%s5777_s0 + $0x10] sm:$0xff]   ;;  %1280 = vmatprep.mubr.bf16.mxu1 %v4155_v50  ;;  %vm1577_vm3 = vcmask 1042434   ;;  %vm1579_vm4 = vcmask 1043459  }
   0x2   :  { %3872 = vmatprep.subr.msk.bf16.mxu0 %vm205_vm0, %v68_v0  ;;  %v207_v1 = vsel %vm205_vm0, %v68_v0, 0  ;;  %v3875_v2 = vld [vmem:[%s5777_s0] sm:$0xff]   ;;  %v3878_v5 = vld [vmem:[%s5777_s0 + $0x18] sm:$0xff]   ;;  %v3880_v7 = vld [vmem:[%s5777_s0 + $0x28] sm:$0xff]   ;;  %vm1581_vm5 = vcmask 1044484   ;;  %vm1583_vm6 = vcmask 1045509  }
   0x3   :  { %3775 = vmatpush3.bf16.msra.mxu0 %v207_v1  ;;  %3776 = vmatprep.mubr.msk.bf16.mxu0 %vm156_vm1, %v3875_v2  ;;  %v3879_v6 = vld [vmem:[%s5777_s0 + $0x20] sm:$0xff]   ;;  %v3881_v10 = vld [vmem:[%s5777_s0 + $0x30] sm:$0xff]   ;;  %v3882_v15 = vld [vmem:[%s5777_s0 + $0x38] sm:$0xff]   ;;  %vm1585_vm7 = vcmask 1046534   ;;  %vm1587_vm8 = vcmask 1047559  }
   0x4   :  { %v3891_v8 = vld [vmem:[%s5778_s3] ss:$8 sps:$4 sm:$0xff]   ;;  %v3893_v9 = vld [vmem:[%s5778_s3 + $0x4] ss:$8 sps:$4 sm:$0xff]   ;;  %v3896_v11 = vld [vmem:[%s5778_s3 + $0x14] ss:$8 sps:$4 sm:$0xff]  }
   0x5   :  { %526 = vmatprep.subr.bf16.mxu0 %v3893_v9  ;;  %v3894_v12 = vld [vmem:[%s5778_s3 + $0x10] ss:$8 sps:$4 sm:$0xff]   ;;  %v3899_v13 = vld [vmem:[%s5778_s3 + $0x24] ss:$8 sps:$4 sm:$0xff]   ;;  %v3897_v14 = vld [vmem:[%s5778_s3 + $0x20] ss:$8 sps:$4 sm:$0xff]  }
   0x6   :  { %3777 = vmatmul.mubr.msk.bf16.vlgmr.msra.gmra.mrb[0].mxu0 %vm156_vm1, %v3876_v3  ;;  %v3906_v16 = vld [vmem:[%s5779_s5 + $0xc] ss:$16 sps:$4 sm:$0xff]   ;;  %v3908_v17 = vld [vmem:[%s5779_s5 + $0x8] ss:$16 sps:$4 sm:$0xff]   ;;  %v3883_v20 = vld [vmem:[%s5777_s0 + $0x40] sm:$0xff]  }
   0x7   :  { %3780 = vmatprep.mubr.msk.bf16.mxu0 %vm156_vm1, %v3877_v4  ;;  %527 = vmatpush1.bf16.msra.mxu0 %v3891_v8  ;;  %v3902_v18 = vld [vmem:[%s5778_s3 + $0x34] ss:$8 sps:$4 sm:$0xff]   ;;  %v3911_v21 = vld [vmem:[%s5779_s5 + $0x28] ss:$16 sps:$4 sm:$0xff]   ;;  %v3905_v24 = vld [vmem:[%s5778_s3 + $0x44] ss:$8 sps:$4 sm:$0xff]  }
   0x8   :  { %528 = vmatprep.subr.bf16.mxu0 %v3896_v11  ;;  %1248 = vmatprep.subr.bf16.mxu1 %v3906_v16  ;;  %v3909_v19 = vld [vmem:[%s5779_s5 + $0x2c] ss:$16 sps:$4 sm:$0xff]   ;;  %v3900_v23 = vld [vmem:[%s5778_s3 + $0x30] ss:$8 sps:$4 sm:$0xff]   ;;  %v3903_v25 = vld [vmem:[%s5778_s3 + $0x40] ss:$8 sps:$4 sm:$0xff]  }
   0x9   :  { %1249 = vmatpush1.bf16.msra.mxu1 %v3908_v17  ;;  %v3915_v22 = vld [vmem:[%s5779_s5 + $0x4c] ss:$16 sps:$4 sm:$0xff]   ;;  %v3917_v26 = vld [vmem:[%s5779_s5 + $0x48] ss:$16 sps:$4 sm:$0xff]   ;;  %v3885_v29 = vld [vmem:[%s5777_s0 + $0x50] sm:$0xff]  }
   0xa   :  { %1250 = vmatprep.subr.bf16.mxu1 %v3909_v19  ;;  %v3884_v27 = vld [vmem:[%s5777_s0 + $0x48] sm:$0xff]   ;;  %v3914_v30 = vld [vmem:[%s5778_s3 + $0x54] ss:$8 sps:$4 sm:$0xff]   ;;  %v3912_v33 = vld [vmem:[%s5778_s3 + $0x50] ss:$8 sps:$4 sm:$0xff]  }
   0xb   :  { %529 = vmatpush1.bf16.msra.mxu0 %v3894_v12  ;;  %v3918_v28 = vld [vmem:[%s5779_s5 + $0x6c] ss:$16 sps:$4 sm:$0xff]   ;;  %v3920_v31 = vld [vmem:[%s5779_s5 + $0x68] ss:$16 sps:$4 sm:$0xff]   ;;  %v3887_v39 = vld [vmem:[%s5777_s0 + $0x60] sm:$0xff]  }
   0xc   :  { %530 = vmatprep.subr.bf16.mxu0 %v3899_v13  ;;  %v3924_v32 = vld [vmem:[%s5779_s5 + $0x8c] ss:$16 sps:$4 sm:$0xff]   ;;  %v3926_v35 = vld [vmem:[%s5779_s5 + $0x88] ss:$16 sps:$4 sm:$0xff]   ;;  %v3889_v42 = vld [vmem:[%s5777_s0 + $0x70] sm:$0xff]  }
   0xd   :  { %1251 = vmatpush1.bf16.msra.mxu1 %v3911_v21  ;;  %v3923_v34 = vld [vmem:[%s5778_s3 + $0x64] ss:$8 sps:$4 sm:$0xff]   ;;  %v3921_v37 = vld [vmem:[%s5778_s3 + $0x60] ss:$8 sps:$4 sm:$0xff]   ;;  %v3886_v38 = vld [vmem:[%s5777_s0 + $0x58] sm:$0xff]  }
   0xe   :  { %3781 = vmatmul.mubr.msk.bf16.gmra.mrb[4].mxu0 %vm156_vm1, %v3878_v5  ;;  %1252 = vmatprep.subr.bf16.mxu1 %v3915_v22  ;;  %v3927_v36 = vld [vmem:[%s5779_s5 + $0xac] ss:$16 sps:$4 sm:$0xff]   ;;  %v3929_v40 = vld [vmem:[%s5779_s5 + $0xa8] ss:$16 sps:$4 sm:$0xff]   ;;  %v3941_v51 = vld [vmem:[%s5779_s5 + $0x4] ss:$16 sps:$4 sm:$0xff]  }
   0xf   :  { %3784 = vmatprep.mubr.msk.bf16.mxu0 %vm156_vm1, %v3879_v6  ;;  %531 = vmatpush1.bf16.msra.mxu0 %v3897_v14  ;;  %v3888_v41 = vld [vmem:[%s5777_s0 + $0x68] sm:$0xff]   ;;  %v3890_v43 = vld [vmem:[%s5777_s0 + $0x78] sm:$0xff]   ;;  %v4383_v52 = vld [vmem:[%s5780_s2] ss:$0 sm:$0xff] }
  0x10   :  { %532 = vmatprep.subr.bf16.mxu0 %v3902_v18  ;;  %v3933_v44 = vld [vmem:[%s5779_s5 + $0xcc] ss:$16 sps:$4 sm:$0xff]   ;;  %v3935_v45 = vld [vmem:[%s5779_s5 + $0xc8] ss:$16 sps:$4 sm:$0xff]   ;;  %v3939_v4 = vld [vmem:[%s5779_s5] ss:$16 sps:$4 sm:$0xff]  }
  0x11   :  { %1253 = vmatpush1.bf16.msra.mxu1 %v3917_v26  ;;  %v3930_v46 = vld [vmem:[%s5778_s3 + $0x70] ss:$8 sps:$4 sm:$0xff]   ;;  %v3932_v47 = vld [vmem:[%s5778_s3 + $0x74] ss:$8 sps:$4 sm:$0xff]  }
  0x12   :  { %1254 = vmatprep.subr.bf16.mxu1 %v3918_v28  ;;  %v3936_v48 = vld [vmem:[%s5779_s5 + $0xec] ss:$16 sps:$4 sm:$0xff]   ;;  %v3938_v49 = vld [vmem:[%s5779_s5 + $0xe8] ss:$16 sps:$4 sm:$0xff]   ;;  %v3947_v17 = vld [vmem:[%s5779_s5 + $0x44] ss:$16 sps:$4 sm:$0xff]  }
  0x13   :  { %533 = vmatpush1.bf16.msra.mxu0 %v3900_v23  ;;  %v3945_v22 = vld [vmem:[%s5779_s5 + $0x40] ss:$16 sps:$4 sm:$0xff]  }
  0x14   :  { %534 = vmatprep.subr.bf16.mxu0 %v3905_v24 }
  0x15   :  { %1255 = vmatpush1.bf16.msra.mxu1 %v3920_v31 }
  0x16   :  { %3785 = vmatmul.mubr.msk.bf16.gmra.mrb[8].mxu0 %vm156_vm1, %v3880_v7  ;;  %1256 = vmatprep.subr.bf16.mxu1 %v3924_v32  ;;  %v3944_v7 = vld [vmem:[%s5779_s5 + $0x24] ss:$16 sps:$4 sm:$0xff]  }
  0x17   :  { %3788 = vmatprep.mubr.msk.bf16.mxu0 %vm156_vm1, %v3881_v10  ;;  %535 = vmatpush1.bf16.msra.mxu0 %v3903_v25  ;;  %v3950_v25 = vld [vmem:[%s5779_s5 + $0x64] ss:$16 sps:$4 sm:$0xff]  }
  0x18   :  { %536 = vmatprep.subr.bf16.mxu0 %v3914_v30 }
  0x19   :  { %1257 = vmatpush1.bf16.msra.mxu1 %v3926_v35  ;;  %v3953_v35 = vld [vmem:[%s5779_s5 + $0x84] ss:$16 sps:$4 sm:$0xff]  }
  0x1a   :  { %1258 = vmatprep.subr.bf16.mxu1 %v3927_v36 }
  0x1b   :  { %537 = vmatpush1.bf16.msra.mxu0 %v3912_v33  ;;  %v3948_v33 = vld [vmem:[%s5779_s5 + $0x60] ss:$16 sps:$4 sm:$0xff]  }
  0x1c   :  { %538 = vmatprep.subr.bf16.mxu0 %v3923_v34 }
  0x1d   :  { %1259 = vmatpush1.bf16.msra.mxu1 %v3929_v40  ;;  %v3951_v40 = vld [vmem:[%s5779_s5 + $0x80] ss:$16 sps:$4 sm:$0xff]  }
  0x1e   :  { %3789 = vmatmul.mubr.msk.bf16.gmra.mrb[12].mxu0 %vm156_vm1, %v3882_v15  ;;  %1260 = vmatprep.subr.bf16.mxu1 %v3933_v44  ;;  %v3942_v15 = vld [vmem:[%s5779_s5 + $0x20] ss:$16 sps:$4 sm:$0xff]  }
  0x1f   :  { %3792 = vmatprep.mubr.msk.bf16.mxu0 %vm156_vm1, %v3883_v20  ;;  %539 = vmatpush1.bf16.msra.mxu0 %v3921_v37 }
  0x20   :  { %540 = vmatprep.subr.bf16.mxu0 %v3932_v47 }
  0x21   :  { %1261 = vmatpush1.bf16.msra.mxu1 %v3935_v45 }
  0x22   :  { %1262 = vmatprep.subr.bf16.mxu1 %v3936_v48 }
  0x23   :  { %541 = vmatpush1.bf16.msra.mxu0 %v3930_v46 }
  0x24   :  { %1055 = vmatprep.subr.bf16.mxu0 %v3941_v51 }
  0x25   :  { %1263 = vmatpush1.bf16.msra.mxu1 %v3938_v49 }
  0x26   :  { %3793 = vmatmul.mubr.msk.bf16.gmra.mrb[16].mxu0 %vm156_vm1, %v3884_v27 }
  0x27   :  { %3796 = vmatprep.mubr.msk.bf16.mxu0 %vm156_vm1, %v3885_v29 }
  0x2e   :  { %3797 = vmatmul.mubr.msk.bf16.gmra.mrb[20].mxu0 %vm156_vm1, %v3886_v38 }
  0x2f   :  { %3800 = vmatprep.mubr.msk.bf16.mxu0 %vm156_vm1, %v3887_v39 }
  0x36   :  { %3801 = vmatmul.mubr.msk.bf16.gmra.mrb[24].mxu0 %vm156_vm1, %v3888_v41 }
  0x37   :  { %3804 = vmatprep.mubr.msk.bf16.mxu0 %vm156_vm1, %v3889_v42 }
  0x3e   :  { %3805 = vmatmul.mubr.msk.bf16.gmra.mrb[28].mxu0 %vm156_vm1, %v3890_v43  ;;  %v3956_v43 = vld [vmem:[%s5779_s5 + $0xa4] ss:$16 sps:$4 sm:$0xff]  }
  0x3f   :  { %558 = vmatprep.mubr.bf16.mxu0 %v4155_v50 }
  0xd9   :  { %v3778_v53 = vpop.f32.mrb[0].mxu0 }
  0xda   :  { %v252_v54 = vadd.f32 %v3778_v53, %v4383_v52  ;;  %v243_v55 = vpop.f32.mrb[1].mxu0  ;;  %v3954_v53 = vld [vmem:[%s5779_s5 + $0xa0] ss:$16 sps:$4 sm:$0xff]  }
  0xdb   :  { %v244_v56 = vadd.f32 %v4383_v52, %v243_v55  ;;  %v3779_v57 = vpop.f32.mrb[2].mxu0  ;;  %v3959_v55 = vld [vmem:[%s5779_s5 + $0xc4] ss:$16 sps:$4 sm:$0xff]  }
  0xdc   :  { %v255_v58 = vadd.f32 %v3779_v57, %v4383_v52  ;;  %v246_v59 = vpop.f32.mrb[3].mxu0  ;;  %v372_v61 = vmax.f32 %v252_v54, 0.0 }
  0xdd   :  { %v247_v60 = vadd.f32 %v4383_v52, %v246_v59  ;;  %v370_v63 = vmax.f32 %v244_v56, 0.0 }
  0xde   :  { %v373_v62 = vmax.f32 %v255_v58, 0.0 }
  0xdf   :  { %v371_v0 = vmax.f32 %v247_v60, 0.0  ;;  %v3957_v60 = vld [vmem:[%s5779_s5 + $0xc0] ss:$16 sps:$4 sm:$0xff]  }
  0xe0   :  { %v4389_v1 = vpack.c.bf16 %v373_v62, %v372_v61 }
  0xe1   :  { %v4391_v2 = vpack.c.bf16 %v371_v0, %v370_v63  ;;  %v3782_v3 = vpop.f32.mrb[4].mxu0  ;;  %v3962_v63 = vld [vmem:[%s5779_s5 + $0xe4] ss:$16 sps:$4 sm:$0xff]  }
  0xe2   :  { %v268_v5 = vadd.f32 %v3782_v3, %v4383_v52  ;;  %v259_v6 = vpop.f32.mrb[5].mxu0 }
  0xe3   :  { %559 = vmatmul.mubr.bf16.vlgmr.msra.gmra.mrb[32].mxu0 %v4391_v2  ;;  %1281 = vmatmul.mubr.bf16.vlgmr.msra.gmra.mrb[0].mxu1 %v4391_v2  ;;  %v260_v8 = vadd.f32 %v4383_v52, %v259_v6  ;;  %v3783_v9 = vpop.f32.mrb[6].mxu0 }
  0xe4   :  { %v376_v10 = vmax.f32 %v268_v5, 0.0  ;;  %v271_v11 = vadd.f32 %v3783_v9, %v4383_v52  ;;  %v262_v12 = vpop.f32.mrb[7].mxu0  ;;  %568 = vmatprep.mubr.bf16.mxu0 %v4155_v50  ;;  %1290 = vmatprep.mubr.bf16.mxu1 %v4155_v50  ;;  %v3960_v9 = vld [vmem:[%s5779_s5 + $0xe0] ss:$16 sps:$4 sm:$0xff]  }
  0xe5   :  { %v374_v13 = vmax.f32 %v260_v8, 0.0  ;;  %v263_v14 = vadd.f32 %v4383_v52, %v262_v12  ;;  %1056 = vmatpush1.bf16.msra.mxu0 %v3939_v4 }
  0xe6   :  { %v377_v16 = vmax.f32 %v271_v11, 0.0  ;;  %1057 = vmatprep.subr.bf16.mxu0 %v3944_v7 }
  0xe7   :  { %v375_v18 = vmax.f32 %v263_v14, 0.0 }
  0xe8   :  { %v4413_v19 = vpack.c.bf16 %v377_v16, %v376_v10 }
  0xe9   :  { %v4415_v20 = vpack.c.bf16 %v375_v18, %v374_v13  ;;  %v3786_v21 = vpop.f32.mrb[8].mxu0  ;;  %1058 = vmatpush1.bf16.msra.mxu0 %v3942_v15 }
  0xea   :  { %v284_v23 = vadd.f32 %v3786_v21, %v4383_v52  ;;  %v275_v24 = vpop.f32.mrb[9].mxu0  ;;  %1059 = vmatprep.subr.bf16.mxu0 %v3947_v17 }
  0xeb   :  { %569 = vmatmul.mubr.bf16.gmra.mrb[36].mxu0 %v4389_v1  ;;  %1291 = vmatmul.mubr.bf16.gmra.mrb[4].mxu1 %v4389_v1  ;;  %v276_v26 = vadd.f32 %v4383_v52, %v275_v24  ;;  %v3787_v27 = vpop.f32.mrb[10].mxu0 }
  0xec   :  { %578 = vmatprep.mubr.bf16.mxu0 %v4155_v50  ;;  %1300 = vmatprep.mubr.bf16.mxu1 %v4155_v50  ;;  %v380_v28 = vmax.f32 %v284_v23, 0.0  ;;  %v287_v29 = vadd.f32 %v3787_v27, %v4383_v52  ;;  %v278_v30 = vpop.f32.mrb[11].mxu0 }
  0xed   :  { %v378_v31 = vmax.f32 %v276_v26, 0.0  ;;  %v279_v32 = vadd.f32 %v4383_v52, %v278_v30  ;;  %1060 = vmatpush1.bf16.msra.mxu0 %v3945_v22 }
  0xee   :  { %v381_v34 = vmax.f32 %v287_v29, 0.0  ;;  %1061 = vmatprep.subr.bf16.mxu0 %v3950_v25 }
  0xef   :  { %v379_v36 = vmax.f32 %v279_v32, 0.0 }
  0xf0   :  { %v4437_v37 = vpack.c.bf16 %v381_v34, %v380_v28 }
  0xf1   :  { %v4439_v38 = vpack.c.bf16 %v379_v36, %v378_v31  ;;  %v3790_v39 = vpop.f32.mrb[12].mxu0  ;;  %1062 = vmatpush1.bf16.msra.mxu0 %v3948_v33 }
  0xf2   :  { %v300_v41 = vadd.f32 %v3790_v39, %v4383_v52  ;;  %v291_v42 = vpop.f32.mrb[13].mxu0  ;;  %1063 = vmatprep.subr.bf16.mxu0 %v3953_v35 }
  0xf3   :  { %579 = vmatmul.mubr.bf16.gmra.mrb[40].mxu0 %v4415_v20  ;;  %1301 = vmatmul.mubr.bf16.gmra.mrb[8].mxu1 %v4415_v20  ;;  %v292_v44 = vadd.f32 %v4383_v52, %v291_v42  ;;  %v3791_v45 = vpop.f32.mrb[14].mxu0 }
  0xf4   :  { %588 = vmatprep.mubr.bf16.mxu0 %v4155_v50  ;;  %1310 = vmatprep.mubr.bf16.mxu1 %v4155_v50  ;;  %v384_v46 = vmax.f32 %v300_v41, 0.0  ;;  %v303_v47 = vadd.f32 %v3791_v45, %v4383_v52  ;;  %v294_v48 = vpop.f32.mrb[15].mxu0 }
  0xf5   :  { %v382_v49 = vmax.f32 %v292_v44, 0.0  ;;  %v295_v51 = vadd.f32 %v4383_v52, %v294_v48  ;;  %1064 = vmatpush1.bf16.msra.mxu0 %v3951_v40 }
  0xf6   :  { %v385_v54 = vmax.f32 %v303_v47, 0.0  ;;  %1065 = vmatprep.subr.bf16.mxu0 %v3956_v43 }
  0xf7   :  { %v383_v56 = vmax.f32 %v295_v51, 0.0 }
  0xf8   :  { %v4461_v57 = vpack.c.bf16 %v385_v54, %v384_v46 }
  0xf9   :  { %v4463_v58 = vpack.c.bf16 %v383_v56, %v382_v49  ;;  %v3794_v59 = vpop.f32.mrb[16].mxu0  ;;  %1066 = vmatpush1.bf16.msra.mxu0 %v3954_v53 }
  0xfa   :  { %v316_v61 = vadd.f32 %v3794_v59, %v4383_v52  ;;  %v307_v62 = vpop.f32.mrb[17].mxu0  ;;  %1067 = vmatprep.subr.bf16.mxu0 %v3959_v55 }
  0xfb   :  { %589 = vmatmul.mubr.bf16.gmra.mrb[44].mxu0 %v4413_v19  ;;  %1311 = vmatmul.mubr.bf16.gmra.mrb[12].mxu1 %v4413_v19  ;;  %v308_v0 = vadd.f32 %v4383_v52, %v307_v62  ;;  %v3795_v3 = vpop.f32.mrb[18].mxu0 }
  0xfc   :  { %598 = vmatprep.mubr.bf16.mxu0 %v4155_v50  ;;  %1320 = vmatprep.mubr.bf16.mxu1 %v4155_v50  ;;  %v388_v4 = vmax.f32 %v316_v61, 0.0  ;;  %v319_v5 = vadd.f32 %v3795_v3, %v4383_v52  ;;  %v310_v6 = vpop.f32.mrb[19].mxu0  ;;  %v3966_v3 = vld [vmem:[%s5781_s6 + $0x20] ss:$16 sps:$4 sm:$0xff]  }
  0xfd   :  { %v386_v7 = vmax.f32 %v308_v0, 0.0  ;;  %v311_v8 = vadd.f32 %v4383_v52, %v310_v6  ;;  %1068 = vmatpush1.bf16.msra.mxu0 %v3957_v60  ;;  %v3963_v0 = vld [vmem:[%s5781_s6] ss:$16 sps:$4 sm:$0xff]   ;;  %v3971_v6 = vld [vmem:[%s5781_s6 + $0x44] ss:$16 sps:$4 sm:$0xff]  }
  0xfe   :  { %v389_v10 = vmax.f32 %v319_v5, 0.0  ;;  %1069 = vmatprep.subr.bf16.mxu0 %v3962_v63  ;;  %v3969_v5 = vld [vmem:[%s5781_s6 + $0x40] ss:$16 sps:$4 sm:$0xff]  }
  0xff   :  { %v387_v11 = vmax.f32 %v311_v8, 0.0  ;;  %v3977_v8 = vld [vmem:[%s5781_s6 + $0x84] ss:$16 sps:$4 sm:$0xff]  }
 0x100   :  { %v4482_v12 = vpack.c.bf16 %v389_v10, %v388_v4  ;;  %v3968_v4 = vld [vmem:[%s5781_s6 + $0x24] ss:$16 sps:$4 sm:$0xff]  }
 0x101   :  { %v4484_v13 = vpack.c.bf16 %v387_v11, %v386_v7  ;;  %v3798_v14 = vpop.f32.mrb[20].mxu0  ;;  %1070 = vmatpush1.bf16.msra.mxu0 %v3960_v9  ;;  %v3974_v7 = vld [vmem:[%s5781_s6 + $0x64] ss:$16 sps:$4 sm:$0xff]  }
 0x102   :  { %v332_v15 = vadd.f32 %v3798_v14, %v4383_v52  ;;  %v323_v16 = vpop.f32.mrb[21].mxu0  ;;  %v3980_v9 = vld [vmem:[%s5781_s6 + $0xa4] ss:$16 sps:$4 sm:$0xff]  }
 0x103   :  { %599 = vmatmul.mubr.bf16.gmra.mrb[48].mxu0 %v4439_v38  ;;  %1321 = vmatmul.mubr.bf16.gmra.mrb[16].mxu1 %v4439_v38  ;;  %v324_v17 = vadd.f32 %v4383_v52, %v323_v16  ;;  %v3799_v18 = vpop.f32.mrb[22].mxu0  ;;  %v3983_v10 = vld [vmem:[%s5781_s6 + $0xc4] ss:$16 sps:$4 sm:$0xff]  }
 0x104   :  { %608 = vmatprep.mubr.bf16.mxu0 %v4155_v50  ;;  %1330 = vmatprep.mubr.bf16.mxu1 %v4155_v50  ;;  %v392_v21 = vmax.f32 %v332_v15, 0.0  ;;  %v335_v22 = vadd.f32 %v3799_v18, %v4383_v52  ;;  %v326_v23 = vpop.f32.mrb[23].mxu0  ;;  %v3986_v11 = vld [vmem:[%s5781_s6 + $0xe4] ss:$16 sps:$4 sm:$0xff]  }
 0x105   :  { %v390_v24 = vmax.f32 %v324_v17, 0.0  ;;  %v327_v25 = vadd.f32 %v4383_v52, %v326_v23  ;;  %v3989_v14 = vld [vmem:[%s5781_s6 + $0x104] ss:$16 sps:$4 sm:$0xff]   ;;  %v3996_v23 = vld [vmem:[%s5781_s6 + $0x160] ss:$16 sps:$4 sm:$0xff]  }
 0x106   :  { %v393_v26 = vmax.f32 %v335_v22, 0.0  ;;  %v3992_v15 = vld [vmem:[%s5781_s6 + $0x124] ss:$16 sps:$4 sm:$0xff]  }
 0x107   :  { %v391_v27 = vmax.f32 %v327_v25, 0.0  ;;  %v3995_v16 = vld [vmem:[%s5781_s6 + $0x144] ss:$16 sps:$4 sm:$0xff]  }
 0x108   :  { %v4494_v28 = vpack.c.bf16 %v393_v26, %v392_v21  ;;  %v434_v21 = vld [vmem:[%s5782_s4] sm:$0x3] }
 0x109   :  { %v4496_v29 = vpack.c.bf16 %v391_v27, %v390_v24  ;;  %v3802_v30 = vpop.f32.mrb[24].mxu0  ;;  %v4001_v24 = vld [vmem:[%s5781_s6 + $0x184] ss:$16 sps:$4 sm:$0xff]  }
 0x10a   :  { %v348_v31 = vadd.f32 %v3802_v30, %v4383_v52  ;;  %v339_v32 = vpop.f32.mrb[25].mxu0  ;;  %v3999_v30 = vld [vmem:[%s5781_s6 + $0x180] ss:$16 sps:$4 sm:$0xff]  }
 0x10b   :  { %609 = vmatmul.mubr.bf16.gmra.mrb[52].mxu0 %v4437_v37  ;;  %1331 = vmatmul.mubr.bf16.gmra.mrb[20].mxu1 %v4437_v37  ;;  %v340_v33 = vadd.f32 %v4383_v52, %v339_v32  ;;  %v3803_v34 = vpop.f32.mrb[26].mxu0 }
 0x10c   :  { %618 = vmatprep.mubr.bf16.mxu0 %v4155_v50  ;;  %1340 = vmatprep.mubr.bf16.mxu1 %v4155_v50  ;;  %v396_v35 = vmax.f32 %v348_v31, 0.0  ;;  %v351_v36 = vadd.f32 %v3803_v34, %v4383_v52  ;;  %v342_v39 = vpop.f32.mrb[27].mxu0 }
 0x10d   :  { %v394_v40 = vmax.f32 %v340_v33, 0.0  ;;  %v343_v41 = vadd.f32 %v4383_v52, %v342_v39 }
 0x10e   :  { %v397_v42 = vmax.f32 %v351_v36, 0.0 }
 0x10f   :  { %v395_v43 = vmax.f32 %v343_v41, 0.0 }
 0x110   :  { %v4506_v44 = vpack.c.bf16 %v397_v42, %v396_v35 }
 0x111   :  { %v4508_v45 = vpack.c.bf16 %v395_v43, %v394_v40  ;;  %v3806_v46 = vpop.f32.mrb[28].mxu0 }
 0x112   :  { %v364_v47 = vadd.f32 %v3806_v46, %v4383_v52  ;;  %v355_v48 = vpop.f32.mrb[29].mxu0  ;;  %v4004_v46 = vld [vmem:[%s5781_s6 + $0x1a4] ss:$16 sps:$4 sm:$0xff]  }
 0x113   :  { %619 = vmatmul.mubr.bf16.gmra.mrb[56].mxu0 %v4463_v58  ;;  %1341 = vmatmul.mubr.bf16.gmra.mrb[24].mxu1 %v4463_v58  ;;  %v356_v49 = vadd.f32 %v4383_v52, %v355_v48  ;;  %v3807_v51 = vpop.f32.mrb[30].mxu0  ;;  %v4002_v48 = vld [vmem:[%s5781_s6 + $0x1a0] ss:$16 sps:$4 sm:$0xff]  }
 0x114   :  { %628 = vmatprep.mubr.bf16.mxu0 %v4155_v50  ;;  %1350 = vmatprep.mubr.bf16.mxu1 %v4155_v50  ;;  %v400_v53 = vmax.f32 %v364_v47, 0.0  ;;  %v367_v54 = vadd.f32 %v3807_v51, %v4383_v52  ;;  %v358_v55 = vpop.f32.mrb[31].mxu0 }
 0x115   :  { %v398_v56 = vmax.f32 %v356_v49, 0.0  ;;  %v359_v59 = vadd.f32 %v4383_v52, %v358_v55  ;;  %v3965_v52 = vld [vmem:[%s5781_s6 + $0x4] ss:$16 sps:$4 sm:$0xff]  }
 0x116   :  { %v401_v60 = vmax.f32 %v367_v54, 0.0  ;;  %1920 = vmatprep.subr.bf16.mxu0 %v3965_v52  ;;  %v4007_v55 = vld [vmem:[%s5781_s6 + $0x1c4] ss:$16 sps:$4 sm:$0xff]  }
 0x117   :  { %v399_v61 = vmax.f32 %v359_v59, 0.0 }
 0x118   :  { %v4518_v62 = vpack.c.bf16 %v401_v60, %v400_v53 }
 0x119   :  { %v4520_v63 = vpack.c.bf16 %v399_v61, %v398_v56  ;;  %v4005_v61 = vld [vmem:[%s5781_s6 + $0x1c0] ss:$16 sps:$4 sm:$0xff]  }
 0x11b   :  { %629 = vmatmul.mubr.bf16.gmra.mrb[60].mxu0 %v4461_v57  ;;  %1351 = vmatmul.mubr.bf16.gmra.mrb[28].mxu1 %v4461_v57 }
 0x11c   :  { %638 = vmatprep.mubr.bf16.mxu0 %v4155_v50  ;;  %1360 = vmatprep.mubr.bf16.mxu1 %v4155_v50 }
 0x123   :  { %639 = vmatmul.mubr.bf16.gmra.mrb[64].mxu0 %v4484_v13  ;;  %1361 = vmatmul.mubr.bf16.gmra.mrb[32].mxu1 %v4484_v13 }
 0x124   :  { %648 = vmatprep.mubr.bf16.mxu0 %v4155_v50  ;;  %1370 = vmatprep.mubr.bf16.mxu1 %v4155_v50 }
 0x12b   :  { %649 = vmatmul.mubr.bf16.gmra.mrb[68].mxu0 %v4482_v12  ;;  %1371 = vmatmul.mubr.bf16.gmra.mrb[36].mxu1 %v4482_v12 }
 0x12c   :  { %658 = vmatprep.mubr.bf16.mxu0 %v4155_v50  ;;  %1380 = vmatprep.mubr.bf16.mxu1 %v4155_v50 }
 0x133   :  { %659 = vmatmul.mubr.bf16.gmra.mrb[72].mxu0 %v4496_v29  ;;  %1381 = vmatmul.mubr.bf16.gmra.mrb[40].mxu1 %v4496_v29 }
 0x134   :  { %668 = vmatprep.mubr.bf16.mxu0 %v4155_v50  ;;  %1390 = vmatprep.mubr.bf16.mxu1 %v4155_v50 }
 0x13b   :  { %669 = vmatmul.mubr.bf16.gmra.mrb[76].mxu0 %v4494_v28  ;;  %1391 = vmatmul.mubr.bf16.gmra.mrb[44].mxu1 %v4494_v28 }
 0x13c   :  { %678 = vmatprep.mubr.bf16.mxu0 %v4155_v50  ;;  %1400 = vmatprep.mubr.bf16.mxu1 %v4155_v50 }
 0x143   :  { %679 = vmatmul.mubr.bf16.gmra.mrb[80].mxu0 %v4508_v45  ;;  %1401 = vmatmul.mubr.bf16.gmra.mrb[48].mxu1 %v4508_v45 }
 0x144   :  { %688 = vmatprep.mubr.bf16.mxu0 %v4155_v50  ;;  %1410 = vmatprep.mubr.bf16.mxu1 %v4155_v50 }
 0x14b   :  { %689 = vmatmul.mubr.bf16.gmra.mrb[84].mxu0 %v4506_v44  ;;  %1411 = vmatmul.mubr.bf16.gmra.mrb[52].mxu1 %v4506_v44 }
 0x14c   :  { %698 = vmatprep.mubr.bf16.mxu0 %v4155_v50  ;;  %1420 = vmatprep.mubr.bf16.mxu1 %v4155_v50 }
 0x153   :  { %699 = vmatmul.mubr.bf16.gmra.mrb[88].mxu0 %v4520_v63  ;;  %1421 = vmatmul.mubr.bf16.gmra.mrb[56].mxu1 %v4520_v63 }
 0x154   :  { %708 = vmatprep.mubr.bf16.mxu0 %v4155_v50  ;;  %1430 = vmatprep.mubr.bf16.mxu1 %v4155_v50 }
 0x15b   :  { %709 = vmatmul.mubr.bf16.gmra.mrb[92].mxu0 %v4518_v62  ;;  %1431 = vmatmul.mubr.bf16.gmra.mrb[60].mxu1 %v4518_v62 }
 0x15c   :  { %1087 = vmatprep.mubr.bf16.mxu0 %v4155_v50 }
 0x163   :  { %1088 = vmatmul.mubr.bf16.vlgmr.msra.gmra.mrb[96].mxu0 %v4391_v2  ;;  %v3972_v2 = vld [vmem:[%s5781_s6 + $0x60] ss:$16 sps:$4 sm:$0xff]  }
 0x164   :  { %1097 = vmatprep.mubr.bf16.mxu0 %v4155_v50  ;;  %1921 = vmatpush1.bf16.msra.mxu0 %v3963_v0 }
 0x165   :  { %1922 = vmatprep.subr.bf16.mxu0 %v3968_v4 }
 0x168   :  { %1923 = vmatpush1.bf16.msra.mxu0 %v3966_v3 }
 0x169   :  { %1924 = vmatprep.subr.bf16.mxu0 %v3971_v6 }
 0x16b   :  { %1098 = vmatmul.mubr.bf16.gmra.mrb[100].mxu0 %v4389_v1  ;;  %v3975_v1 = vld [vmem:[%s5781_s6 + $0x80] ss:$16 sps:$4 sm:$0xff]  }
 0x16c   :  { %1107 = vmatprep.mubr.bf16.mxu0 %v4155_v50  ;;  %1925 = vmatpush1.bf16.msra.mxu0 %v3969_v5 }
 0x16d   :  { %1926 = vmatprep.subr.bf16.mxu0 %v3974_v7  ;;  %v4008_v7 = vld [vmem:[%s5781_s6 + $0x1e0] ss:$16 sps:$4 sm:$0xff]  }
 0x170   :  { %1927 = vmatpush1.bf16.msra.mxu0 %v3972_v2 }
 0x171   :  { %1928 = vmatprep.subr.bf16.mxu0 %v3977_v8  ;;  %v4010_v8 = vld [vmem:[%s5781_s6 + $0x1e4] ss:$16 sps:$4 sm:$0xff]  }
 0x173   :  { %1108 = vmatmul.mubr.bf16.gmra.mrb[104].mxu0 %v4415_v20  ;;  %v3978_v20 = vld [vmem:[%s5781_s6 + $0xa0] ss:$16 sps:$4 sm:$0xff]  }
 0x174   :  { %1117 = vmatprep.mubr.bf16.mxu0 %v4155_v50  ;;  %1929 = vmatpush1.bf16.msra.mxu0 %v3975_v1 }
 0x175   :  { %1930 = vmatprep.subr.bf16.mxu0 %v3980_v9 }
 0x178   :  { %1931 = vmatpush1.bf16.msra.mxu0 %v3978_v20 }
 0x179   :  { %1932 = vmatprep.subr.bf16.mxu0 %v3983_v10 }
 0x17b   :  { %1118 = vmatmul.mubr.bf16.gmra.mrb[108].mxu0 %v4413_v19  ;;  %v3981_v19 = vld [vmem:[%s5781_s6 + $0xc0] ss:$16 sps:$4 sm:$0xff]  }
 0x17c   :  { %1127 = vmatprep.mubr.bf16.mxu0 %v4155_v50  ;;  %1933 = vmatpush1.bf16.msra.mxu0 %v3981_v19 }
 0x17d   :  { %1934 = vmatprep.subr.bf16.mxu0 %v3986_v11 }
 0x183   :  { %1128 = vmatmul.mubr.bf16.gmra.mrb[112].mxu0 %v4439_v38  ;;  %v3984_v38 = vld [vmem:[%s5781_s6 + $0xe0] ss:$16 sps:$4 sm:$0xff]  }
 0x184   :  { %1137 = vmatprep.mubr.bf16.mxu0 %v4155_v50  ;;  %1935 = vmatpush1.bf16.msra.mxu0 %v3984_v38 }
 0x185   :  { %1936 = vmatprep.subr.bf16.mxu0 %v3989_v14 }
 0x18b   :  { %1138 = vmatmul.mubr.bf16.gmra.mrb[116].mxu0 %v4437_v37  ;;  %v3987_v37 = vld [vmem:[%s5781_s6 + $0x100] ss:$16 sps:$4 sm:$0xff]  }
 0x18c   :  { %1147 = vmatprep.mubr.bf16.mxu0 %v4155_v50  ;;  %1937 = vmatpush1.bf16.msra.mxu0 %v3987_v37 }
 0x18d   :  { %1938 = vmatprep.subr.bf16.mxu0 %v3992_v15 }
 0x193   :  { %1148 = vmatmul.mubr.bf16.gmra.mrb[120].mxu0 %v4463_v58  ;;  %v3990_v58 = vld [vmem:[%s5781_s6 + $0x120] ss:$16 sps:$4 sm:$0xff]  }
 0x194   :  { %1157 = vmatprep.mubr.bf16.mxu0 %v4155_v50  ;;  %1939 = vmatpush1.bf16.msra.mxu0 %v3990_v58 }
 0x195   :  { %1940 = vmatprep.subr.bf16.mxu0 %v3995_v16 }
 0x19b   :  { %1158 = vmatmul.mubr.bf16.gmra.mrb[124].mxu0 %v4461_v57  ;;  %v3993_v57 = vld [vmem:[%s5781_s6 + $0x140] ss:$16 sps:$4 sm:$0xff]  }
 0x19c   :  { %1167 = vmatprep.mubr.bf16.mxu0 %v4155_v50  ;;  %1941 = vmatpush1.bf16.msra.mxu0 %v3993_v57 }
 0x1a3   :  { %1168 = vmatmul.mubr.bf16.gmra.mrb[128].mxu0 %v4484_v13  ;;  %v436_v13 = vlaneseq }
 0x1a4   :  { %1177 = vmatprep.mubr.bf16.mxu0 %v4155_v50 }
 0x1a5   :  { %v4643_v17 = vshrl.u32 %v436_v13, 7 }
 0x1a7   :  { %v4646_v18 = vsub.s32 0, %v4643_v17  ;;  %v4652_v22 = vsub.s32 1, %v4643_v17 }
 0x1a9   :  { %5799 = vst [vmem:[#allocation2_spill] sm:$0xff] %v4646_v18  ;;  %5800 = vst [vmem:[#allocation3_spill] sm:$0xff] %v4652_v22  ;;  %v4666_v25 = vrot.slane %v434_v21, %v4646_v18 }
 0x1ab   :  { %1178 = vmatmul.mubr.bf16.gmra.mrb[132].mxu0 %v4482_v12  ;;  %v3998_v12 = vld [vmem:[%s5781_s6 + $0x164] ss:$16 sps:$4 sm:$0xff]  }
 0x1ac   :  { %1187 = vmatprep.mubr.bf16.mxu0 %v4155_v50  ;;  %1942 = vmatprep.subr.bf16.mxu0 %v3998_v12 }
 0x1ad   :  { %1943 = vmatpush1.bf16.msra.mxu0 %v3996_v23 }
 0x1ae   :  { %1944 = vmatprep.subr.bf16.mxu0 %v4001_v24 }
 0x1b1   :  { %1945 = vmatpush1.bf16.msra.mxu0 %v3999_v30 }
 0x1b2   :  { %1946 = vmatprep.subr.bf16.mxu0 %v4004_v46 }
 0x1b3   :  { %1188 = vmatmul.mubr.bf16.gmra.mrb[136].mxu0 %v4496_v29  ;;  %v4671_v29 = vrot.slane %v434_v21, %v4652_v22 }
 0x1b4   :  { %1197 = vmatprep.mubr.bf16.mxu0 %v4155_v50 }
 0x1b5   :  { %1947 = vmatpush1.bf16.msra.mxu0 %v4002_v48 }
 0x1b6   :  { %v560_v26 = vpop.f32.mrb[32].mxu0  ;;  %v4668_v27 = vpop.f32.mrb[0].mxu1  ;;  %1948 = vmatprep.subr.bf16.mxu0 %v4007_v55 }
 0x1b7   :  { %5801 = vst [vmem:[#allocation4_spill] sm:$0xff] %v4668_v27  ;;  %v562_v31 = vpop.f32.mrb[33].mxu0  ;;  %v4676_v32 = vpop.f32.mrb[1].mxu1  ;;  %v561_v35 = vadd.f32 %v560_v26, %v4666_v25  ;;  %v4082_v27 = vld [vmem:[%s5783_s8 + $0x74] ss:$8 sps:$4 sm:$0xff]  }
 0x1b8   :  { %5802 = vst [vmem:[#allocation5_spill] sm:$0xff] %v4676_v32  ;;  %v564_v33 = vpop.f32.mrb[34].mxu0  ;;  %v4678_v34 = vpop.f32.mrb[2].mxu1  ;;  %v563_v41 = vadd.f32 %v562_v31, %v4671_v29  ;;  %v4080_v32 = vld [vmem:[%s5783_s8 + $0x70] ss:$8 sps:$4 sm:$0xff]  }
 0x1b9   :  { %5803 = vst [vmem:[#allocation6_spill] sm:$0xff] %v4678_v34  ;;  %v565_v36 = vadd.f32 %v564_v33, %v4666_v25  ;;  %v566_v39 = vpop.f32.mrb[35].mxu0  ;;  %v4682_v40 = vpop.f32.mrb[3].mxu1  ;;  %1949 = vmatpush1.bf16.msra.mxu0 %v4005_v61  ;;  %v4079_v34 = vld [vmem:[%s5783_s8 + $0x64] ss:$8 sps:$4 sm:$0xff]  }
 0x1ba   :  { %5804 = vst [vmem:[#allocation7_spill] sm:$0xff] %v4682_v40  ;;  %v567_v42 = vadd.f32 %v566_v39, %v4671_v29  ;;  %1950 = vmatprep.subr.bf16.mxu0 %v4010_v8 }
 0x1bb   :  { %v719_v43 = vmax.f32 %v561_v35, %v565_v36  ;;  %1198 = vmatmul.mubr.bf16.gmra.mrb[140].mxu0 %v4494_v28 }
 0x1bc   :  { %v728_v47 = vmax.f32 %v563_v41, %v567_v42  ;;  %1207 = vmatprep.mubr.bf16.mxu0 %v4155_v50 }
 0x1bd   :  { %1951 = vmatpush1.bf16.msra.mxu0 %v4008_v7 }
 0x1be   :  { %v570_v49 = vpop.f32.mrb[36].mxu0  ;;  %v4694_v51 = vpop.f32.mrb[4].mxu1 }
 0x1bf   :  { %5805 = vst [vmem:[#allocation8_spill] sm:$0xff] %v4694_v51  ;;  %v571_v53 = vadd.f32 %v570_v49, %v4666_v25  ;;  %v572_v54 = vpop.f32.mrb[37].mxu0  ;;  %v4697_v28 = vpop.f32.mrb[5].mxu1 }
 0x1c0   :  { %5806 = vst [vmem:[#allocation9_spill] sm:$0xff] %v4697_v28  ;;  %v573_v56 = vadd.f32 %v572_v54, %v4671_v29  ;;  %v574_v59 = vpop.f32.mrb[38].mxu0  ;;  %v4703_v60 = vpop.f32.mrb[6].mxu1  ;;  %v4077_v28 = vld [vmem:[%s5783_s8 + $0x60] ss:$8 sps:$4 sm:$0xff]  }
 0x1c1   :  { %5807 = vst [vmem:[#allocation10_spill] sm:$0xff] %v4703_v60  ;;  %v720_v52 = vmax.f32 %v719_v43, %v571_v53  ;;  %v575_v0 = vadd.f32 %v574_v59, %v4666_v25  ;;  %v576_v3 = vpop.f32.mrb[39].mxu0  ;;  %v4709_v4 = vpop.f32.mrb[7].mxu1 }
 0x1c2   :  { %5808 = vst [vmem:[#allocation11_spill] sm:$0xff] %v4709_v4  ;;  %v729_v5 = vmax.f32 %v728_v47, %v573_v56  ;;  %v577_v6 = vadd.f32 %v576_v3, %v4671_v29 }
 0x1c3   :  { %v721_v2 = vmax.f32 %v720_v52, %v575_v0  ;;  %1208 = vmatmul.mubr.bf16.gmra.mrb[144].mxu0 %v4508_v45  ;;  %v4013_v45 = vld [vmem:[%s5781_s6 + $0xc] ss:$16 sps:$4 sm:$0xff]  }
 0x1c4   :  { %v730_v1 = vmax.f32 %v729_v5, %v577_v6  ;;  %1217 = vmatprep.mubr.bf16.mxu0 %v4155_v50  ;;  %1961 = vmatprep.subr.bf16.mxu0 %v4013_v45 }
 0x1c5   :  { %v722_v10 = vrot.slane %v721_v2, 4 }
 0x1c6   :  { %v580_v20 = vpop.f32.mrb[40].mxu0  ;;  %v4720_v9 = vpop.f32.mrb[8].mxu1  ;;  %v731_v11 = vrot.slane %v730_v1, 4 }
 0x1c7   :  { %5809 = vst [vmem:[#allocation12_spill] sm:$0xff] %v4720_v9  ;;  %v582_v19 = vpop.f32.mrb[41].mxu0  ;;  %v4722_v38 = vpop.f32.mrb[9].mxu1  ;;  %v581_v58 = vadd.f32 %v580_v20, %v4666_v25  ;;  %v723_v12 = vmax.f32 %v721_v2, %v722_v10 }
 0x1c8   :  { %5810 = vst [vmem:[#allocation13_spill] sm:$0xff] %v4722_v38  ;;  %v584_v14 = vpop.f32.mrb[42].mxu0  ;;  %v4727_v37 = vpop.f32.mrb[10].mxu1  ;;  %v583_v13 = vadd.f32 %v582_v19, %v4671_v29  ;;  %v732_v24 = vmax.f32 %v730_v1, %v731_v11 }
 0x1c9   :  { %5811 = vst [vmem:[#allocation14_spill] sm:$0xff] %v4727_v37  ;;  %v585_v15 = vadd.f32 %v584_v14, %v4666_v25  ;;  %v586_v16 = vpop.f32.mrb[43].mxu0  ;;  %v4731_v57 = vpop.f32.mrb[11].mxu1  ;;  %v724_v33 = vrot.slane %v723_v12, 2 }
 0x1ca   :  { %5812 = vst [vmem:[#allocation15_spill] sm:$0xff] %v4731_v57  ;;  %v587_v21 = vadd.f32 %v586_v16, %v4671_v29  ;;  %v733_v41 = vrot.slane %v732_v24, 2 }
 0x1cb   :  { %v737_v23 = vmax.f32 %v581_v58, %v585_v15  ;;  %1218 = vmatmul.mubr.bf16.gmra.mrb[148].mxu0 %v4506_v44  ;;  %v725_v55 = vmax.f32 %v723_v12, %v724_v33 }
 0x1cc   :  { %v746_v26 = vmax.f32 %v583_v13, %v587_v21  ;;  %1227 = vmatprep.mubr.bf16.mxu0 %v4155_v50  ;;  %v734_v59 = vmax.f32 %v732_v24, %v733_v41 }
 0x1cd   :  { %v726_v6 = vrot.slane %v725_v55, 1 }
 0x1ce   :  { %v590_v30 = vpop.f32.mrb[44].mxu0  ;;  %v4737_v31 = vpop.f32.mrb[12].mxu1  ;;  %v735_v1 = vrot.slane %v734_v59, 1 }
 0x1cf   :  { %5813 = vst [vmem:[#allocation16_spill] sm:$0xff] %v4737_v31  ;;  %v591_v35 = vadd.f32 %v590_v30, %v4666_v25  ;;  %v592_v36 = vpop.f32.mrb[45].mxu0  ;;  %v4740_v39 = vpop.f32.mrb[13].mxu1  ;;  %v727_v13 = vmax.f32 %v725_v55, %v726_v6 }
 0x1d0   :  { %5814 = vst [vmem:[#allocation17_spill] sm:$0xff] %v4740_v39  ;;  %v593_v42 = vadd.f32 %v592_v36, %v4671_v29  ;;  %v594_v43 = vpop.f32.mrb[46].mxu0  ;;  %v4743_v46 = vpop.f32.mrb[14].mxu1 }
 0x1d1   :  { %5815 = vst [vmem:[#allocation18_spill] sm:$0xff] %v4743_v46  ;;  %v738_v44 = vmax.f32 %v737_v23, %v591_v35  ;;  %v595_v47 = vadd.f32 %v594_v43, %v4666_v25  ;;  %v596_v48 = vpop.f32.mrb[47].mxu0  ;;  %v4746_v49 = vpop.f32.mrb[15].mxu1  ;;  %v736_v23 = vmax.f32 %v734_v59, %v735_v1  ;;  %v1441_v41 = vpack.c.bf16 %v727_v13, %v727_v13 }
 0x1d2   :  { %5816 = vst [vmem:[#allocation19_spill] sm:$0xff] %v4746_v49  ;;  %v747_v53 = vmax.f32 %v746_v26, %v593_v42  ;;  %v597_v54 = vadd.f32 %v596_v48, %v4671_v29 }
 0x1d3   :  { %v739_v56 = vmax.f32 %v738_v44, %v595_v47  ;;  %1228 = vmatmul.mubr.bf16.gmra.mrb[152].mxu0 %v4520_v63  ;;  %v1442_v48 = vpack.c.bf16 %v736_v23, %v736_v23 }
 0x1d4   :  { %v748_v61 = vmax.f32 %v747_v53, %v597_v54  ;;  %1237 = vmatprep.mubr.bf16.mxu0 %v4155_v50 }
 0x1d5   :  { %v740_v52 = vrot.slane %v739_v56, 4 }
 0x1d6   :  { %v749_v0 = vrot.slane %v748_v61, 4  ;;  %v600_v3 = vpop.f32.mrb[48].mxu0  ;;  %v4751_v5 = vpop.f32.mrb[16].mxu1 }
 0x1d7   :  { %5817 = vst [vmem:[#allocation20_spill] sm:$0xff] %v4751_v5  ;;  %v741_v2 = vmax.f32 %v739_v56, %v740_v52  ;;  %v602_v7 = vpop.f32.mrb[49].mxu0  ;;  %v4753_v8 = vpop.f32.mrb[17].mxu1  ;;  %v601_v45 = vadd.f32 %v600_v3, %v4666_v25 }
 0x1d8   :  { %5818 = vst [vmem:[#allocation21_spill] sm:$0xff] %v4753_v8  ;;  %v750_v20 = vmax.f32 %v748_v61, %v749_v0  ;;  %v604_v10 = vpop.f32.mrb[50].mxu0  ;;  %v4755_v19 = vpop.f32.mrb[18].mxu1  ;;  %v603_v15 = vadd.f32 %v602_v7, %v4671_v29  ;;  %v1559_v7 = vunpack.c.l.b16 %v1441_v41 }
 0x1d9   :  { %5819 = vst [vmem:[#allocation22_spill] sm:$0xff] %v4755_v19  ;;  %v742_v63 = vrot.slane %v741_v2, 2  ;;  %v605_v50 = vadd.f32 %v604_v10, %v4666_v25  ;;  %v606_v11 = vpop.f32.mrb[51].mxu0  ;;  %v4759_v14 = vpop.f32.mrb[19].mxu1  ;;  %v1560_v10 = vunpack.c.l.b16 %v1442_v48  ;;  %v4055_v19 = vld [vmem:[%s5781_s6 + $0x1cc] ss:$16 sps:$4 sm:$0xff]  }
 0x1da   :  { %5820 = vst [vmem:[#allocation23_spill] sm:$0xff] %v4759_v14  ;;  %v751_v58 = vrot.slane %v750_v20, 2  ;;  %v607_v16 = vadd.f32 %v606_v11, %v4671_v29  ;;  %v4053_v14 = vld [vmem:[%s5781_s6 + $0x1c8] ss:$16 sps:$4 sm:$0xff]  }
 0x1db   :  { %v743_v21 = vmax.f32 %v741_v2, %v742_v63  ;;  %v755_v12 = vmax.f32 %v601_v45, %v605_v50  ;;  %1238 = vmatmul.mubr.bf16.gmra.mrb[156].mxu0 %v4518_v62 }
 0x1dc   :  { %v752_v24 = vmax.f32 %v750_v20, %v751_v58  ;;  %v764_v26 = vmax.f32 %v603_v15, %v607_v16 }
 0x1dd   :  { %v744_v30 = vrot.slane %v743_v21, 1 }
 0x1de   :  { %v753_v33 = vrot.slane %v752_v24, 1  ;;  %v610_v35 = vpop.f32.mrb[52].mxu0  ;;  %v4764_v36 = vpop.f32.mrb[20].mxu1 }
 0x1df   :  { %5821 = vst [vmem:[#allocation24_spill] sm:$0xff] %v4764_v36  ;;  %v745_v42 = vmax.f32 %v743_v21, %v744_v30  ;;  %v611_v43 = vadd.f32 %v610_v35, %v4666_v25  ;;  %v612_v44 = vpop.f32.mrb[53].mxu0  ;;  %v4767_v47 = vpop.f32.mrb[21].mxu1 }
 0x1e0   :  { %5822 = vst [vmem:[#allocation25_spill] sm:$0xff] %v4767_v47  ;;  %v754_v53 = vmax.f32 %v752_v24, %v753_v33  ;;  %v613_v54 = vadd.f32 %v612_v44, %v4671_v29  ;;  %v614_v62 = vpop.f32.mrb[54].mxu0  ;;  %v4770_v55 = vpop.f32.mrb[22].mxu1 }
 0x1e1   :  { %5823 = vst [vmem:[#allocation26_spill] sm:$0xff] %v4770_v55  ;;  %v1443_v56 = vpack.c.bf16 %v745_v42, %v745_v42  ;;  %v756_v59 = vmax.f32 %v755_v12, %v611_v43  ;;  %v615_v61 = vadd.f32 %v614_v62, %v4666_v25  ;;  %v616_v52 = vpop.f32.mrb[55].mxu0  ;;  %v4773_v0 = vpop.f32.mrb[23].mxu1  ;;  %v4049_v55 = vld [vmem:[%s5781_s6 + $0x18c] ss:$16 sps:$4 sm:$0xff]  }
 0x1e2   :  { %5824 = vst [vmem:[#allocation27_spill] sm:$0xff] %v4773_v0  ;;  %v1444_v3 = vpack.c.bf16 %v754_v53, %v754_v53  ;;  %v765_v6 = vmax.f32 %v764_v26, %v613_v54  ;;  %v617_v2 = vadd.f32 %v616_v52, %v4671_v29  ;;  %v4047_v0 = vld [vmem:[%s5781_s6 + $0x188] ss:$16 sps:$4 sm:$0xff]  }
 0x1e3   :  { %v1561_v1 = vunpack.c.l.b16 %v1443_v56  ;;  %v757_v20 = vmax.f32 %v756_v59, %v615_v61 }
 0x1e4   :  { %v1562_v63 = vunpack.c.l.b16 %v1444_v3  ;;  %v766_v45 = vmax.f32 %v765_v6, %v617_v2 }
 0x1e5   :  { %v1576_v50 = vsel %vm1575_vm2, %v1561_v1, %v1559_v7  ;;  %v758_v11 = vrot.slane %v757_v20, 4 }
 0x1e6   :  { %v1589_v58 = vsel %vm1575_vm2, %v1562_v63, %v1560_v10  ;;  %v767_v15 = vrot.slane %v766_v45, 4  ;;  %v620_v16 = vpop.f32.mrb[56].mxu0  ;;  %v4778_v13 = vpop.f32.mrb[24].mxu1 }
 0x1e7   :  { %5825 = vst [vmem:[#allocation28_spill] sm:$0xff] %v4778_v13  ;;  %v759_v21 = vmax.f32 %v757_v20, %v758_v11  ;;  %v622_v12 = vpop.f32.mrb[57].mxu0  ;;  %v4780_v23 = vpop.f32.mrb[25].mxu1  ;;  %v621_v35 = vadd.f32 %v620_v16, %v4666_v25 }
 0x1e8   :  { %5826 = vst [vmem:[#allocation29_spill] sm:$0xff] %v4780_v23  ;;  %v768_v24 = vmax.f32 %v766_v45, %v767_v15  ;;  %v624_v26 = vpop.f32.mrb[58].mxu0  ;;  %v4782_v30 = vpop.f32.mrb[26].mxu1  ;;  %v623_v48 = vadd.f32 %v622_v12, %v4671_v29 }
 0x1e9   :  { %5827 = vst [vmem:[#allocation30_spill] sm:$0xff] %v4782_v30  ;;  %v760_v33 = vrot.slane %v759_v21, 2  ;;  %v625_v41 = vadd.f32 %v624_v26, %v4666_v25  ;;  %v626_v42 = vpop.f32.mrb[59].mxu0  ;;  %v4786_v43 = vpop.f32.mrb[27].mxu1  ;;  %v4043_v30 = vld [vmem:[%s5781_s6 + $0x14c] ss:$16 sps:$4 sm:$0xff]  }
 0x1ea   :  { %5828 = vst [vmem:[#allocation31_spill] sm:$0xff] %v4786_v43  ;;  %v769_v44 = vrot.slane %v768_v24, 2  ;;  %v627_v53 = vadd.f32 %v626_v42, %v4671_v29  ;;  %v4041_v43 = vld [vmem:[%s5781_s6 + $0x148] ss:$16 sps:$4 sm:$0xff]  }
 0x1eb   :  { %v761_v54 = vmax.f32 %v759_v21, %v760_v33  ;;  %v773_v62 = vmax.f32 %v621_v35, %v625_v41 }
 0x1ec   :  { %v770_v56 = vmax.f32 %v768_v24, %v769_v44  ;;  %v782_v59 = vmax.f32 %v623_v48, %v627_v53 }
 0x1ed   :  { %v762_v61 = vrot.slane %v761_v54, 1 }
 0x1ee   :  { %v771_v52 = vrot.slane %v770_v56, 1  ;;  %v630_v3 = vpop.f32.mrb[60].mxu0  ;;  %v4790_v6 = vpop.f32.mrb[28].mxu1 }
 0x1ef   :  { %5829 = vst [vmem:[#allocation32_spill] sm:$0xff] %v4790_v6  ;;  %v763_v2 = vmax.f32 %v761_v54, %v762_v61  ;;  %v631_v7 = vadd.f32 %v630_v3, %v4666_v25  ;;  %v632_v1 = vpop.f32.mrb[61].mxu0  ;;  %v4793_v20 = vpop.f32.mrb[29].mxu1 }
 0x1f0   :  { %5830 = vst [vmem:[#allocation33_spill] sm:$0xff] %v4793_v20  ;;  %v772_v10 = vmax.f32 %v770_v56, %v771_v52  ;;  %v633_v63 = vadd.f32 %v632_v1, %v4671_v29  ;;  %v634_v45 = vpop.f32.mrb[62].mxu0  ;;  %v4796_v11 = vpop.f32.mrb[30].mxu1 }
 0x1f1   :  { %5831 = vst [vmem:[#allocation34_spill] sm:$0xff] %v4796_v11  ;;  %v1445_v15 = vpack.c.bf16 %v763_v2, %v763_v2  ;;  %v774_v16 = vmax.f32 %v773_v62, %v631_v7  ;;  %v635_v21 = vadd.f32 %v634_v45, %v4666_v25  ;;  %v636_v12 = vpop.f32.mrb[63].mxu0  ;;  %v4799_v24 = vpop.f32.mrb[31].mxu1  ;;  %v4037_v11 = vld [vmem:[%s5781_s6 + $0x10c] ss:$16 sps:$4 sm:$0xff]  }
 0x1f2   :  { %5832 = vst [vmem:[#allocation35_spill] sm:$0xff] %v4799_v24  ;;  %v1446_v26 = vpack.c.bf16 %v772_v10, %v772_v10  ;;  %v783_v33 = vmax.f32 %v782_v59, %v633_v63  ;;  %v637_v35 = vadd.f32 %v636_v12, %v4671_v29  ;;  %v4035_v24 = vld [vmem:[%s5781_s6 + $0x108] ss:$16 sps:$4 sm:$0xff]  }
 0x1f3   :  { %v1563_v41 = vunpack.c.l.b16 %v1445_v15  ;;  %v775_v42 = vmax.f32 %v774_v16, %v635_v21 }
 0x1f4   :  { %v1564_v44 = vunpack.c.l.b16 %v1446_v26  ;;  %v784_v48 = vmax.f32 %v783_v33, %v637_v35 }
 0x1f5   :  { %v1578_v53 = vsel %vm1577_vm3, %v1563_v41, %v1576_v50  ;;  %v776_v54 = vrot.slane %v775_v42, 4 }
 0x1f6   :  { %v1590_v56 = vsel %vm1577_vm3, %v1564_v44, %v1589_v58  ;;  %v785_v62 = vrot.slane %v784_v48, 4  ;;  %v640_v61 = vpop.f32.mrb[64].mxu0  ;;  %v4804_v52 = vpop.f32.mrb[32].mxu1 }
 0x1f7   :  { %5833 = vst [vmem:[#allocation36_spill] sm:$0xff] %v4804_v52  ;;  %v777_v3 = vmax.f32 %v775_v42, %v776_v54  ;;  %v642_v2 = vpop.f32.mrb[65].mxu0  ;;  %v4806_v7 = vpop.f32.mrb[33].mxu1  ;;  %v641_v45 = vadd.f32 %v640_v61, %v4666_v25 }
 0x1f8   :  { %5834 = vst [vmem:[#allocation37_spill] sm:$0xff] %v4806_v7  ;;  %v786_v59 = vmax.f32 %v784_v48, %v785_v62  ;;  %v644_v1 = vpop.f32.mrb[66].mxu0  ;;  %v4808_v10 = vpop.f32.mrb[34].mxu1  ;;  %v643_v21 = vadd.f32 %v642_v2, %v4671_v29 }
 0x1f9   :  { %5835 = vst [vmem:[#allocation38_spill] sm:$0xff] %v4808_v10  ;;  %v778_v63 = vrot.slane %v777_v3, 2  ;;  %v645_v50 = vadd.f32 %v644_v1, %v4666_v25  ;;  %v646_v15 = vpop.f32.mrb[67].mxu0  ;;  %v4812_v16 = vpop.f32.mrb[35].mxu1 }
 0x1fa   :  { %5836 = vst [vmem:[#allocation39_spill] sm:$0xff] %v4812_v16  ;;  %v787_v58 = vrot.slane %v786_v59, 2  ;;  %v647_v12 = vadd.f32 %v646_v15, %v4671_v29 }
 0x1fb   :  { %v779_v26 = vmax.f32 %v777_v3, %v778_v63  ;;  %v791_v33 = vmax.f32 %v641_v45, %v645_v50 }
 0x1fc   :  { %v788_v35 = vmax.f32 %v786_v59, %v787_v58  ;;  %v800_v41 = vmax.f32 %v643_v21, %v647_v12 }
 0x1fd   :  { %v780_v42 = vrot.slane %v779_v26, 1 }
 0x1fe   :  { %v789_v44 = vrot.slane %v788_v35, 1  ;;  %v650_v48 = vpop.f32.mrb[68].mxu0  ;;  %v4816_v54 = vpop.f32.mrb[36].mxu1 }
 0x1ff   :  { %5837 = vst [vmem:[#allocation40_spill] sm:$0xff] %v4816_v54  ;;  %v781_v62 = vmax.f32 %v779_v26, %v780_v42  ;;  %v651_v61 = vadd.f32 %v650_v48, %v4666_v25  ;;  %v652_v1 = vpop.f32.mrb[69].mxu0  ;;  %v4819_v10 = vpop.f32.mrb[37].mxu1 }
 0x200   :  { %5838 = vst [vmem:[#allocation41_spill] sm:$0xff] %v4819_v10  ;;  %v790_v52 = vmax.f32 %v788_v35, %v789_v44  ;;  %v653_v2 = vadd.f32 %v652_v1, %v4671_v29  ;;  %v654_v16 = vpop.f32.mrb[70].mxu0  ;;  %v4822_v15 = vpop.f32.mrb[38].mxu1 }
 0x201   :  { %5839 = vst [vmem:[#allocation42_spill] sm:$0xff] %v4822_v15  ;;  %v1447_v3 = vpack.c.bf16 %v781_v62, %v781_v62  ;;  %v792_v59 = vmax.f32 %v791_v33, %v651_v61  ;;  %v655_v63 = vadd.f32 %v654_v16, %v4666_v25  ;;  %v656_v45 = vpop.f32.mrb[71].mxu0  ;;  %v4825_v50 = vpop.f32.mrb[39].mxu1 }
 0x202   :  { %5840 = vst [vmem:[#allocation43_spill] sm:$0xff] %v4825_v50  ;;  %v1448_v58 = vpack.c.bf16 %v790_v52, %v790_v52  ;;  %v801_v21 = vmax.f32 %v800_v41, %v653_v2  ;;  %v657_v12 = vadd.f32 %v656_v45, %v4671_v29 }
 0x203   :  { %v1565_v26 = vunpack.c.l.b16 %v1447_v3  ;;  %v793_v42 = vmax.f32 %v792_v59, %v655_v63 }
 0x204   :  { %v1566_v35 = vunpack.c.l.b16 %v1448_v58  ;;  %v802_v44 = vmax.f32 %v801_v21, %v657_v12 }
 0x205   :  { %v1580_v48 = vsel %vm1579_vm4, %v1565_v26, %v1578_v53  ;;  %v794_v1 = vrot.slane %v793_v42, 4 }
 0x206   :  { %v803_v15 = vrot.slane %v802_v44, 4  ;;  %v660_v62 = vpop.f32.mrb[72].mxu0  ;;  %v4829_v33 = vpop.f32.mrb[40].mxu1  ;;  %v1591_v16 = vsel %vm1579_vm4, %v1566_v35, %v1590_v56 }
 0x207   :  { %5841 = vst [vmem:[#allocation44_spill] sm:$0xff] %v4829_v33  ;;  %v795_v61 = vmax.f32 %v793_v42, %v794_v1  ;;  %v662_v54 = vpop.f32.mrb[73].mxu0  ;;  %v4832_v50 = vpop.f32.mrb[41].mxu1  ;;  %v661_v59 = vadd.f32 %v660_v62, %v4666_v25 }
 0x208   :  { %5842 = vst [vmem:[#allocation45_spill] sm:$0xff] %v4832_v50  ;;  %v804_v52 = vmax.f32 %v802_v44, %v803_v15  ;;  %v664_v41 = vpop.f32.mrb[74].mxu0  ;;  %v4834_v2 = vpop.f32.mrb[42].mxu1  ;;  %v663_v21 = vadd.f32 %v662_v54, %v4671_v29 }
 0x209   :  { %5843 = vst [vmem:[#allocation46_spill] sm:$0xff] %v4834_v2  ;;  %v796_v3 = vrot.slane %v795_v61, 2  ;;  %v665_v53 = vadd.f32 %v664_v41, %v4666_v25  ;;  %v666_v63 = vpop.f32.mrb[75].mxu0  ;;  %v4838_v45 = vpop.f32.mrb[43].mxu1 }
 0x20a   :  { %5844 = vst [vmem:[#allocation47_spill] sm:$0xff] %v4838_v45  ;;  %v805_v58 = vrot.slane %v804_v52, 2  ;;  %v667_v56 = vadd.f32 %v666_v63, %v4671_v29 }
 0x20b   :  { %v797_v12 = vmax.f32 %v795_v61, %v796_v3  ;;  %v809_v26 = vmax.f32 %v661_v59, %v665_v53 }
 0x20c   :  { %v806_v42 = vmax.f32 %v804_v52, %v805_v58  ;;  %v818_v15 = vmax.f32 %v663_v21, %v667_v56 }
 0x20d   :  { %v798_v35 = vrot.slane %v797_v12, 1 }
 0x20e   :  { %v807_v44 = vrot.slane %v806_v42, 1  ;;  %v670_v1 = vpop.f32.mrb[76].mxu0  ;;  %v4842_v2 = vpop.f32.mrb[44].mxu1 }
 0x20f   :  { %5845 = vst [vmem:[#allocation48_spill] sm:$0xff] %v4842_v2  ;;  %v799_v62 = vmax.f32 %v797_v12, %v798_v35  ;;  %v671_v41 = vadd.f32 %v670_v1, %v4666_v25  ;;  %v672_v33 = vpop.f32.mrb[77].mxu0  ;;  %v4845_v50 = vpop.f32.mrb[45].mxu1 }
 0x210   :  { %5846 = vst [vmem:[#allocation49_spill] sm:$0xff] %v4845_v50  ;;  %v808_v45 = vmax.f32 %v806_v42, %v807_v44  ;;  %v673_v54 = vadd.f32 %v672_v33, %v4671_v29  ;;  %v674_v10 = vpop.f32.mrb[78].mxu0  ;;  %v4848_v63 = vpop.f32.mrb[46].mxu1 }
 0x211   :  { %5847 = vst [vmem:[#allocation50_spill] sm:$0xff] %v4848_v63  ;;  %v1449_v61 = vpack.c.bf16 %v799_v62, %v799_v62  ;;  %v810_v52 = vmax.f32 %v809_v26, %v671_v41  ;;  %v675_v3 = vadd.f32 %v674_v10, %v4666_v25  ;;  %v676_v59 = vpop.f32.mrb[79].mxu0  ;;  %v4851_v53 = vpop.f32.mrb[47].mxu1 }
 0x212   :  { %5848 = vst [vmem:[#allocation51_spill] sm:$0xff] %v4851_v53  ;;  %v1450_v58 = vpack.c.bf16 %v808_v45, %v808_v45  ;;  %v819_v21 = vmax.f32 %v818_v15, %v673_v54  ;;  %v677_v56 = vadd.f32 %v676_v59, %v4671_v29 }
 0x213   :  { %v1567_v12 = vunpack.c.l.b16 %v1449_v61  ;;  %v811_v35 = vmax.f32 %v810_v52, %v675_v3 }
 0x214   :  { %v1568_v42 = vunpack.c.l.b16 %v1450_v58  ;;  %v820_v44 = vmax.f32 %v819_v21, %v677_v56 }
 0x215   :  { %v1582_v33 = vsel %vm1581_vm5, %v1567_v12, %v1580_v48  ;;  %v812_v1 = vrot.slane %v811_v35, 4 }
 0x216   :  { %v821_v63 = vrot.slane %v820_v44, 4  ;;  %v680_v62 = vpop.f32.mrb[80].mxu0  ;;  %v4855_v26 = vpop.f32.mrb[48].mxu1  ;;  %v1592_v10 = vsel %vm1581_vm5, %v1568_v42, %v1591_v16 }
 0x217   :  { %5849 = vst [vmem:[#allocation52_spill] sm:$0xff] %v4855_v26  ;;  %v813_v41 = vmax.f32 %v811_v35, %v812_v1  ;;  %v682_v2 = vpop.f32.mrb[81].mxu0  ;;  %v4858_v53 = vpop.f32.mrb[49].mxu1  ;;  %v681_v52 = vadd.f32 %v680_v62, %v4666_v25 }
 0x218   :  { %5850 = vst [vmem:[#allocation53_spill] sm:$0xff] %v4858_v53  ;;  %v822_v45 = vmax.f32 %v820_v44, %v821_v63  ;;  %v684_v15 = vpop.f32.mrb[82].mxu0  ;;  %v4860_v54 = vpop.f32.mrb[50].mxu1  ;;  %v683_v21 = vadd.f32 %v682_v2, %v4671_v29 }
 0x219   :  { %5851 = vst [vmem:[#allocation54_spill] sm:$0xff] %v4860_v54  ;;  %v814_v61 = vrot.slane %v813_v41, 2  ;;  %v685_v48 = vadd.f32 %v684_v15, %v4666_v25  ;;  %v686_v3 = vpop.f32.mrb[83].mxu0  ;;  %v4864_v59 = vpop.f32.mrb[51].mxu1 }
 0x21a   :  { %5852 = vst [vmem:[#allocation55_spill] sm:$0xff] %v4864_v59  ;;  %v823_v58 = vrot.slane %v822_v45, 2  ;;  %v687_v16 = vadd.f32 %v686_v3, %v4671_v29 }
 0x21b   :  { %v815_v56 = vmax.f32 %v813_v41, %v814_v61  ;;  %v827_v12 = vmax.f32 %v681_v52, %v685_v48 }
 0x21c   :  { %v824_v35 = vmax.f32 %v822_v45, %v823_v58  ;;  %v836_v63 = vmax.f32 %v683_v21, %v687_v16 }
 0x21d   :  { %v816_v42 = vrot.slane %v815_v56, 1 }
 0x21e   :  { %v825_v44 = vrot.slane %v824_v35, 1  ;;  %v690_v1 = vpop.f32.mrb[84].mxu0  ;;  %v4868_v54 = vpop.f32.mrb[52].mxu1 }
 0x21f   :  { %5853 = vst [vmem:[#allocation56_spill] sm:$0xff] %v4868_v54  ;;  %v817_v62 = vmax.f32 %v815_v56, %v816_v42  ;;  %v691_v15 = vadd.f32 %v690_v1, %v4666_v25  ;;  %v692_v26 = vpop.f32.mrb[85].mxu0  ;;  %v4871_v53 = vpop.f32.mrb[53].mxu1 }
 0x220   :  { %5854 = vst [vmem:[#allocation57_spill] sm:$0xff] %v4871_v53  ;;  %v826_v59 = vmax.f32 %v824_v35, %v825_v44  ;;  %v693_v2 = vadd.f32 %v692_v26, %v4671_v29  ;;  %v694_v50 = vpop.f32.mrb[86].mxu0  ;;  %v4874_v3 = vpop.f32.mrb[54].mxu1 }
 0x221   :  { %5855 = vst [vmem:[#allocation58_spill] sm:$0xff] %v4874_v3  ;;  %v1451_v41 = vpack.c.bf16 %v817_v62, %v817_v62  ;;  %v828_v45 = vmax.f32 %v827_v12, %v691_v15  ;;  %v695_v61 = vadd.f32 %v694_v50, %v4666_v25  ;;  %v696_v52 = vpop.f32.mrb[87].mxu0  ;;  %v4877_v48 = vpop.f32.mrb[55].mxu1 }
 0x222   :  { %5856 = vst [vmem:[#allocation59_spill] sm:$0xff] %v4877_v48  ;;  %v1452_v58 = vpack.c.bf16 %v826_v59, %v826_v59  ;;  %v837_v21 = vmax.f32 %v836_v63, %v693_v2  ;;  %v697_v16 = vadd.f32 %v696_v52, %v4671_v29 }
 0x223   :  { %v1569_v56 = vunpack.c.l.b16 %v1451_v41  ;;  %v829_v42 = vmax.f32 %v828_v45, %v695_v61 }
 0x224   :  { %v1570_v35 = vunpack.c.l.b16 %v1452_v58  ;;  %v838_v44 = vmax.f32 %v837_v21, %v697_v16 }
 0x225   :  { %v830_v26 = vrot.slane %v829_v42, 4  ;;  %v1584_v1 = vsel %vm1583_vm6, %v1569_v56, %v1582_v33 }
 0x226   :  { %v839_v3 = vrot.slane %v838_v44, 4  ;;  %v700_v62 = vpop.f32.mrb[88].mxu0  ;;  %v4881_v12 = vpop.f32.mrb[56].mxu1  ;;  %v1593_v50 = vsel %vm1583_vm6, %v1570_v35, %v1592_v10 }
 0x227   :  { %5857 = vst [vmem:[#allocation60_spill] sm:$0xff] %v4881_v12  ;;  %v831_v15 = vmax.f32 %v829_v42, %v830_v26  ;;  %v702_v54 = vpop.f32.mrb[89].mxu0  ;;  %v4884_v59 = vpop.f32.mrb[57].mxu1  ;;  %v701_v45 = vadd.f32 %v700_v62, %v4666_v25 }
 0x228   :  { %5858 = vst [vmem:[#allocation61_spill] sm:$0xff] %v4884_v59  ;;  %v840_v63 = vmax.f32 %v838_v44, %v839_v3  ;;  %v704_v2 = vpop.f32.mrb[90].mxu0  ;;  %v4886_v52 = vpop.f32.mrb[58].mxu1  ;;  %v703_v16 = vadd.f32 %v702_v54, %v4671_v29 }
 0x229   :  { %5859 = vst [vmem:[#allocation62_spill] sm:$0xff] %v4886_v52  ;;  %v832_v41 = vrot.slane %v831_v15, 2  ;;  %v705_v61 = vadd.f32 %v704_v2, %v4666_v25  ;;  %v706_v33 = vpop.f32.mrb[91].mxu0  ;;  %v4890_v58 = vpop.f32.mrb[59].mxu1 }
 0x22a   :  { %5860 = vst [vmem:[#allocation63_spill] sm:$0xff] %v4890_v58  ;;  %v841_v21 = vrot.slane %v840_v63, 2  ;;  %v707_v10 = vadd.f32 %v706_v33, %v4671_v29 }
 0x22b   :  { %v833_v56 = vmax.f32 %v831_v15, %v832_v41  ;;  %v845_v42 = vmax.f32 %v701_v45, %v705_v61 }
 0x22c   :  { %v842_v35 = vmax.f32 %v840_v63, %v841_v21  ;;  %v854_v3 = vmax.f32 %v703_v16, %v707_v10  ;;  %v4059_v10 = vld [vmem:[%s5783_s8] ss:$8 sps:$4 sm:$0xff]  }
 0x22d   :  { %v834_v44 = vrot.slane %v833_v56, 1 }
 0x22e   :  { %v843_v26 = vrot.slane %v842_v35, 1  ;;  %v710_v52 = vpop.f32.mrb[92].mxu0  ;;  %v4894_v12 = vpop.f32.mrb[60].mxu1 }
 0x22f   :  { %5861 = vst [vmem:[#allocation64_spill] sm:$0xff] %v4894_v12  ;;  %v835_v62 = vmax.f32 %v833_v56, %v834_v44  ;;  %v711_v2 = vadd.f32 %v710_v52, %v4666_v25  ;;  %v712_v59 = vpop.f32.mrb[93].mxu0  ;;  %v4897_v48 = vpop.f32.mrb[61].mxu1  ;;  %v4031_v12 = vld [vmem:[%s5781_s6 + $0xcc] ss:$16 sps:$4 sm:$0xff]  }
 0x230   :  { %5862 = vst [vmem:[#allocation65_spill] sm:$0xff] %v4897_v48  ;;  %v844_v58 = vmax.f32 %v842_v35, %v843_v26  ;;  %v713_v54 = vadd.f32 %v712_v59, %v4671_v29  ;;  %v714_v53 = vpop.f32.mrb[94].mxu0  ;;  %v4900_v33 = vpop.f32.mrb[62].mxu1  ;;  %v4029_v48 = vld [vmem:[%s5781_s6 + $0xc8] ss:$16 sps:$4 sm:$0xff]  }
 0x231   :  { %5863 = vst [vmem:[#allocation66_spill] sm:$0xff] %v4900_v33  ;;  %v1453_v15 = vpack.c.bf16 %v835_v62, %v835_v62  ;;  %v846_v63 = vmax.f32 %v845_v42, %v711_v2  ;;  %v715_v41 = vadd.f32 %v714_v53, %v4666_v25  ;;  %v716_v45 = vpop.f32.mrb[95].mxu0  ;;  %v4903_v61 = vpop.f32.mrb[63].mxu1  ;;  %v4061_v42 = vld [vmem:[%s5783_s8 + $0x4] ss:$8 sps:$4 sm:$0xff]  }
 0x232   :  { %5864 = vst [vmem:[#allocation67_spill] sm:$0xff] %v4903_v61  ;;  %v1454_v21 = vpack.c.bf16 %v844_v58, %v844_v58  ;;  %v855_v16 = vmax.f32 %v854_v3, %v713_v54  ;;  %v717_v52 = vadd.f32 %v716_v45, %v4671_v29  ;;  %v4064_v53 = vld [vmem:[%s5783_s8 + $0x14] ss:$8 sps:$4 sm:$0xff]   ;;  %2938 = vmatprep.subr.bf16.mxu1 %v4061_v42  ;;  %v4062_v62 = vld [vmem:[%s5783_s8 + $0x10] ss:$8 sps:$4 sm:$0xff]  }
 0x233   :  { %v1571_v59 = vunpack.c.l.b16 %v1453_v15  ;;  %v847_v56 = vmax.f32 %v846_v63, %v715_v41  ;;  %2939 = vmatpush1.bf16.msra.mxu1 %v4059_v10  ;;  %v4067_v15 = vld [vmem:[%s5783_s8 + $0x24] ss:$8 sps:$4 sm:$0xff]  }
 0x234   :  { %v1572_v35 = vunpack.c.l.b16 %v1454_v21  ;;  %v856_v25 = vmax.f32 %v855_v16, %v717_v52  ;;  %2940 = vmatprep.subr.bf16.mxu1 %v4064_v53  ;;  %v4065_v21 = vld [vmem:[%s5783_s8 + $0x20] ss:$8 sps:$4 sm:$0xff]   ;;  %v4070_v16 = vld [vmem:[%s5783_s8 + $0x34] ss:$8 sps:$4 sm:$0xff]   ;;  %v4073_v42 = vld [vmem:[%s5783_s8 + $0x44] ss:$8 sps:$4 sm:$0xff]  }
 0x235   :  { %v848_v58 = vrot.slane %v847_v56, 4  ;;  %v1586_v29 = vsel %vm1585_vm7, %v1571_v59, %v1584_v1  ;;  %v4068_v59 = vld [vmem:[%s5783_s8 + $0x30] ss:$8 sps:$4 sm:$0xff]  }
 0x236   :  { %v857_v3 = vrot.slane %v856_v25, 4  ;;  %v4916_v44 = vpop.f32.mrb[96].mxu0  ;;  %v1594_v26 = vsel %vm1585_vm7, %v1572_v35, %v1593_v50 }
 0x237   :  { %v849_v2 = vmax.f32 %v847_v56, %v848_v58  ;;  %v4922_v54 = vpop.f32.mrb[97].mxu0  ;;  %2941 = vmatpush1.bf16.msra.mxu1 %v4062_v62 }
 0x238   :  { %v858_v1 = vmax.f32 %v856_v25, %v857_v3  ;;  %v4927_v63 = vpop.f32.mrb[98].mxu0  ;;  %2942 = vmatprep.subr.bf16.mxu1 %v4067_v15 }
 0x239   :  { %v850_v41 = vrot.slane %v849_v2, 2  ;;  %v4929_v45 = vpop.f32.mrb[99].mxu0 }
 0x23a   :  { %v859_v50 = vrot.slane %v858_v1, 2 }
 0x23b   :  { %v851_v52 = vmax.f32 %v849_v2, %v850_v41  ;;  %2943 = vmatpush1.bf16.msra.mxu1 %v4065_v21  ;;  %v4071_v2 = vld [vmem:[%s5783_s8 + $0x40] ss:$8 sps:$4 sm:$0xff]   ;;  %v4076_v41 = vld [vmem:[%s5783_s8 + $0x54] ss:$8 sps:$4 sm:$0xff]  }
 0x23c   :  { %v860_v10 = vmax.f32 %v858_v1, %v859_v50  ;;  %2944 = vmatprep.subr.bf16.mxu1 %v4070_v16 }
 0x23d   :  { %v852_v56 = vrot.slane %v851_v52, 1 }
 0x23e   :  { %v861_v35 = vrot.slane %v860_v10, 1  ;;  %v4943_v25 = vpop.f32.mrb[100].mxu0 }
 0x23f   :  { %v853_v53 = vmax.f32 %v851_v52, %v852_v56  ;;  %v4945_v58 = vpop.f32.mrb[101].mxu0  ;;  %2945 = vmatpush1.bf16.msra.mxu1 %v4068_v59  ;;  %v4074_v52 = vld [vmem:[%s5783_s8 + $0x50] ss:$8 sps:$4 sm:$0xff]   ;;  %v4016_v59 = vld [vmem:[%s5781_s6 + $0x2c] ss:$16 sps:$4 sm:$0xff]  }
 0x240   :  { %v862_v3 = vmax.f32 %v860_v10, %v861_v35  ;;  %v4947_v62 = vpop.f32.mrb[102].mxu0  ;;  %2946 = vmatprep.subr.bf16.mxu1 %v4073_v42  ;;  %v4011_v10 = vld [vmem:[%s5781_s6 + $0x8] ss:$16 sps:$4 sm:$0xff]  }
 0x241   :  { %v1455_v15 = vpack.c.bf16 %v853_v53, %v853_v53  ;;  %v4952_v1 = vpop.f32.mrb[103].mxu0 }
 0x242   :  { %v1456_v50 = vpack.c.bf16 %v862_v3, %v862_v3 }
 0x243   :  { %v1573_v21 = vunpack.c.l.b16 %v1455_v15  ;;  %2947 = vmatpush1.bf16.msra.mxu1 %v4071_v2 }
 0x244   :  { %v1574_v16 = vunpack.c.l.b16 %v1456_v50  ;;  %2948 = vmatprep.subr.bf16.mxu1 %v4076_v41 }
 0x245   :  { %v1588_v56 = vsel %vm1587_vm8, %v1573_v21, %v1586_v29  ;;  %v4014_v29 = vld [vmem:[%s5781_s6 + $0x28] ss:$16 sps:$4 sm:$0xff]  }
 0x246   :  { %v4964_v35 = vpop.f32.mrb[104].mxu0  ;;  %v1595_v53 = vsel %vm1587_vm8, %v1574_v16, %v1594_v26  ;;  %v4974_v50 = vpack.c.b16 %v1588_v56, %v1588_v56  ;;  %v4019_v26 = vld [vmem:[%s5781_s6 + $0x4c] ss:$16 sps:$4 sm:$0xff]   ;;  %v4017_v21 = vld [vmem:[%s5781_s6 + $0x48] ss:$16 sps:$4 sm:$0xff]  }
 0x247   :  { %v4970_v42 = vpop.f32.mrb[105].mxu0  ;;  %v1597_v3 = vpack.c.b16 %v1595_v53, %v1595_v53  ;;  %2949 = vmatpush1.bf16.msra.mxu1 %v4074_v52  ;;  %v4022_v52 = vld [vmem:[%s5781_s6 + $0x6c] ss:$16 sps:$4 sm:$0xff]   ;;  %v4020_v56 = vld [vmem:[%s5781_s6 + $0x68] ss:$16 sps:$4 sm:$0xff]  }
 0x248   :  { %v4972_v15 = vpop.f32.mrb[106].mxu0  ;;  %v4025_v53 = vld [vmem:[%s5781_s6 + $0x8c] ss:$16 sps:$4 sm:$0xff]   ;;  %2950 = vmatprep.subr.bf16.mxu1 %v4079_v34  ;;  %v4083_v34 = vld [vmem:[%s5783_s8 + $0x80] ss:$8 sps:$4 sm:$0xff]  }
 0x249   :  { %v4976_v33 = vpop.f32.mrb[107].mxu0  ;;  %1952 = vmatprep.mubr.bf16.mxu0 %v1597_v3 }
 0x24a   :  { %1953 = vmatmul.mubr.bf16.vlgmr.msra.gmra.mrb[160].mxu0 %v4974_v50 }
 0x24b   :  { %1962 = vmatpush1.bf16.msra.mxu0 %v4011_v10  ;;  %1993 = vmatprep.mubr.bf16.mxu0 %v1597_v3 }
 0x24c   :  { %1963 = vmatprep.subr.bf16.mxu0 %v4016_v59  ;;  %2951 = vmatpush1.bf16.msra.mxu1 %v4077_v28  ;;  %v4088_v28 = vld [vmem:[%s5783_s8 + $0x94] ss:$8 sps:$4 sm:$0xff]  }
 0x24d   :  { %2952 = vmatprep.subr.bf16.mxu1 %v4082_v27  ;;  %v4086_v27 = vld [vmem:[%s5783_s8 + $0x90] ss:$8 sps:$4 sm:$0xff]  }
 0x24e   :  { %v4985_v2 = vpop.f32.mrb[108].mxu0 }
 0x24f   :  { %1964 = vmatpush1.bf16.msra.mxu0 %v4014_v29  ;;  %v4987_v41 = vpop.f32.mrb[109].mxu0  ;;  %v4023_v29 = vld [vmem:[%s5781_s6 + $0x88] ss:$16 sps:$4 sm:$0xff]  }
 0x250   :  { %v4992_v16 = vpop.f32.mrb[110].mxu0  ;;  %1965 = vmatprep.subr.bf16.mxu0 %v4019_v26  ;;  %2953 = vmatpush1.bf16.msra.mxu1 %v4080_v32  ;;  %v4091_v32 = vld [vmem:[%s5783_s8 + $0xa4] ss:$8 sps:$4 sm:$0xff]  }
 0x251   :  { %v4997_v10 = vpop.f32.mrb[111].mxu0 }
 0x253   :  { %1966 = vmatpush1.bf16.msra.mxu0 %v4017_v21  ;;  %v4028_v21 = vld [vmem:[%s5781_s6 + $0xac] ss:$16 sps:$4 sm:$0xff]  }
 0x254   :  { %1967 = vmatprep.subr.bf16.mxu0 %v4022_v52 }
 0x256   :  { %v5005_v59 = vpop.f32.mrb[112].mxu0 }
 0x257   :  { %1968 = vmatpush1.bf16.msra.mxu0 %v4020_v56  ;;  %v5007_v3 = vpop.f32.mrb[113].mxu0  ;;  %v4026_v56 = vld [vmem:[%s5781_s6 + $0xa8] ss:$16 sps:$4 sm:$0xff]  }
 0x258   :  { %v5012_v26 = vpop.f32.mrb[114].mxu0  ;;  %1969 = vmatprep.subr.bf16.mxu0 %v4025_v53 }
 0x259   :  { %v5017_v52 = vpop.f32.mrb[115].mxu0 }
 0x25b   :  { %1970 = vmatpush1.bf16.msra.mxu0 %v4023_v29  ;;  %v4034_v29 = vld [vmem:[%s5781_s6 + $0xec] ss:$16 sps:$4 sm:$0xff]  }
 0x25c   :  { %1971 = vmatprep.subr.bf16.mxu0 %v4028_v21 }
 0x25e   :  { %v5025_v61 = vpop.f32.mrb[116].mxu0 }
 0x25f   :  { %1972 = vmatpush1.bf16.msra.mxu0 %v4026_v56  ;;  %v5027_v53 = vpop.f32.mrb[117].mxu0  ;;  %v4032_v56 = vld [vmem:[%s5781_s6 + $0xe8] ss:$16 sps:$4 sm:$0xff]  }
 0x260   :  { %v5032_v7 = vpop.f32.mrb[118].mxu0  ;;  %1973 = vmatprep.subr.bf16.mxu0 %v4031_v12 }
 0x261   :  { %v5037_v21 = vpop.f32.mrb[119].mxu0 }
 0x263   :  { %1974 = vmatpush1.bf16.msra.mxu0 %v4029_v48  ;;  %v4040_v48 = vld [vmem:[%s5781_s6 + $0x12c] ss:$16 sps:$4 sm:$0xff]  }
 0x264   :  { %1975 = vmatprep.subr.bf16.mxu0 %v4034_v29 }
 0x266   :  { %v5045_v6 = vpop.f32.mrb[120].mxu0 }
 0x267   :  { %1976 = vmatpush1.bf16.msra.mxu0 %v4032_v56  ;;  %v5047_v12 = vpop.f32.mrb[121].mxu0  ;;  %v4038_v56 = vld [vmem:[%s5781_s6 + $0x128] ss:$16 sps:$4 sm:$0xff]  }
 0x268   :  { %v5052_v20 = vpop.f32.mrb[122].mxu0  ;;  %1977 = vmatprep.subr.bf16.mxu0 %v4037_v11 }
 0x269   :  { %v5057_v29 = vpop.f32.mrb[123].mxu0 }
 0x26b   :  { %1978 = vmatpush1.bf16.msra.mxu0 %v4035_v24  ;;  %v4046_v24 = vld [vmem:[%s5781_s6 + $0x16c] ss:$16 sps:$4 sm:$0xff]  }
 0x26c   :  { %1979 = vmatprep.subr.bf16.mxu0 %v4040_v48 }
 0x26e   :  { %v5065_v13 = vpop.f32.mrb[124].mxu0 }
 0x26f   :  { %1980 = vmatpush1.bf16.msra.mxu0 %v4038_v56  ;;  %v5067_v11 = vpop.f32.mrb[125].mxu0  ;;  %v4044_v56 = vld [vmem:[%s5781_s6 + $0x168] ss:$16 sps:$4 sm:$0xff]  }
 0x270   :  { %v5072_v23 = vpop.f32.mrb[126].mxu0  ;;  %1981 = vmatprep.subr.bf16.mxu0 %v4043_v30 }
 0x271   :  { %v5077_v48 = vpop.f32.mrb[127].mxu0 }
 0x273   :  { %1982 = vmatpush1.bf16.msra.mxu0 %v4041_v43  ;;  %v4052_v43 = vld [vmem:[%s5781_s6 + $0x1ac] ss:$16 sps:$4 sm:$0xff]  }
 0x274   :  { %1983 = vmatprep.subr.bf16.mxu0 %v4046_v24 }
 0x276   :  { %v5085_v36 = vpop.f32.mrb[128].mxu0 }
 0x277   :  { %5865 = vst [vmem:[#allocation68_spill] sm:$0xff] %v5085_v36  ;;  %1984 = vmatpush1.bf16.msra.mxu0 %v4044_v56  ;;  %v5087_v30 = vpop.f32.mrb[129].mxu0  ;;  %v4050_v56 = vld [vmem:[%s5781_s6 + $0x1a8] ss:$16 sps:$4 sm:$0xff]  }
 0x278   :  { %v5092_v47 = vpop.f32.mrb[130].mxu0  ;;  %1985 = vmatprep.subr.bf16.mxu0 %v4049_v55 }
 0x279   :  { %5866 = vst [vmem:[#allocation69_spill] sm:$0xff] %v5092_v47  ;;  %v5097_v24 = vpop.f32.mrb[131].mxu0 }
 0x27b   :  { %1986 = vmatpush1.bf16.msra.mxu0 %v4047_v0  ;;  %v4058_v0 = vld [vmem:[%s5781_s6 + $0x1ec] ss:$16 sps:$4 sm:$0xff]  }
 0x27c   :  { %1987 = vmatprep.subr.bf16.mxu0 %v4052_v43 }
 0x27e   :  { %v5105_v5 = vpop.f32.mrb[132].mxu0 }
 0x27f   :  { %5867 = vst [vmem:[#allocation70_spill] sm:$0xff] %v5105_v5  ;;  %1988 = vmatpush1.bf16.msra.mxu0 %v4050_v56  ;;  %v5107_v55 = vpop.f32.mrb[133].mxu0  ;;  %v4056_v56 = vld [vmem:[%s5781_s6 + $0x1e8] ss:$16 sps:$4 sm:$0xff]  }
 0x280   :  { %v5112_v8 = vpop.f32.mrb[134].mxu0  ;;  %1989 = vmatprep.subr.bf16.mxu0 %v4055_v19 }
 0x281   :  { %5868 = vst [vmem:[#allocation71_spill] sm:$0xff] %v5112_v8  ;;  %v5117_v43 = vpop.f32.mrb[135].mxu0 }
 0x282   :  { %5869 = vst [vmem:[#allocation72_spill] sm:$0xff] %v5117_v43 }
 0x283   :  { %1990 = vmatpush1.bf16.msra.mxu0 %v4053_v14 }
 0x284   :  { %1991 = vmatprep.subr.bf16.mxu0 %v4058_v0 }
 0x286   :  { %v5122_v46 = vpop.f32.mrb[136].mxu0 }
 0x287   :  { %5870 = vst [vmem:[#allocation73_spill] sm:$0xff] %v5122_v46  ;;  %1992 = vmatpush1.bf16.msra.mxu0 %v4056_v56  ;;  %v5124_v31 = vpop.f32.mrb[137].mxu0 }
 0x288   :  { %5871 = vst [vmem:[#allocation74_spill] sm:$0xff] %v5124_v31  ;;  %v5126_v49 = vpop.f32.mrb[138].mxu0 }
 0x289   :  { %5872 = vst [vmem:[#allocation75_spill] sm:$0xff] %v5126_v49  ;;  %v5128_v19 = vpop.f32.mrb[139].mxu0 }
 0x28a   :  { %5873 = vst [vmem:[#allocation76_spill] sm:$0xff] %v5128_v19  ;;  %1994 = vmatmul.mubr.bf16.vlgmr.msra.gmra.mrb[164].mxu0 %v4974_v50 }
 0x28e   :  { %v5131_v39 = vpop.f32.mrb[140].mxu0 }
 0x28f   :  { %5874 = vst [vmem:[#allocation77_spill] sm:$0xff] %v5131_v39  ;;  %v5133_v37 = vpop.f32.mrb[141].mxu0  ;;  %v5243_v39 = vsub.s32 3, %v4643_v17 }
 0x290   :  { %5875 = vst [vmem:[#allocation78_spill] sm:$0xff] %v5133_v37  ;;  %v5135_v14 = vpop.f32.mrb[142].mxu0 }
 0x291   :  { %5876 = vst [vmem:[#allocation79_spill] sm:$0xff] %v5135_v14  ;;  %v5137_v9 = vpop.f32.mrb[143].mxu0  ;;  %5895 = vst [vmem:[#allocation98_spill] sm:$0xff] %v5243_v39 }
 0x292   :  { %5877 = vst [vmem:[#allocation80_spill] sm:$0xff] %v5137_v9 }
 0x296   :  { %v5139_v0 = vpop.f32.mrb[144].mxu0 }
 0x297   :  { %5878 = vst [vmem:[#allocation81_spill] sm:$0xff] %v5139_v0  ;;  %v5141_v57 = vpop.f32.mrb[145].mxu0 }
 0x298   :  { %5879 = vst [vmem:[#allocation82_spill] sm:$0xff] %v5141_v57  ;;  %v5143_v56 = vpop.f32.mrb[146].mxu0  ;;  %v5240_v57 = vsub.s32 2, %v4643_v17 }
 0x299   :  { %5880 = vst [vmem:[#allocation83_spill] sm:$0xff] %v5143_v56  ;;  %v5145_v38 = vpop.f32.mrb[147].mxu0 }
 0x29a   :  { %5881 = vst [vmem:[#allocation84_spill] sm:$0xff] %v5145_v38  ;;  %5894 = vst [vmem:[#allocation97_spill] sm:$0xff] %v5240_v57 }
 0x29e   :  { %v5147_v60 = vpop.f32.mrb[148].mxu0 }
 0x29f   :  { %5882 = vst [vmem:[#allocation85_spill] sm:$0xff] %v5147_v60  ;;  %v5149_v51 = vpop.f32.mrb[149].mxu0  ;;  %v4085_v60 = vld [vmem:[%s5783_s8 + $0x84] ss:$8 sps:$4 sm:$0xff]  }
 0x2a0   :  { %5883 = vst [vmem:[#allocation86_spill] sm:$0xff] %v5149_v51  ;;  %v5151_v50 = vpop.f32.mrb[150].mxu0  ;;  %2954 = vmatprep.subr.bf16.mxu1 %v4085_v60 }
 0x2a1   :  { %5884 = vst [vmem:[#allocation87_spill] sm:$0xff] %v5151_v50  ;;  %v5153_v4 = vpop.f32.mrb[151].mxu0  ;;  %2955 = vmatpush1.bf16.msra.mxu1 %v4083_v34  ;;  %v4089_v34 = vld [vmem:[%s5783_s8 + $0xa0] ss:$8 sps:$4 sm:$0xff]  }
 0x2a2   :  { %5885 = vst [vmem:[#allocation88_spill] sm:$0xff] %v5153_v4  ;;  %2956 = vmatprep.subr.bf16.mxu1 %v4088_v28  ;;  %v4092_v28 = vld [vmem:[%s5783_s8 + $0xb0] ss:$8 sps:$4 sm:$0xff]  }
 0x2a5   :  { %2957 = vmatpush1.bf16.msra.mxu1 %v4086_v27  ;;  %v4095_v27 = vld [vmem:[%s5783_s8 + $0xc0] ss:$8 sps:$4 sm:$0xff]  }
 0x2a6   :  { %v5164_v40 = vpop.f32.mrb[152].mxu0  ;;  %2958 = vmatprep.subr.bf16.mxu1 %v4091_v32  ;;  %v4100_v32 = vld [vmem:[%s5783_s8 + $0xd4] ss:$8 sps:$4 sm:$0xff]  }
 0x2a7   :  { %5886 = vst [vmem:[#allocation89_spill] sm:$0xff] %v5164_v40  ;;  %v5169_v50 = vpop.f32.mrb[153].mxu0 }
 0x2a8   :  { %5887 = vst [vmem:[#allocation90_spill] sm:$0xff] %v5169_v50  ;;  %v5174_v56 = vpop.f32.mrb[154].mxu0 }
 0x2a9   :  { %5888 = vst [vmem:[#allocation91_spill] sm:$0xff] %v5174_v56  ;;  %v5176_v0 = vpop.f32.mrb[155].mxu0  ;;  %2959 = vmatpush1.bf16.msra.mxu1 %v4089_v34  ;;  %v4098_v34 = vld [vmem:[%s5783_s8 + $0xd0] ss:$8 sps:$4 sm:$0xff]  }
 0x2aa   :  { %5889 = vst [vmem:[#allocation92_spill] sm:$0xff] %v5176_v0 }
 0x2ae   :  { %v5184_v40 = vpop.f32.mrb[156].mxu0 }
 0x2af   :  { %5890 = vst [vmem:[#allocation93_spill] sm:$0xff] %v5184_v40  ;;  %v5189_v56 = vpop.f32.mrb[157].mxu0  ;;  %v4094_v40 = vld [vmem:[%s5783_s8 + $0xb4] ss:$8 sps:$4 sm:$0xff]  }
 0x2b0   :  { %5891 = vst [vmem:[#allocation94_spill] sm:$0xff] %v5189_v56  ;;  %v5194_v0 = vpop.f32.mrb[158].mxu0  ;;  %2960 = vmatprep.subr.bf16.mxu1 %v4094_v40  ;;  %v4103_v40 = vld [vmem:[%s5783_s8 + $0xe4] ss:$8 sps:$4 sm:$0xff]  }
 0x2b1   :  { %5892 = vst [vmem:[#allocation95_spill] sm:$0xff] %v5194_v0  ;;  %v5196_v60 = vpop.f32.mrb[159].mxu0  ;;  %v4097_v0 = vld [vmem:[%s5783_s8 + $0xc4] ss:$8 sps:$4 sm:$0xff]   ;;  %2961 = vmatpush1.bf16.msra.mxu1 %v4092_v28  ;;  %v4101_v28 = vld [vmem:[%s5783_s8 + $0xe0] ss:$8 sps:$4 sm:$0xff]  }
 0x2b2   :  { %5893 = vst [vmem:[#allocation96_spill] sm:$0xff] %v5196_v60  ;;  %2962 = vmatprep.subr.bf16.mxu1 %v4097_v0  ;;  %v4106_v0 = vld [vmem:[%s5783_s8 + $0xf4] ss:$8 sps:$4 sm:$0xff]  }
 0x2b5   :  { %2963 = vmatpush1.bf16.msra.mxu1 %v4095_v27  ;;  %v4104_v27 = vld [vmem:[%s5783_s8 + $0xf0] ss:$8 sps:$4 sm:$0xff]  }
 0x2b6   :  { %2964 = vmatprep.subr.bf16.mxu1 %v4100_v32  ;;  %v4109_v32 = vld [vmem:[%s5783_s8 + $0x104] ss:$8 sps:$4 sm:$0xff]  }
 0x2b9   :  { %2965 = vmatpush1.bf16.msra.mxu1 %v4098_v34  ;;  %v1521_v34 = vld [vmem:[%s5784_s7] sm:$0xf] }
 0x2ba   :  { %2966 = vmatprep.subr.bf16.mxu1 %v4103_v40  ;;  %v1526_v60 = vrot.slane %v1521_v34, %v4646_v18  ;;  %v1530_v40 = vrot.slane %v1521_v34, %v4652_v22  ;;  %v1534_v9 = vrot.slane %v1521_v34, %v5240_v57  ;;  %v1538_v46 = vrot.slane %v1521_v34, %v5243_v39 }
 0x2bd   :  { %2967 = vmatpush1.bf16.msra.mxu1 %v4101_v28 }
 0x2be   :  { %2968 = vmatprep.subr.bf16.mxu1 %v4106_v0 }
 0x2c1   :  { %2969 = vmatpush1.bf16.msra.mxu1 %v4104_v27 }
 0x2c2   :  { %3131 = vmatprep.subr.bf16.mxu1 %v4109_v32  ;;  %v4156_v32 = vmov 1966171168  }
 0x2c3   :  { %v2011_v14 = vunpack.c.l.s4 %v4156_v32 }
 0x2c5   :  { %v2012_v49 = vunpack.c.0.s8 %v2011_v14 }
 0x31d   :  { %v1954_v28 = vpop.f32.mrb[160].mxu0 }
 0x31e   :  { %v1955_v56 = vadd.f32 %v1954_v28, %v1526_v60  ;;  %v1956_v50 = vpop.f32.mrb[161].mxu0 }
 0x31f   :  { %v1957_v4 = vadd.f32 %v1956_v50, %v1530_v40  ;;  %v1958_v51 = vpop.f32.mrb[162].mxu0 }
 0x320   :  { %v1959_v0 = vpop.f32.mrb[163].mxu0  ;;  %v2015_v51 = vsub.s32 %v2012_v49, %v4643_v17 }
 0x321   :  { %v2006_v27 = vcombine.low %v1955_v56, %v1957_v4  ;;  %v2007_v38 = vcombine.high %v1955_v56, %v1957_v4 }
 0x323   :  { %v2016_v19 = vrot.slane %v2006_v27, %v2015_v51  ;;  %v2023_v32 = vrot.slane %v2007_v38, %v2015_v51 }
 0x35d   :  { %v1995_v60 = vpop.f32.mrb[164].mxu0 }
 0x35e   :  { %v1996_v28 = vadd.f32 %v1995_v60, %v1534_v9  ;;  %v1997_v50 = vpop.f32.mrb[165].mxu0 }
 0x35f   :  { %v1998_v40 = vadd.f32 %v1997_v50, %v1538_v46  ;;  %v1999_v4 = vpop.f32.mrb[166].mxu0 }
 0x360   :  { %v2000_v56 = vpop.f32.mrb[167].mxu0 }
 0x361   :  { %v2008_v0 = vcombine.low %v1996_v28, %v1998_v40  ;;  %v2009_v37 = vcombine.high %v1996_v28, %v1998_v40 }
 0x363   :  { %v2030_v31 = vrot.slane %v2008_v0, %v2015_v51  ;;  %v2037_v8 = vrot.slane %v2009_v37, %v2015_v51 }
 0x365   :  { %v2038_v5 = vcombine.low %v2016_v19, %v2030_v31  ;;  %v2039_v47 = vcombine.high %v2016_v19, %v2030_v31  ;;  %v2040_v36 = vcombine.low %v2023_v32, %v2037_v8  ;;  %v2041_v14 = vcombine.high %v2023_v32, %v2037_v8 }
 0x367   :  { %v5248_v43 = vrot.slane %v2038_v5, %v2015_v51  ;;  %v5250_v34 = vrot.slane %v2040_v36, %v2015_v51  ;;  %v5252_v9 = vrot.slane %v2039_v47, %v2015_v51  ;;  %v5254_v17 = vrot.slane %v2041_v14, %v2015_v51 }
 0x369   :  { %5896 = vst [vmem:[#allocation99_spill] sm:$0xff] %v5248_v43  ;;  %5897 = vst [vmem:[#allocation100_spill] sm:$0xff] %v5252_v9  ;;  %v5258_v46 = vcombine.high %v5248_v43, %v5248_v43  ;;  %v5262_v38 = vcombine.high %v5250_v34, %v5250_v34  ;;  %v5266_v37 = vcombine.high %v5252_v9, %v5252_v9 }
 0x36a   :  { %v5270_v31 = vcombine.high %v5254_v17, %v5254_v17  ;;  %v2077_v49 = vrot.slane %v5248_v43, %v4646_v18  ;;  %v5276_v5 = vrot.slane %v5248_v43, %v5240_v57  ;;  %v2081_v8 = vrot.slane %v5248_v43, %v4652_v22 }
 0x36b   :  { %5898 = vst [vmem:[#allocation101_spill] sm:$0xff] %v5258_v46  ;;  %v2097_v36 = vrot.slane %v5252_v9, %v4652_v22  ;;  %v2093_v47 = vrot.slane %v5252_v9, %v4646_v18  ;;  %v2113_v19 = vrot.slane %v5258_v46, %v4652_v22  ;;  %v5288_v27 = vrot.slane %v5258_v46, %v4646_v18 }
 0x36c   :  { %5899 = vst [vmem:[#allocation102_spill] sm:$0xff] %v5276_v5  ;;  %v5292_v60 = vrot.slane %v5266_v37, %v4652_v22  ;;  %v2235_v28 = vadd.f32 %v2081_v8, %v4922_v54  ;;  %v2239_v50 = vadd.f32 %v2081_v8, %v4929_v45  ;;  %v2234_v51 = vadd.f32 %v2077_v49, %v4916_v44  ;;  %v4107_v44 = vld [vmem:[%s5783_s8 + $0x100] ss:$8 sps:$4 sm:$0xff]  }
 0x36d   :  { %v2238_v40 = vadd.f32 %v2077_v49, %v4927_v63  ;;  %v2243_v4 = vadd.f32 %v2081_v8, %v4945_v58  ;;  %v2247_v56 = vadd.f32 %v2081_v8, %v4952_v1  ;;  %v2242_v0 = vadd.f32 %v2077_v49, %v4943_v25 }
 0x36e   :  { %v2246_v32 = vadd.f32 %v2077_v49, %v4947_v62  ;;  %v2363_v14 = vmax.f32 %v2235_v28, 0.0  ;;  %v2367_v46 = vmax.f32 %v2239_v50, 0.0  ;;  %v2362_v57 = vmax.f32 %v2234_v51, 0.0  ;;  %v4112_v62 = vld [vmem:[%s5783_s8 + $0x114] ss:$8 sps:$4 sm:$0xff]  }
 0x36f   :  { %v2366_v9 = vmax.f32 %v2238_v40, 0.0  ;;  %v2371_v5 = vmax.f32 %v2243_v4, 0.0  ;;  %v2375_v54 = vmax.f32 %v2247_v56, 0.0  ;;  %v2370_v43 = vmax.f32 %v2242_v0, 0.0 }
 0x370   :  { %v2374_v45 = vmax.f32 %v2246_v32, 0.0  ;;  %v2491_v39 = vpack.c.bf16 %v2367_v46, %v2363_v14  ;;  %v2251_v58 = vadd.f32 %v2097_v36, %v4970_v42  ;;  %v2255_v25 = vadd.f32 %v2097_v36, %v4976_v33 }
 0x371   :  { %v2490_v63 = vpack.c.bf16 %v2366_v9, %v2362_v57  ;;  %v2495_v1 = vpack.c.bf16 %v2375_v54, %v2371_v5  ;;  %v2250_v8 = vadd.f32 %v2093_v47, %v4964_v35  ;;  %v2254_v28 = vadd.f32 %v2093_v47, %v4972_v15  ;;  %v4110_v35 = vld [vmem:[%s5783_s8 + $0x110] ss:$8 sps:$4 sm:$0xff]  }
 0x372   :  { %v2494_v49 = vpack.c.bf16 %v2374_v45, %v2370_v43  ;;  %2970 = vmatprep.mubr.bf16.mxu1 %v2491_v39  ;;  %v2379_v46 = vmax.f32 %v2251_v58, 0.0  ;;  %v2383_v50 = vmax.f32 %v2255_v25, 0.0  ;;  %v2259_v51 = vadd.f32 %v2097_v36, %v4987_v41 }
 0x373   :  { %v2263_v57 = vadd.f32 %v2097_v36, %v4997_v10  ;;  %2971 = vmatmul.mubr.bf16.vlgmr.msra.gmra.mrb[64].mxu1 %v2490_v63  ;;  %v2378_v42 = vmax.f32 %v2250_v8, 0.0  ;;  %v2382_v33 = vmax.f32 %v2254_v28, 0.0  ;;  %v2258_v9 = vadd.f32 %v2093_v47, %v4985_v2  ;;  %v4115_v10 = vld [vmem:[%s5783_s8 + $0x124] ss:$8 sps:$4 sm:$0xff]  }
 0x374   :  { %v2262_v5 = vadd.f32 %v2093_v47, %v4992_v16  ;;  %3132 = vmatpush1.bf16.msra.mxu1 %v4107_v44  ;;  %2980 = vmatprep.mubr.bf16.mxu1 %v2495_v1  ;;  %v2499_v39 = vpack.c.bf16 %v2383_v50, %v2379_v46  ;;  %v2387_v15 = vmax.f32 %v2259_v51, 0.0  ;;  %v2267_v41 = vadd.f32 %v2113_v19, %v5007_v3 }
 0x375   :  { %v2391_v43 = vmax.f32 %v2263_v57, 0.0  ;;  %3133 = vmatprep.subr.bf16.mxu1 %v4112_v62  ;;  %v5323_v36 = vpack.c.bf16 %v2382_v33, %v2378_v42  ;;  %v2386_v2 = vmax.f32 %v2258_v9, 0.0  ;;  %v2271_v47 = vadd.f32 %v2113_v19, %v5017_v52  ;;  %v4113_v52 = vld [vmem:[%s5783_s8 + $0x120] ss:$8 sps:$4 sm:$0xff]  }
 0x376   :  { %v2390_v16 = vmax.f32 %v2262_v5, 0.0  ;;  %v2395_v4 = vmax.f32 %v2267_v41, 0.0  ;;  %v2266_v56 = vadd.f32 %v5288_v27, %v5005_v59  ;;  %v2270_v3 = vadd.f32 %v5288_v27, %v5012_v26 }
 0x377   :  { %v5326_v40 = vpack.c.bf16 %v2391_v43, %v2387_v15  ;;  %v2399_v32 = vmax.f32 %v2271_v47, 0.0  ;;  %v2275_v14 = vadd.f32 %v2113_v19, %v5027_v53  ;;  %v2279_v54 = vadd.f32 %v2113_v19, %v5037_v21  ;;  %v4118_v53 = vld [vmem:[%s5783_s8 + $0x134] ss:$8 sps:$4 sm:$0xff]  }
 0x378   :  { %v5332_v0 = vpack.c.bf16 %v2390_v16, %v2386_v2  ;;  %3134 = vmatpush1.bf16.msra.mxu1 %v4110_v35  ;;  %v2394_v45 = vmax.f32 %v2266_v56, 0.0  ;;  %v2398_v44 = vmax.f32 %v2270_v3, 0.0  ;;  %v2274_v59 = vadd.f32 %v5288_v27, %v5025_v61  ;;  %v5900_v16 = vld [vmem:[#allocation72_spill] sm:$0xff] }
 0x379   :  { %v2278_v26 = vadd.f32 %v5288_v27, %v5032_v7  ;;  %3135 = vmatprep.subr.bf16.mxu1 %v4115_v10  ;;  %v5346_v63 = vpack.c.bf16 %v2399_v32, %v2395_v4  ;;  %v2403_v21 = vmax.f32 %v2275_v14, 0.0  ;;  %v2407_v19 = vmax.f32 %v2279_v54, 0.0  ;;  %v5901_v56 = vld [vmem:[#allocation68_spill] sm:$0xff]  ;;  %v5902_v32 = vld [vmem:[#allocation69_spill] sm:$0xff]  ;;  %v5903_v54 = vld [vmem:[#allocation70_spill] sm:$0xff] }
 0x37a   :  { %v2283_v58 = vadd.f32 %v5292_v60, %v5047_v12  ;;  %v5350_v25 = vpack.c.bf16 %v2398_v44, %v2394_v45  ;;  %v2402_v1 = vmax.f32 %v2274_v59, 0.0  ;;  %v2287_v61 = vadd.f32 %v5292_v60, %v5057_v29  ;;  %v4116_v12 = vld [vmem:[%s5783_s8 + $0x130] ss:$8 sps:$4 sm:$0xff]  }
 0x37b   :  { %v2406_v62 = vmax.f32 %v2278_v26, 0.0  ;;  %2981 = vmatmul.mubr.bf16.gmra.mrb[68].mxu1 %v2494_v49  ;;  %v5354_v7 = vpack.c.bf16 %v2407_v19, %v2403_v21  ;;  %v2125_v8 = vrot.slane %v5266_v37, %v4646_v18  ;;  %v2291_v28 = vadd.f32 %v5292_v60, %v5067_v11  ;;  %v4121_v11 = vld [vmem:[%s5783_s8 + $0x144] ss:$8 sps:$4 sm:$0xff]  }
 0x37c   :  { %v2411_v27 = vmax.f32 %v2283_v58, 0.0  ;;  %2990 = vmatprep.mubr.bf16.mxu1 %v2499_v39  ;;  %3136 = vmatpush1.bf16.msra.mxu1 %v4113_v52  ;;  %v2415_v50 = vmax.f32 %v2287_v61, 0.0  ;;  %v2295_v29 = vadd.f32 %v5292_v60, %v5077_v48  ;;  %v2145_v49 = vrot.slane %v5250_v34, %v4652_v22  ;;  %v5904_v26 = vld [vmem:[#allocation71_spill] sm:$0xff] }
 0x37d   :  { %v5363_v46 = vpack.c.bf16 %v2406_v62, %v2402_v1  ;;  %3137 = vmatprep.subr.bf16.mxu1 %v4118_v53  ;;  %v2282_v51 = vadd.f32 %v2125_v8, %v5045_v6  ;;  %v2286_v57 = vadd.f32 %v2125_v8, %v5052_v20  ;;  %v2419_v42 = vmax.f32 %v2291_v28, 0.0  ;;  %v4119_v6 = vld [vmem:[%s5783_s8 + $0x140] ss:$8 sps:$4 sm:$0xff]  }
 0x37e   :  { %v2290_v33 = vadd.f32 %v2125_v8, %v5065_v13  ;;  %v5375_v9 = vpack.c.bf16 %v2415_v50, %v2411_v27  ;;  %v2423_v5 = vmax.f32 %v2295_v29, 0.0  ;;  %v2294_v48 = vadd.f32 %v2125_v8, %v5072_v23  ;;  %v4124_v23 = vld [vmem:[%s5783_s8 + $0x154] ss:$8 sps:$4 sm:$0xff]   ;;  %v5905_v28 = vld [vmem:[#allocation74_spill] sm:$0xff] }
 0x37f   :  { %v2299_v60 = vadd.f32 %v2145_v49, %v5087_v30  ;;  %v2410_v35 = vmax.f32 %v2282_v51, 0.0  ;;  %v2414_v39 = vmax.f32 %v2286_v57, 0.0  ;;  %v2303_v43 = vadd.f32 %v2145_v49, %v5097_v24  ;;  %v5906_v50 = vld [vmem:[#allocation76_spill] sm:$0xff]  ;;  %v5908_v57 = vld [vmem:[#allocation73_spill] sm:$0xff] }
 0x380   :  { %v2418_v15 = vmax.f32 %v2290_v33, 0.0  ;;  %3138 = vmatpush1.bf16.msra.mxu1 %v4116_v12  ;;  %v5383_v20 = vpack.c.bf16 %v2423_v5, %v2419_v42  ;;  %v2422_v13 = vmax.f32 %v2294_v48, 0.0  ;;  %v2141_v10 = vrot.slane %v5250_v34, %v4646_v18  ;;  %v5909_v33 = vld [vmem:[#allocation75_spill] sm:$0xff]  ;;  %v5910_v48 = vld [vmem:[#allocation80_spill] sm:$0xff] }
 0x381   :  { %v2427_v41 = vmax.f32 %v2299_v60, 0.0  ;;  %3139 = vmatprep.subr.bf16.mxu1 %v4121_v11  ;;  %v5390_v30 = vpack.c.bf16 %v2414_v39, %v2410_v35  ;;  %v2431_v24 = vmax.f32 %v2303_v43, 0.0  ;;  %v2307_v2 = vadd.f32 %v2145_v49, %v5107_v55  ;;  %v4122_v55 = vld [vmem:[%s5783_s8 + $0x150] ss:$8 sps:$4 sm:$0xff]   ;;  %v4125_v35 = vld [vmem:[%s5783_s8 + $0x160] ss:$8 sps:$4 sm:$0xff]  }
 0x382   :  { %v2311_v47 = vadd.f32 %v2145_v49, %v5900_v16  ;;  %v5394_v4 = vpack.c.bf16 %v2422_v13, %v2418_v15  ;;  %v2298_v3 = vadd.f32 %v2141_v10, %v5901_v56  ;;  %v2302_v14 = vadd.f32 %v2141_v10, %v5902_v32  ;;  %v5907_v49 = vld [vmem:[#allocation78_spill] sm:$0xff] }
 0x383   :  { %v2306_v52 = vadd.f32 %v2141_v10, %v5903_v54  ;;  %2991 = vmatmul.mubr.bf16.gmra.mrb[72].mxu1 %v5323_v36  ;;  %v5400_v45 = vpack.c.bf16 %v2431_v24, %v2427_v41  ;;  %v2435_v44 = vmax.f32 %v2307_v2, 0.0  ;;  %v2310_v53 = vadd.f32 %v2141_v10, %v5904_v26  ;;  %v4127_v36 = vld [vmem:[%s5783_s8 + $0x164] ss:$8 sps:$4 sm:$0xff]   ;;  %v4130_v41 = vld [vmem:[%s5783_s8 + $0x174] ss:$8 sps:$4 sm:$0xff]  }
 0x384   :  { %v2439_v59 = vmax.f32 %v2311_v47, 0.0  ;;  %3000 = vmatprep.mubr.bf16.mxu1 %v5326_v40  ;;  %3140 = vmatpush1.bf16.msra.mxu1 %v4119_v6  ;;  %v2426_v21 = vmax.f32 %v2298_v3, 0.0  ;;  %v2430_v19 = vmax.f32 %v2302_v14, 0.0  ;;  %v2161_v1 = vrot.slane %v5254_v17, %v4652_v22  ;;  %v5911_v6 = vld [vmem:[#allocation77_spill] sm:$0xff]  ;;  %v5912_v2 = vld [vmem:[#allocation79_spill] sm:$0xff]  ;;  %v5913_v3 = vld [vmem:[#allocation82_spill] sm:$0xff] }
 0x385   :  { %v2434_v58 = vmax.f32 %v2306_v52, 0.0  ;;  %3141 = vmatprep.subr.bf16.mxu1 %v4124_v23  ;;  %v2438_v61 = vmax.f32 %v2310_v53, 0.0  ;;  %v2157_v40 = vrot.slane %v5254_v17, %v4646_v18  ;;  %v2177_v27 = vrot.slane %v5262_v38, %v4652_v22  ;;  %v5914_v14 = vld [vmem:[#allocation84_spill] sm:$0xff] }
 0x386   :  { %v5412_v62 = vpack.c.bf16 %v2439_v59, %v2435_v44  ;;  %v5418_v8 = vpack.c.bf16 %v2430_v19, %v2426_v21  ;;  %v2315_v12 = vadd.f32 %v2161_v1, %v5905_v28  ;;  %v2319_v29 = vadd.f32 %v2161_v1, %v5906_v50  ;;  %v4128_v53 = vld [vmem:[%s5783_s8 + $0x170] ss:$8 sps:$4 sm:$0xff]   ;;  %v5915_v19 = vld [vmem:[#allocation86_spill] sm:$0xff]  ;;  %v5918_v28 = vld [vmem:[#allocation83_spill] sm:$0xff] }
 0x387   :  { %v2323_v11 = vadd.f32 %v2161_v1, %v5907_v49  ;;  %v5423_v51 = vpack.c.bf16 %v2438_v61, %v2434_v58  ;;  %v2314_v42 = vadd.f32 %v2157_v40, %v5908_v57  ;;  %v2318_v5 = vadd.f32 %v2157_v40, %v5909_v33  ;;  %v5919_v50 = vld [vmem:[#allocation85_spill] sm:$0xff] }
 0x388   :  { %v2327_v60 = vadd.f32 %v2161_v1, %v5910_v48  ;;  %3142 = vmatpush1.bf16.msra.mxu1 %v4122_v55  ;;  %v2443_v39 = vmax.f32 %v2315_v12, 0.0  ;;  %v2447_v15 = vmax.f32 %v2319_v29, 0.0  ;;  %v2322_v13 = vadd.f32 %v2157_v40, %v5911_v6  ;;  %v5921_v6 = vld [vmem:[#allocation98_spill] sm:$0xff] }
 0x389   :  { %v2451_v43 = vmax.f32 %v2323_v11, 0.0  ;;  %3143 = vmatprep.subr.bf16.mxu1 %v4127_v36  ;;  %v2442_v10 = vmax.f32 %v2314_v42, 0.0  ;;  %v2446_v23 = vmax.f32 %v2318_v5, 0.0  ;;  %v2326_v16 = vadd.f32 %v2157_v40, %v5912_v2  ;;  %v4133_v36 = vld [vmem:[%s5783_s8 + $0x184] ss:$8 sps:$4 sm:$0xff]   ;;  %v5917_v40 = vld [vmem:[#allocation81_spill] sm:$0xff] }
 0x38a   :  { %v2455_v24 = vmax.f32 %v2327_v60, 0.0  ;;  %v5436_v47 = vpack.c.bf16 %v2447_v15, %v2443_v39  ;;  %v2450_v56 = vmax.f32 %v2322_v13, 0.0  ;;  %v2331_v32 = vadd.f32 %v2177_v27, %v5913_v3  ;;  %v5920_v42 = vld [vmem:[#allocation87_spill] sm:$0xff]  ;;  %v5925_v3 = vld [vmem:[#allocation94_spill] sm:$0xff] }
 0x38b   :  { %v2335_v54 = vadd.f32 %v2177_v27, %v5914_v14  ;;  %3001 = vmatmul.mubr.bf16.gmra.mrb[76].mxu1 %v5332_v0  ;;  %v5441_v52 = vpack.c.bf16 %v2446_v23, %v2442_v10  ;;  %v2454_v59 = vmax.f32 %v2326_v16, 0.0  ;;  %v2173_v26 = vrot.slane %v5262_v38, %v4646_v18  ;;  %v5916_v0 = vld [vmem:[#allocation88_spill] sm:$0xff]  ;;  %v5922_v13 = vld [vmem:[#allocation99_spill] sm:$0xff] }
 0x38c   :  { %v5443_v44 = vpack.c.bf16 %v2455_v24, %v2451_v43  ;;  %3010 = vmatprep.mubr.bf16.mxu1 %v5346_v63  ;;  %3144 = vmatpush1.bf16.msra.mxu1 %v4125_v35  ;;  %v2459_v55 = vmax.f32 %v2331_v32, 0.0  ;;  %v2339_v58 = vadd.f32 %v2177_v27, %v5915_v19  ;;  %v2343_v1 = vadd.f32 %v2177_v27, %v5916_v0  ;;  %v4131_v35 = vld [vmem:[%s5783_s8 + $0x180] ss:$8 sps:$4 sm:$0xff]   ;;  %v4136_v10 = vld [vmem:[%s5783_s8 + $0x194] ss:$8 sps:$4 sm:$0xff]  }
 0x38d   :  { %v2463_v21 = vmax.f32 %v2335_v54, 0.0  ;;  %3145 = vmatprep.subr.bf16.mxu1 %v4130_v41  ;;  %v5456_v61 = vpack.c.bf16 %v2454_v59, %v2450_v56  ;;  %v2330_v63 = vadd.f32 %v2173_v26, %v5917_v40  ;;  %v2334_v12 = vadd.f32 %v2173_v26, %v5918_v28  ;;  %v5923_v24 = vld [vmem:[#allocation90_spill] sm:$0xff]  ;;  %v5924_v16 = vld [vmem:[#allocation92_spill] sm:$0xff]  ;;  %v5926_v54 = vld [vmem:[#allocation89_spill] sm:$0xff] }
 0x38e   :  { %v2338_v29 = vadd.f32 %v2173_v26, %v5919_v50  ;;  %v2467_v11 = vmax.f32 %v2339_v58, 0.0  ;;  %v2471_v57 = vmax.f32 %v2343_v1, 0.0  ;;  %v2342_v33 = vadd.f32 %v2173_v26, %v5920_v42  ;;  %v5927_v26 = vld [vmem:[#allocation91_spill] sm:$0xff]  ;;  %v5929_v1 = vld [vmem:[#allocation93_spill] sm:$0xff] }
 0x38f   :  { %v5461_v49 = vpack.c.bf16 %v2463_v21, %v2459_v55  ;;  %v2458_v27 = vmax.f32 %v2330_v63, 0.0  ;;  %v2462_v5 = vmax.f32 %v2334_v12, 0.0  ;;  %v2193_v60 = vrot.slane %v5270_v31, %v4652_v22  ;;  %v5928_v55 = vld [vmem:[#allocation96_spill] sm:$0xff]  ;;  %v5930_v50 = vld [vmem:[#allocation95_spill] sm:$0xff]  ;;  %v5931_v42 = vld [vmem:[#allocation5_spill] sm:$0xff] }
 0x390   :  { %v2466_v48 = vmax.f32 %v2338_v29, 0.0  ;;  %3146 = vmatpush1.bf16.msra.mxu1 %v4128_v53  ;;  %v5469_v39 = vpack.c.bf16 %v2471_v57, %v2467_v11  ;;  %v2470_v15 = vmax.f32 %v2342_v33, 0.0  ;;  %v2189_v43 = vrot.slane %v5270_v31, %v4646_v18  ;;  %v4134_v40 = vld [vmem:[%s5783_s8 + $0x190] ss:$8 sps:$4 sm:$0xff]   ;;  %v5932_v33 = vld [vmem:[#allocation7_spill] sm:$0xff] }
 0x391   :  { %v2089_v41 = vrot.slane %v5922_v13, %v5921_v6  ;;  %3147 = vmatprep.subr.bf16.mxu1 %v4133_v36  ;;  %v5478_v23 = vpack.c.bf16 %v2462_v5, %v2458_v27  ;;  %v2347_v2 = vadd.f32 %v2193_v60, %v5923_v24  ;;  %v2351_v56 = vadd.f32 %v2193_v60, %v5924_v16  ;;  %v5935_v24 = vld [vmem:[#allocation6_spill] sm:$0xff]  ;;  %v5936_v16 = vld [vmem:[#allocation9_spill] sm:$0xff] }
 0x392   :  { %v2355_v32 = vadd.f32 %v2193_v60, %v5925_v3  ;;  %v5483_v14 = vpack.c.bf16 %v2470_v15, %v2466_v48  ;;  %v2346_v59 = vadd.f32 %v2189_v43, %v5926_v54  ;;  %v2350_v53 = vadd.f32 %v2189_v43, %v5927_v26  ;;  %v5934_v15 = vld [vmem:[#allocation102_spill] sm:$0xff] }
 0x393   :  { %v2359_v21 = vadd.f32 %v2193_v60, %v5928_v55  ;;  %3011 = vmatmul.mubr.bf16.gmra.mrb[80].mxu1 %v5350_v25  ;;  %v2475_v19 = vmax.f32 %v2347_v2, 0.0  ;;  %v2479_v58 = vmax.f32 %v2351_v56, 0.0  ;;  %v2354_v36 = vadd.f32 %v2189_v43, %v5929_v1  ;;  %v4139_v25 = vld [vmem:[%s5783_s8 + $0x1a4] ss:$8 sps:$4 sm:$0xff]   ;;  %v4137_v3 = vld [vmem:[%s5783_s8 + $0x1a0] ss:$8 sps:$4 sm:$0xff]  }
 0x394   :  { %v2483_v0 = vmax.f32 %v2355_v32, 0.0  ;;  %3020 = vmatprep.mubr.bf16.mxu1 %v5354_v7  ;;  %3148 = vmatpush1.bf16.msra.mxu1 %v4131_v35  ;;  %v2474_v63 = vmax.f32 %v2346_v59, 0.0  ;;  %v2478_v28 = vmax.f32 %v2350_v53, 0.0  ;;  %v2358_v29 = vadd.f32 %v2189_v43, %v5930_v50  ;;  %v5933_v35 = vld [vmem:[#allocation4_spill] sm:$0xff]  ;;  %v5937_v59 = vld [vmem:[#allocation11_spill] sm:$0xff]  ;;  %v5939_v1 = vld [vmem:[#allocation10_spill] sm:$0xff] }
 0x395   :  { %v2487_v12 = vmax.f32 %v2359_v21, 0.0  ;;  %3149 = vmatprep.subr.bf16.mxu1 %v4136_v10  ;;  %v5498_v11 = vpack.c.bf16 %v2479_v58, %v2475_v19  ;;  %v2482_v57 = vmax.f32 %v2354_v36, 0.0  ;;  %v2237_v7 = vadd.f32 %v2089_v41, %v5931_v42  ;;  %v5938_v53 = vld [vmem:[#allocation8_spill] sm:$0xff] }
 0x396   :  { %v2241_v27 = vadd.f32 %v2089_v41, %v5932_v33  ;;  %v5502_v5 = vpack.c.bf16 %v2478_v28, %v2474_v63  ;;  %v2486_v60 = vmax.f32 %v2358_v29, 0.0  ;;  %v2236_v43 = vadd.f32 %v5934_v15, %v5933_v35  ;;  %v4142_v21 = vld [vmem:[%s5783_s8 + $0x1b4] ss:$8 sps:$4 sm:$0xff]   ;;  %v4140_v33 = vld [vmem:[%s5783_s8 + $0x1b0] ss:$8 sps:$4 sm:$0xff]   ;;  %v5944_v35 = vld [vmem:[#allocation15_spill] sm:$0xff] }
 0x397   :  { %v5504_v48 = vpack.c.bf16 %v2487_v12, %v2483_v0  ;;  %v2365_v13 = vmax.f32 %v2237_v7, 0.0  ;;  %v2240_v2 = vadd.f32 %v5934_v15, %v5935_v24  ;;  %v2245_v56 = vadd.f32 %v2089_v41, %v5936_v16  ;;  %v5940_v28 = vld [vmem:[#allocation100_spill] sm:$0xff]  ;;  %v5941_v12 = vld [vmem:[#allocation97_spill] sm:$0xff]  ;;  %v5946_v24 = vld [vmem:[#allocation14_spill] sm:$0xff] }
 0x398   :  { %v2369_v10 = vmax.f32 %v2241_v27, 0.0  ;;  %3150 = vmatpush1.bf16.msra.mxu1 %v4134_v40  ;;  %v5514_v32 = vpack.c.bf16 %v2486_v60, %v2482_v57  ;;  %v2364_v54 = vmax.f32 %v2236_v43, 0.0  ;;  %v2249_v26 = vadd.f32 %v2089_v41, %v5937_v59  ;;  %v5942_v57 = vld [vmem:[#allocation101_spill] sm:$0xff]  ;;  %v4145_v43 = vld [vmem:[%s5783_s8 + $0x1c4] ss:$8 sps:$4 sm:$0xff]  }
 0x399   :  { %v2244_v55 = vadd.f32 %v5934_v15, %v5938_v53  ;;  %3151 = vmatprep.subr.bf16.mxu1 %v4139_v25  ;;  %v2368_v58 = vmax.f32 %v2240_v2, 0.0  ;;  %v2373_v0 = vmax.f32 %v2245_v56, 0.0  ;;  %v2248_v36 = vadd.f32 %v5934_v15, %v5939_v1  ;;  %v5943_v60 = vld [vmem:[#allocation13_spill] sm:$0xff]  ;;  %v5948_v59 = vld [vmem:[#allocation19_spill] sm:$0xff]  ;;  %v5949_v53 = vld [vmem:[#allocation16_spill] sm:$0xff] }
 0x39a   :  { %v5522_v19 = vpack.c.bf16 %v2369_v10, %v2365_v13  ;;  %v2377_v40 = vmax.f32 %v2249_v26, 0.0  ;;  %v2105_v41 = vrot.slane %v5940_v28, %v5921_v6  ;;  %v2101_v50 = vrot.slane %v5940_v28, %v5941_v12  ;;  %v5945_v10 = vld [vmem:[#allocation12_spill] sm:$0xff]  ;;  %v5947_v16 = vld [vmem:[#allocation17_spill] sm:$0xff]  ;;  %v5950_v1 = vld [vmem:[#allocation18_spill] sm:$0xff] }
 0x39b   :  { %v2372_v63 = vmax.f32 %v2244_v55, 0.0  ;;  %3021 = vmatmul.mubr.bf16.gmra.mrb[84].mxu1 %v5363_v46  ;;  %v5531_v29 = vpack.c.bf16 %v2368_v58, %v2364_v54  ;;  %v2376_v25 = vmax.f32 %v2248_v36, 0.0  ;;  %v2121_v42 = vrot.slane %v5942_v57, %v5921_v6 }
 0x39c   :  { %v2117_v7 = vrot.slane %v5942_v57, %v5941_v12  ;;  %3030 = vmatprep.mubr.bf16.mxu1 %v5375_v9  ;;  %3152 = vmatpush1.bf16.msra.mxu1 %v4137_v3  ;;  %v5541_v27 = vpack.c.bf16 %v2377_v40, %v2373_v0  ;;  %v2253_v46 = vadd.f32 %v2105_v41, %v5943_v60  ;;  %v4143_v40 = vld [vmem:[%s5783_s8 + $0x1c0] ss:$8 sps:$4 sm:$0xff]   ;;  %v5951_v57 = vld [vmem:[#allocation21_spill] sm:$0xff] }
 0x39d   :  { %v2257_v15 = vadd.f32 %v2105_v41, %v5944_v35  ;;  %3153 = vmatprep.subr.bf16.mxu1 %v4142_v21  ;;  %v5548_v13 = vpack.c.bf16 %v2376_v25, %v2372_v63  ;;  %v2252_v9 = vadd.f32 %v2101_v50, %v5945_v10  ;;  %v2256_v2 = vadd.f32 %v2101_v50, %v5946_v24 }
 0x39e   :  { %v2261_v56 = vadd.f32 %v2105_v41, %v5947_v16  ;;  %v2381_v3 = vmax.f32 %v2253_v46, 0.0  ;;  %v2265_v26 = vadd.f32 %v2105_v41, %v5948_v59  ;;  %v2260_v55 = vadd.f32 %v2101_v50, %v5949_v53  ;;  %v4148_v41 = vld [vmem:[%s5783_s8 + $0x1d4] ss:$8 sps:$4 sm:$0xff]  }
 0x39f   :  { %v2385_v54 = vmax.f32 %v2257_v15, 0.0  ;;  %v2380_v58 = vmax.f32 %v2252_v9, 0.0  ;;  %v2384_v21 = vmax.f32 %v2256_v2, 0.0  ;;  %v2264_v36 = vadd.f32 %v2101_v50, %v5950_v1  ;;  %v5952_v50 = vld [vmem:[#allocation23_spill] sm:$0xff]  ;;  %v5953_v15 = vld [vmem:[#allocation20_spill] sm:$0xff]  ;;  %v5954_v2 = vld [vmem:[#allocation22_spill] sm:$0xff] }
 0x3a0   :  { %v2389_v0 = vmax.f32 %v2261_v56, 0.0  ;;  %3154 = vmatpush1.bf16.msra.mxu1 %v4140_v33  ;;  %v2393_v28 = vmax.f32 %v2265_v26, 0.0  ;;  %v2388_v25 = vmax.f32 %v2260_v55, 0.0  ;;  %v2269_v60 = vadd.f32 %v2121_v42, %v5951_v57  ;;  %v5955_v56 = vld [vmem:[#allocation25_spill] sm:$0xff]  ;;  %v5956_v26 = vld [vmem:[#allocation27_spill] sm:$0xff] }
 0x3a1   :  { %v5559_v63 = vpack.c.bf16 %v2385_v54, %v2381_v3  ;;  %3155 = vmatprep.subr.bf16.mxu1 %v4145_v43  ;;  %v5565_v46 = vpack.c.bf16 %v2384_v21, %v2380_v58  ;;  %v2392_v35 = vmax.f32 %v2264_v36, 0.0  ;;  %v2273_v33 = vadd.f32 %v2121_v42, %v5952_v50  ;;  %v4146_v55 = vld [vmem:[%s5783_s8 + $0x1d0] ss:$8 sps:$4 sm:$0xff]   ;;  %v5958_v36 = vld [vmem:[#allocation26_spill] sm:$0xff] }
 0x3a2   :  { %v2268_v10 = vadd.f32 %v2117_v7, %v5953_v15  ;;  %v5569_v9 = vpack.c.bf16 %v2393_v28, %v2389_v0  ;;  %v2397_v24 = vmax.f32 %v2269_v60, 0.0  ;;  %v2272_v16 = vadd.f32 %v2117_v7, %v5954_v2  ;;  %v5957_v0 = vld [vmem:[#allocation24_spill] sm:$0xff]  ;;  %v5959_v50 = vld [vmem:[#allocation29_spill] sm:$0xff]  ;;  %v5960_v15 = vld [vmem:[#allocation31_spill] sm:$0xff] }
 0x3a3   :  { %v2277_v3 = vadd.f32 %v2121_v42, %v5955_v56  ;;  %3031 = vmatmul.mubr.bf16.gmra.mrb[88].mxu1 %v5390_v30  ;;  %v5574_v43 = vpack.c.bf16 %v2392_v35, %v2388_v25  ;;  %v2401_v54 = vmax.f32 %v2273_v33, 0.0  ;;  %v2281_v53 = vadd.f32 %v2121_v42, %v5956_v26  ;;  %v4151_v30 = vld [vmem:[%s5783_s8 + $0x1e4] ss:$8 sps:$4 sm:$0xff]  }
 0x3a4   :  { %v2396_v59 = vmax.f32 %v2268_v10, 0.0  ;;  %3040 = vmatprep.mubr.bf16.mxu1 %v5383_v20  ;;  %3156 = vmatpush1.bf16.msra.mxu1 %v4143_v40  ;;  %v2400_v58 = vmax.f32 %v2272_v16, 0.0  ;;  %v2276_v1 = vadd.f32 %v2117_v7, %v5957_v0  ;;  %v2280_v28 = vadd.f32 %v2117_v7, %v5958_v36  ;;  %v5962_v56 = vld [vmem:[#allocation30_spill] sm:$0xff]  ;;  %v5964_v26 = vld [vmem:[#allocation35_spill] sm:$0xff] }
 0x3a5   :  { %v2405_v21 = vmax.f32 %v2277_v3, 0.0  ;;  %3157 = vmatprep.subr.bf16.mxu1 %v4148_v41  ;;  %v5586_v25 = vpack.c.bf16 %v2401_v54, %v2397_v24  ;;  %v2409_v42 = vmax.f32 %v2281_v53, 0.0  ;;  %v2137_v20 = vrot.slane %v5266_v37, %v5921_v6  ;;  %v5961_v24 = vld [vmem:[#allocation28_spill] sm:$0xff]  ;;  %v5963_v54 = vld [vmem:[#allocation33_spill] sm:$0xff] }
 0x3a6   :  { %v2133_v40 = vrot.slane %v5266_v37, %v5941_v12  ;;  %v5592_v57 = vpack.c.bf16 %v2400_v58, %v2396_v59  ;;  %v2404_v60 = vmax.f32 %v2276_v1, 0.0  ;;  %v2408_v35 = vmax.f32 %v2280_v28, 0.0  ;;  %v4149_v37 = vld [vmem:[%s5783_s8 + $0x1e0] ss:$8 sps:$4 sm:$0xff]   ;;  %v4154_v58 = vld [vmem:[%s5783_s8 + $0x1f4] ss:$8 sps:$4 sm:$0xff]  }
 0x3a7   :  { %v2153_v7 = vrot.slane %v5250_v34, %v5921_v6  ;;  %v5596_v41 = vpack.c.bf16 %v2409_v42, %v2405_v21  ;;  %v2285_v33 = vadd.f32 %v2137_v20, %v5959_v50  ;;  %v2289_v10 = vadd.f32 %v2137_v20, %v5960_v15  ;;  %v5965_v1 = vld [vmem:[#allocation32_spill] sm:$0xff] }
 0x3a8   :  { %v2284_v2 = vadd.f32 %v2133_v40, %v5961_v24  ;;  %3158 = vmatpush1.bf16.msra.mxu1 %v4146_v55  ;;  %v5604_v16 = vpack.c.bf16 %v2408_v35, %v2404_v60  ;;  %v2288_v3 = vadd.f32 %v2133_v40, %v5962_v56  ;;  %v2293_v59 = vadd.f32 %v2137_v20, %v5963_v54  ;;  %v5966_v35 = vld [vmem:[#allocation34_spill] sm:$0xff]  ;;  %v5968_v56 = vld [vmem:[#allocation39_spill] sm:$0xff] }
 0x3a9   :  { %v2297_v53 = vadd.f32 %v2137_v20, %v5964_v26  ;;  %3159 = vmatprep.subr.bf16.mxu1 %v4151_v30  ;;  %v2413_v21 = vmax.f32 %v2285_v33, 0.0  ;;  %v2417_v0 = vmax.f32 %v2289_v10, 0.0  ;;  %v2292_v36 = vadd.f32 %v2133_v40, %v5965_v1  ;;  %v5967_v30 = vld [vmem:[#allocation37_spill] sm:$0xff] }
 0x3aa   :  { %v2412_v55 = vmax.f32 %v2284_v2, 0.0  ;;  %v2416_v28 = vmax.f32 %v2288_v3, 0.0  ;;  %v2421_v42 = vmax.f32 %v2293_v59, 0.0  ;;  %v2296_v50 = vadd.f32 %v2133_v40, %v5966_v35  ;;  %v4152_v33 = vld [vmem:[%s5783_s8 + $0x1f0] ss:$8 sps:$4 sm:$0xff]  }
 0x3ab   :  { %v2425_v60 = vmax.f32 %v2297_v53, 0.0  ;;  %3041 = vmatmul.mubr.bf16.gmra.mrb[92].mxu1 %v5394_v4  ;;  %v5615_v15 = vpack.c.bf16 %v2417_v0, %v2413_v21  ;;  %v2420_v20 = vmax.f32 %v2292_v36, 0.0  ;;  %v2301_v24 = vadd.f32 %v2153_v7, %v5967_v30  ;;  %v5969_v26 = vld [vmem:[#allocation41_spill] sm:$0xff]  ;;  %v5970_v21 = vld [vmem:[#allocation43_spill] sm:$0xff]  ;;  %v5971_v0 = vld [vmem:[#allocation36_spill] sm:$0xff] }
 0x3ac   :  { %v2305_v54 = vadd.f32 %v2153_v7, %v5968_v56  ;;  %3050 = vmatprep.mubr.bf16.mxu1 %v5400_v45  ;;  %3160 = vmatpush1.bf16.msra.mxu1 %v4149_v37  ;;  %v5623_v10 = vpack.c.bf16 %v2416_v28, %v2412_v55  ;;  %v2424_v40 = vmax.f32 %v2296_v50, 0.0  ;;  %v2149_v4 = vrot.slane %v5250_v34, %v5941_v12  ;;  %v5972_v36 = vld [vmem:[#allocation38_spill] sm:$0xff]  ;;  %v5973_v28 = vld [vmem:[#allocation40_spill] sm:$0xff] }
 0x3ad   :  { %v5625_v2 = vpack.c.bf16 %v2425_v60, %v2421_v42  ;;  %3161 = vmatprep.subr.bf16.mxu1 %v4154_v58  ;;  %v2429_v3 = vmax.f32 %v2301_v24, 0.0  ;;  %v2309_v53 = vadd.f32 %v2153_v7, %v5969_v26  ;;  %v2313_v45 = vadd.f32 %v2153_v7, %v5970_v21  ;;  %v5974_v34 = vld [vmem:[#allocation42_spill] sm:$0xff]  ;;  %v5975_v26 = vld [vmem:[#allocation45_spill] sm:$0xff] }
 0x3ae   :  { %v2433_v59 = vmax.f32 %v2305_v54, 0.0  ;;  %v5631_v37 = vpack.c.bf16 %v2424_v40, %v2420_v20  ;;  %v2300_v1 = vadd.f32 %v2149_v4, %v5971_v0  ;;  %v2304_v55 = vadd.f32 %v2149_v4, %v5972_v36  ;;  %v5977_v21 = vld [vmem:[#allocation49_spill] sm:$0xff] }
 0x3af   :  { %v2308_v42 = vadd.f32 %v2149_v4, %v5973_v28  ;;  %v2437_v35 = vmax.f32 %v2309_v53, 0.0  ;;  %v2441_v50 = vmax.f32 %v2313_v45, 0.0  ;;  %v2312_v58 = vadd.f32 %v2149_v4, %v5974_v34 }
 0x3b0   :  { %v5636_v60 = vpack.c.bf16 %v2433_v59, %v2429_v3  ;;  %3162 = vmatpush1.bf16.msra.mxu1 %v4152_v33  ;;  %v2428_v30 = vmax.f32 %v2300_v1, 0.0  ;;  %v2432_v24 = vmax.f32 %v2304_v55, 0.0  ;;  %v2169_v7 = vrot.slane %v5254_v17, %v5921_v6  ;;  %v5976_v33 = vld [vmem:[#allocation47_spill] sm:$0xff]  ;;  %v5978_v1 = vld [vmem:[#allocation44_spill] sm:$0xff]  ;;  %v5979_v55 = vld [vmem:[#allocation46_spill] sm:$0xff] }
 0x3b1   :  { %v2436_v56 = vmax.f32 %v2308_v42, 0.0  ;;  %v5641_v20 = vpack.c.bf16 %v2441_v50, %v2437_v35  ;;  %v2440_v54 = vmax.f32 %v2312_v58, 0.0  ;;  %v2165_v40 = vrot.slane %v5254_v17, %v5941_v12  ;;  %v5980_v17 = vld [vmem:[#allocation51_spill] sm:$0xff]  ;;  %v5981_v58 = vld [vmem:[#allocation48_spill] sm:$0xff] }
 0x3b2   :  { %v2185_v3 = vrot.slane %v5262_v38, %v5921_v6  ;;  %v5647_v59 = vpack.c.bf16 %v2432_v24, %v2428_v30  ;;  %v2317_v4 = vadd.f32 %v2169_v7, %v5975_v26  ;;  %v2321_v53 = vadd.f32 %v2169_v7, %v5976_v33 }
 0x3b3   :  { %v2325_v45 = vadd.f32 %v2169_v7, %v5977_v21  ;;  %3051 = vmatmul.mubr.bf16.gmra.mrb[96].mxu1 %v5418_v8  ;;  %v5653_v0 = vpack.c.bf16 %v2440_v54, %v2436_v56  ;;  %v2316_v36 = vadd.f32 %v2165_v40, %v5978_v1  ;;  %v2320_v28 = vadd.f32 %v2165_v40, %v5979_v55  ;;  %v5982_v21 = vld [vmem:[#allocation50_spill] sm:$0xff]  ;;  %v5983_v1 = vld [vmem:[#allocation53_spill] sm:$0xff]  ;;  %v5984_v55 = vld [vmem:[#allocation55_spill] sm:$0xff] }
 0x3b4   :  { %v2329_v42 = vadd.f32 %v2169_v7, %v5980_v17  ;;  %3060 = vmatprep.mubr.bf16.mxu1 %v5412_v62  ;;  %v2445_v35 = vmax.f32 %v2317_v4, 0.0  ;;  %v2449_v50 = vmax.f32 %v2321_v53, 0.0  ;;  %v2324_v30 = vadd.f32 %v2165_v40, %v5981_v58 }
 0x3b5   :  { %v2453_v34 = vmax.f32 %v2325_v45, 0.0  ;;  %v2444_v24 = vmax.f32 %v2316_v36, 0.0  ;;  %v2448_v26 = vmax.f32 %v2320_v28, 0.0  ;;  %v2328_v8 = vadd.f32 %v2165_v40, %v5982_v21  ;;  %v5985_v28 = vld [vmem:[#allocation57_spill] sm:$0xff]  ;;  %v5986_v40 = vld [vmem:[#allocation59_spill] sm:$0xff] }
 0x3b6   :  { %v2457_v33 = vmax.f32 %v2329_v42, 0.0  ;;  %v5661_v56 = vpack.c.bf16 %v2449_v50, %v2445_v35  ;;  %v2452_v54 = vmax.f32 %v2324_v30, 0.0  ;;  %v2333_v22 = vadd.f32 %v2185_v3, %v5983_v1  ;;  %v5987_v50 = vld [vmem:[#allocation52_spill] sm:$0xff]  ;;  %v5988_v30 = vld [vmem:[#allocation54_spill] sm:$0xff] }
 0x3b7   :  { %v2337_v18 = vadd.f32 %v2185_v3, %v5984_v55  ;;  %v5665_v7 = vpack.c.bf16 %v2448_v26, %v2444_v24  ;;  %v2456_v4 = vmax.f32 %v2328_v8, 0.0  ;;  %v2181_v53 = vrot.slane %v5262_v38, %v5941_v12  ;;  %v5989_v24 = vld [vmem:[#allocation56_spill] sm:$0xff]  ;;  %v5991_v1 = vld [vmem:[#allocation58_spill] sm:$0xff] }
 0x3b8   :  { %v5667_v62 = vpack.c.bf16 %v2457_v33, %v2453_v34  ;;  %v2461_v45 = vmax.f32 %v2333_v22, 0.0  ;;  %v2341_v17 = vadd.f32 %v2185_v3, %v5985_v28  ;;  %v2345_v42 = vadd.f32 %v2185_v3, %v5986_v40  ;;  %v5992_v28 = vld [vmem:[#allocation61_spill] sm:$0xff]  ;;  %v5993_v40 = vld [vmem:[#allocation63_spill] sm:$0xff] }
 0x3b9   :  { %v2465_v36 = vmax.f32 %v2337_v18, 0.0  ;;  %v5673_v35 = vpack.c.bf16 %v2456_v4, %v2452_v54  ;;  %v2332_v58 = vadd.f32 %v2181_v53, %v5987_v50  ;;  %v2336_v21 = vadd.f32 %v2181_v53, %v5988_v30 }
 0x3ba   :  { %v2340_v26 = vadd.f32 %v2181_v53, %v5989_v24  ;;  %v2469_v33 = vmax.f32 %v2341_v17, 0.0  ;;  %v2473_v8 = vmax.f32 %v2345_v42, 0.0  ;;  %v2344_v38 = vadd.f32 %v2181_v53, %v5991_v1  ;;  %v5994_v42 = vld [vmem:[#allocation65_spill] sm:$0xff]  ;;  %v5998_v1 = vld [vmem:[#allocation64_spill] sm:$0xff] }
 0x3bb   :  { %v5678_v34 = vpack.c.bf16 %v2465_v36, %v2461_v45  ;;  %3061 = vmatmul.mubr.bf16.gmra.mrb[100].mxu1 %v5423_v51  ;;  %v2460_v18 = vmax.f32 %v2332_v58, 0.0  ;;  %v2464_v22 = vmax.f32 %v2336_v21, 0.0  ;;  %v2201_v3 = vrot.slane %v5270_v31, %v5921_v6  ;;  %v5995_v58 = vld [vmem:[#allocation60_spill] sm:$0xff]  ;;  %v5996_v21 = vld [vmem:[#allocation62_spill] sm:$0xff]  ;;  %v5997_v6 = vld [vmem:[#allocation67_spill] sm:$0xff] }
 0x3bc   :  { %v2468_v55 = vmax.f32 %v2340_v26, 0.0  ;;  %3070 = vmatprep.mubr.bf16.mxu1 %v5436_v47  ;;  %v2545_v54 = vpack.c.bf16 %v2473_v8, %v2469_v33  ;;  %v2472_v4 = vmax.f32 %v2344_v38, 0.0  ;;  %v2197_v45 = vrot.slane %v5270_v31, %v5941_v12 }
 0x3bd   :  { %5990 = vst [vmem:[#allocation72_spill] sm:$0xff] %v5678_v34  ;;  %v2540_v36 = vpack.c.bf16 %v2464_v22, %v2460_v18  ;;  %v2349_v17 = vadd.f32 %v2201_v3, %v5992_v28  ;;  %v2353_v53 = vadd.f32 %v2201_v3, %v5993_v40  ;;  %v2357_v51 = vadd.f32 %v2201_v3, %v5994_v42  ;;  %v5999_v22 = vld [vmem:[#allocation66_spill] sm:$0xff] }
 0x3be   :  { %v2544_v50 = vpack.c.bf16 %v2472_v4, %v2468_v55  ;;  %v2348_v30 = vadd.f32 %v2197_v45, %v5995_v58  ;;  %v2352_v24 = vadd.f32 %v2197_v45, %v5996_v21  ;;  %v2361_v26 = vadd.f32 %v2201_v3, %v5997_v6 }
 0x3bf   :  { %v2477_v47 = vmax.f32 %v2349_v17, 0.0  ;;  %v2481_v33 = vmax.f32 %v2353_v53, 0.0  ;;  %v2485_v8 = vmax.f32 %v2357_v51, 0.0  ;;  %v2356_v38 = vadd.f32 %v2197_v45, %v5998_v1 }
 0x3c0   :  { %v2476_v31 = vmax.f32 %v2348_v30, 0.0  ;;  %v2480_v12 = vmax.f32 %v2352_v24, 0.0  ;;  %v2489_v18 = vmax.f32 %v2361_v26, 0.0  ;;  %v2360_v28 = vadd.f32 %v2197_v45, %v5999_v22  ;;  %v6001_v22 = vld [vmem:[#allocation2_spill] sm:$0xff] }
 0x3c1   :  { %v2549_v40 = vpack.c.bf16 %v2481_v33, %v2477_v47  ;;  %v2484_v34 = vmax.f32 %v2356_v38, 0.0  ;;  %v3468_v33 = vld [vmem:[%s5785_s9] sm:$0x3] }
 0x3c2   :  { %v2548_v42 = vpack.c.bf16 %v2480_v12, %v2476_v31  ;;  %v2553_v55 = vpack.c.bf16 %v2489_v18, %v2485_v8  ;;  %v2488_v4 = vmax.f32 %v2360_v28, 0.0  ;;  %v5735_v28 = vrot.slane %v3468_v33, %v6001_v22 }
 0x3c3   :  { %3071 = vmatmul.mubr.bf16.gmra.mrb[104].mxu1 %v5441_v52 }
 0x3c4   :  { %3080 = vmatprep.mubr.bf16.mxu1 %v5443_v44  ;;  %v2552_v3 = vpack.c.bf16 %v2488_v4, %v2484_v34  ;;  %v6000_v52 = vld [vmem:[#allocation72_spill] sm:$0xff] }
 0x3cb   :  { %3081 = vmatmul.mubr.bf16.gmra.mrb[108].mxu1 %v5456_v61 }
 0x3cc   :  { %3090 = vmatprep.mubr.bf16.mxu1 %v5461_v49 }
 0x3d3   :  { %3091 = vmatmul.mubr.bf16.gmra.mrb[112].mxu1 %v5478_v23 }
 0x3d4   :  { %3100 = vmatprep.mubr.bf16.mxu1 %v5469_v39 }
 0x3db   :  { %3101 = vmatmul.mubr.bf16.gmra.mrb[116].mxu1 %v5483_v14 }
 0x3dc   :  { %3110 = vmatprep.mubr.bf16.mxu1 %v5498_v11 }
 0x3e3   :  { %3111 = vmatmul.mubr.bf16.gmra.mrb[120].mxu1 %v5502_v5 }
 0x3e4   :  { %3120 = vmatprep.mubr.bf16.mxu1 %v5504_v48 }
 0x3eb   :  { %3121 = vmatmul.mubr.bf16.gmra.mrb[124].mxu1 %v5514_v32 }
 0x3ec   :  { %3163 = vmatprep.mubr.bf16.mxu1 %v5522_v19 }
 0x3f3   :  { %3164 = vmatmul.mubr.bf16.vlgmr.msra.gmra.mrb[64].mxu1 %v5531_v29 }
 0x3f4   :  { %3173 = vmatprep.mubr.bf16.mxu1 %v5541_v27 }
 0x3fb   :  { %3174 = vmatmul.mubr.bf16.gmra.mrb[68].mxu1 %v5548_v13 }
 0x3fc   :  { %3183 = vmatprep.mubr.bf16.mxu1 %v5559_v63 }
 0x403   :  { %3184 = vmatmul.mubr.bf16.gmra.mrb[72].mxu1 %v5565_v46 }
 0x404   :  { %3193 = vmatprep.mubr.bf16.mxu1 %v5569_v9 }
 0x40b   :  { %3194 = vmatmul.mubr.bf16.gmra.mrb[76].mxu1 %v5574_v43 }
 0x40c   :  { %3203 = vmatprep.mubr.bf16.mxu1 %v5586_v25 }
 0x413   :  { %3204 = vmatmul.mubr.bf16.gmra.mrb[80].mxu1 %v5592_v57 }
 0x414   :  { %3213 = vmatprep.mubr.bf16.mxu1 %v5596_v41 }
 0x41b   :  { %3214 = vmatmul.mubr.bf16.gmra.mrb[84].mxu1 %v5604_v16 }
 0x41c   :  { %3223 = vmatprep.mubr.bf16.mxu1 %v5615_v15 }
 0x423   :  { %3224 = vmatmul.mubr.bf16.gmra.mrb[88].mxu1 %v5623_v10 }
 0x424   :  { %3233 = vmatprep.mubr.bf16.mxu1 %v5625_v2 }
 0x42b   :  { %3234 = vmatmul.mubr.bf16.gmra.mrb[92].mxu1 %v5631_v37 }
 0x42c   :  { %3243 = vmatprep.mubr.bf16.mxu1 %v5636_v60 }
 0x433   :  { %3244 = vmatmul.mubr.bf16.gmra.mrb[96].mxu1 %v5647_v59 }
 0x434   :  { %3253 = vmatprep.mubr.bf16.mxu1 %v5641_v20 }
 0x43b   :  { %3254 = vmatmul.mubr.bf16.gmra.mrb[100].mxu1 %v5653_v0 }
 0x43c   :  { %3263 = vmatprep.mubr.bf16.mxu1 %v5661_v56 }
 0x443   :  { %3264 = vmatmul.mubr.bf16.gmra.mrb[104].mxu1 %v5665_v7 }
 0x444   :  { %3273 = vmatprep.mubr.bf16.mxu1 %v5667_v62 }
 0x44b   :  { %3274 = vmatmul.mubr.bf16.gmra.mrb[108].mxu1 %v5673_v35 }
 0x44c   :  { %3283 = vmatprep.mubr.bf16.mxu1 %v6000_v52 }
 0x453   :  { %3284 = vmatmul.mubr.bf16.gmra.mrb[112].mxu1 %v2540_v36 }
 0x454   :  { %3293 = vmatprep.mubr.bf16.mxu1 %v2545_v54 }
 0x45b   :  { %3294 = vmatmul.mubr.bf16.gmra.mrb[116].mxu1 %v2544_v50 }
 0x45c   :  { %3303 = vmatprep.mubr.bf16.mxu1 %v2549_v40 }
 0x463   :  { %3304 = vmatmul.mubr.bf16.gmra.mrb[120].mxu1 %v2548_v42 }
 0x464   :  { %3313 = vmatprep.mubr.bf16.mxu1 %v2553_v55  ;;  %v6002_v55 = vld [vmem:[#allocation3_spill] sm:$0xff] }
 0x465   :  { %v5738_v4 = vrot.slane %v3468_v33, %v6002_v55 }
 0x46b   :  { %3314 = vmatmul.mubr.bf16.gmra.mrb[124].mxu1 %v2552_v3 }
 0x4c6   :  { %v3165_v44 = vpop.f32.mrb[64].mxu1 }
 0x4c7   :  { %v3167_v61 = vpop.f32.mrb[65].mxu1 }
 0x4c8   :  { %v3169_v49 = vpop.f32.mrb[66].mxu1 }
 0x4c9   :  { %v3324_v39 = vmax.f32 %v3165_v44, %v3169_v49  ;;  %v3171_v23 = vpop.f32.mrb[67].mxu1 }
 0x4ca   :  { %v3333_v14 = vmax.f32 %v3167_v61, %v3171_v23 }
 0x4ce   :  { %v3175_v11 = vpop.f32.mrb[68].mxu1 }
 0x4cf   :  { %v3325_v5 = vmax.f32 %v3324_v39, %v3175_v11  ;;  %v3177_v48 = vpop.f32.mrb[69].mxu1 }
 0x4d0   :  { %v3334_v32 = vmax.f32 %v3333_v14, %v3177_v48  ;;  %v3179_v19 = vpop.f32.mrb[70].mxu1 }
 0x4d1   :  { %v3326_v29 = vmax.f32 %v3325_v5, %v3179_v19  ;;  %v3181_v27 = vpop.f32.mrb[71].mxu1 }
 0x4d2   :  { %v3335_v13 = vmax.f32 %v3334_v32, %v3181_v27 }
 0x4d3   :  { %v3327_v43 = vrot.slane %v3326_v29, 4 }
 0x4d4   :  { %v3336_v41 = vrot.slane %v3335_v13, 4 }
 0x4d5   :  { %v3328_v15 = vmax.f32 %v3326_v29, %v3327_v43 }
 0x4d6   :  { %v3185_v63 = vpop.f32.mrb[72].mxu1  ;;  %v3337_v10 = vmax.f32 %v3335_v13, %v3336_v41 }
 0x4d7   :  { %v3187_v46 = vpop.f32.mrb[73].mxu1  ;;  %v3329_v0 = vrot.slane %v3328_v15, 2 }
 0x4d8   :  { %v3189_v9 = vpop.f32.mrb[74].mxu1  ;;  %v3338_v62 = vrot.slane %v3337_v10, 2 }
 0x4d9   :  { %v3342_v25 = vmax.f32 %v3185_v63, %v3189_v9  ;;  %v3191_v57 = vpop.f32.mrb[75].mxu1  ;;  %v3330_v45 = vmax.f32 %v3328_v15, %v3329_v0 }
 0x4da   :  { %v3351_v16 = vmax.f32 %v3187_v46, %v3191_v57  ;;  %v3339_v17 = vmax.f32 %v3337_v10, %v3338_v62 }
 0x4db   :  { %v3331_v24 = vrot.slane %v3330_v45, 1 }
 0x4dc   :  { %v3340_v8 = vrot.slane %v3339_v17, 1 }
 0x4dd   :  { %v3332_v18 = vmax.f32 %v3330_v45, %v3331_v24 }
 0x4de   :  { %v3195_v2 = vpop.f32.mrb[76].mxu1  ;;  %v3341_v42 = vmax.f32 %v3339_v17, %v3340_v8 }
 0x4df   :  { %v3343_v37 = vmax.f32 %v3342_v25, %v3195_v2  ;;  %v3197_v60 = vpop.f32.mrb[77].mxu1  ;;  %v3480_v11 = vadd.f32 %v5735_v28, %v3332_v18 }
 0x4e0   :  { %v3352_v20 = vmax.f32 %v3351_v16, %v3197_v60  ;;  %v3199_v59 = vpop.f32.mrb[78].mxu1  ;;  %v3481_v19 = vadd.f32 %v5738_v4, %v3341_v42 }
 0x4e1   :  { %v3344_v56 = vmax.f32 %v3343_v37, %v3199_v59  ;;  %v3201_v7 = vpop.f32.mrb[79].mxu1 }
 0x4e2   :  { %v3353_v35 = vmax.f32 %v3352_v20, %v3201_v7 }
 0x4e3   :  { %v3345_v34 = vrot.slane %v3344_v56, 4 }
 0x4e4   :  { %v3354_v54 = vrot.slane %v3353_v35, 4 }
 0x4e5   :  { %v3346_v36 = vmax.f32 %v3344_v56, %v3345_v34 }
 0x4e6   :  { %v3355_v53 = vmax.f32 %v3353_v35, %v3354_v54  ;;  %v3205_v51 = vpop.f32.mrb[80].mxu1 }
 0x4e7   :  { %v3347_v50 = vrot.slane %v3346_v36, 2  ;;  %v3207_v58 = vpop.f32.mrb[81].mxu1 }
 0x4e8   :  { %v3356_v30 = vrot.slane %v3355_v53, 2  ;;  %v3209_v21 = vpop.f32.mrb[82].mxu1 }
 0x4e9   :  { %v3348_v6 = vmax.f32 %v3346_v36, %v3347_v50  ;;  %v3360_v26 = vmax.f32 %v3205_v51, %v3209_v21  ;;  %v3211_v47 = vpop.f32.mrb[83].mxu1 }
 0x4ea   :  { %v3357_v1 = vmax.f32 %v3355_v53, %v3356_v30  ;;  %v3369_v38 = vmax.f32 %v3207_v58, %v3211_v47 }
 0x4eb   :  { %v3349_v31 = vrot.slane %v3348_v6, 1 }
 0x4ec   :  { %v3358_v12 = vrot.slane %v3357_v1, 1 }
 0x4ed   :  { %v3350_v40 = vmax.f32 %v3348_v6, %v3349_v31 }
 0x4ee   :  { %v3359_v3 = vmax.f32 %v3357_v1, %v3358_v12  ;;  %v3215_v52 = vpop.f32.mrb[84].mxu1 }
 0x4ef   :  { %v3482_v44 = vadd.f32 %v5735_v28, %v3350_v40  ;;  %v3361_v61 = vmax.f32 %v3360_v26, %v3215_v52  ;;  %v3217_v49 = vpop.f32.mrb[85].mxu1 }
 0x4f0   :  { %v3483_v39 = vadd.f32 %v5738_v4, %v3359_v3  ;;  %v3370_v23 = vmax.f32 %v3369_v38, %v3217_v49  ;;  %v3219_v14 = vpop.f32.mrb[86].mxu1 }
 0x4f1   :  { %v3512_v5 = vrot.slane %v3482_v44, 7  ;;  %v3362_v48 = vmax.f32 %v3361_v61, %v3219_v14  ;;  %v3221_v32 = vpop.f32.mrb[87].mxu1 }
 0x4f2   :  { %v3526_v29 = vrot.slane %v3483_v39, 7  ;;  %v3371_v27 = vmax.f32 %v3370_v23, %v3221_v32 }
 0x4f3   :  { %v3513_v13 = vsel %vm1575_vm2, %v3512_v5, %v3480_v11  ;;  %v3363_v63 = vrot.slane %v3362_v48, 4 }
 0x4f4   :  { %v3527_v46 = vsel %vm1575_vm2, %v3526_v29, %v3481_v19  ;;  %v3372_v9 = vrot.slane %v3371_v27, 4 }
 0x4f5   :  { %v3364_v43 = vmax.f32 %v3362_v48, %v3363_v63 }
 0x4f6   :  { %v3373_v25 = vmax.f32 %v3371_v27, %v3372_v9  ;;  %v3225_v57 = vpop.f32.mrb[88].mxu1 }
 0x4f7   :  { %v3365_v41 = vrot.slane %v3364_v43, 2  ;;  %v3227_v16 = vpop.f32.mrb[89].mxu1 }
 0x4f8   :  { %v3374_v15 = vrot.slane %v3373_v25, 2  ;;  %v3229_v10 = vpop.f32.mrb[90].mxu1 }
 0x4f9   :  { %v3366_v2 = vmax.f32 %v3364_v43, %v3365_v41  ;;  %v3378_v37 = vmax.f32 %v3225_v57, %v3229_v10  ;;  %v3231_v60 = vpop.f32.mrb[91].mxu1 }
 0x4fa   :  { %v3375_v20 = vmax.f32 %v3373_v25, %v3374_v15  ;;  %v3387_v59 = vmax.f32 %v3227_v16, %v3231_v60 }
 0x4fb   :  { %v3367_v0 = vrot.slane %v3366_v2, 1 }
 0x4fc   :  { %v3376_v56 = vrot.slane %v3375_v20, 1 }
 0x4fd   :  { %v3368_v7 = vmax.f32 %v3366_v2, %v3367_v0 }
 0x4fe   :  { %v3377_v62 = vmax.f32 %v3375_v20, %v3376_v56  ;;  %v3235_v35 = vpop.f32.mrb[92].mxu1 }
 0x4ff   :  { %v3484_v34 = vadd.f32 %v5735_v28, %v3368_v7  ;;  %v3379_v54 = vmax.f32 %v3378_v37, %v3235_v35  ;;  %v3237_v45 = vpop.f32.mrb[93].mxu1 }
 0x500   :  { %v3485_v36 = vadd.f32 %v5738_v4, %v3377_v62  ;;  %v3388_v17 = vmax.f32 %v3387_v59, %v3237_v45  ;;  %v3239_v53 = vpop.f32.mrb[94].mxu1 }
 0x501   :  { %v3514_v51 = vrot.slane %v3484_v34, 6  ;;  %v3380_v50 = vmax.f32 %v3379_v54, %v3239_v53  ;;  %v3241_v58 = vpop.f32.mrb[95].mxu1 }
 0x502   :  { %v3528_v30 = vrot.slane %v3485_v36, 6  ;;  %v3389_v21 = vmax.f32 %v3388_v17, %v3241_v58 }
 0x503   :  { %v3515_v24 = vsel %vm1577_vm3, %v3514_v51, %v3513_v13  ;;  %v3381_v6 = vrot.slane %v3380_v50, 4 }
 0x504   :  { %v3529_v26 = vsel %vm1577_vm3, %v3528_v30, %v3527_v46  ;;  %v3390_v47 = vrot.slane %v3389_v21, 4 }
 0x505   :  { %v3382_v33 = vmax.f32 %v3380_v50, %v3381_v6 }
 0x506   :  { %v3391_v8 = vmax.f32 %v3389_v21, %v3390_v47  ;;  %v3245_v1 = vpop.f32.mrb[96].mxu1 }
 0x507   :  { %v3383_v38 = vrot.slane %v3382_v33, 2  ;;  %v3247_v31 = vpop.f32.mrb[97].mxu1 }
 0x508   :  { %v3392_v12 = vrot.slane %v3391_v8, 2  ;;  %v3249_v18 = vpop.f32.mrb[98].mxu1 }
 0x509   :  { %v3384_v22 = vmax.f32 %v3382_v33, %v3383_v38  ;;  %v3396_v40 = vmax.f32 %v3245_v1, %v3249_v18  ;;  %v3251_v42 = vpop.f32.mrb[99].mxu1 }
 0x50a   :  { %v3393_v55 = vmax.f32 %v3391_v8, %v3392_v12  ;;  %v3405_v3 = vmax.f32 %v3247_v31, %v3251_v42 }
 0x50b   :  { %v3385_v52 = vrot.slane %v3384_v22, 1 }
 0x50c   :  { %v3394_v44 = vrot.slane %v3393_v55, 1 }
 0x50d   :  { %v3386_v61 = vmax.f32 %v3384_v22, %v3385_v52 }
 0x50e   :  { %v3395_v49 = vmax.f32 %v3393_v55, %v3394_v44  ;;  %v3255_v39 = vpop.f32.mrb[100].mxu1 }
 0x50f   :  { %v3486_v23 = vadd.f32 %v5735_v28, %v3386_v61  ;;  %v3397_v14 = vmax.f32 %v3396_v40, %v3255_v39  ;;  %v3257_v11 = vpop.f32.mrb[101].mxu1 }
 0x510   :  { %v3487_v5 = vadd.f32 %v5738_v4, %v3395_v49  ;;  %v3406_v48 = vmax.f32 %v3405_v3, %v3257_v11  ;;  %v3259_v32 = vpop.f32.mrb[102].mxu1 }
 0x511   :  { %v3516_v19 = vrot.slane %v3486_v23, 5  ;;  %v3398_v29 = vmax.f32 %v3397_v14, %v3259_v32  ;;  %v3261_v27 = vpop.f32.mrb[103].mxu1 }
 0x512   :  { %v3530_v13 = vrot.slane %v3487_v5, 5  ;;  %v3407_v63 = vmax.f32 %v3406_v48, %v3261_v27 }
 0x513   :  { %v3517_v46 = vsel %vm1579_vm4, %v3516_v19, %v3515_v24  ;;  %v3399_v9 = vrot.slane %v3398_v29, 4 }
 0x514   :  { %v3531_v43 = vsel %vm1579_vm4, %v3530_v13, %v3529_v26  ;;  %v3408_v25 = vrot.slane %v3407_v63, 4 }
 0x515   :  { %v3400_v57 = vmax.f32 %v3398_v29, %v3399_v9 }
 0x516   :  { %v3409_v41 = vmax.f32 %v3407_v63, %v3408_v25  ;;  %v3265_v16 = vpop.f32.mrb[104].mxu1 }
 0x517   :  { %v3401_v15 = vrot.slane %v3400_v57, 2  ;;  %v3267_v10 = vpop.f32.mrb[105].mxu1 }
 0x518   :  { %v3410_v2 = vrot.slane %v3409_v41, 2  ;;  %v3269_v37 = vpop.f32.mrb[106].mxu1 }
 0x519   :  { %v3402_v60 = vmax.f32 %v3400_v57, %v3401_v15  ;;  %v3414_v20 = vmax.f32 %v3265_v16, %v3269_v37  ;;  %v3271_v59 = vpop.f32.mrb[107].mxu1 }
 0x51a   :  { %v3411_v0 = vmax.f32 %v3409_v41, %v3410_v2  ;;  %v3423_v56 = vmax.f32 %v3267_v10, %v3271_v59 }
 0x51b   :  { %v3403_v7 = vrot.slane %v3402_v60, 1 }
 0x51c   :  { %v3412_v62 = vrot.slane %v3411_v0, 1 }
 0x51d   :  { %v3404_v35 = vmax.f32 %v3402_v60, %v3403_v7 }
 0x51e   :  { %v3413_v34 = vmax.f32 %v3411_v0, %v3412_v62  ;;  %v3275_v54 = vpop.f32.mrb[108].mxu1 }
 0x51f   :  { %v3488_v45 = vadd.f32 %v5735_v28, %v3404_v35  ;;  %v3415_v36 = vmax.f32 %v3414_v20, %v3275_v54  ;;  %v3277_v17 = vpop.f32.mrb[109].mxu1 }
 0x520   :  { %v3489_v53 = vadd.f32 %v5738_v4, %v3413_v34  ;;  %v3424_v51 = vmax.f32 %v3423_v56, %v3277_v17  ;;  %v3279_v50 = vpop.f32.mrb[110].mxu1 }
 0x521   :  { %v3518_v58 = vrot.slane %v3488_v45, 4  ;;  %v3416_v30 = vmax.f32 %v3415_v36, %v3279_v50  ;;  %v3281_v21 = vpop.f32.mrb[111].mxu1 }
 0x522   :  { %v3532_v24 = vrot.slane %v3489_v53, 4  ;;  %v3425_v6 = vmax.f32 %v3424_v51, %v3281_v21 }
 0x523   :  { %v3519_v26 = vsel %vm1581_vm5, %v3518_v58, %v3517_v46  ;;  %v3417_v47 = vrot.slane %v3416_v30, 4 }
 0x524   :  { %v3533_v33 = vsel %vm1581_vm5, %v3532_v24, %v3531_v43  ;;  %v3426_v8 = vrot.slane %v3425_v6, 4 }
 0x525   :  { %v3418_v1 = vmax.f32 %v3416_v30, %v3417_v47 }
 0x526   :  { %v3427_v38 = vmax.f32 %v3425_v6, %v3426_v8  ;;  %v3285_v31 = vpop.f32.mrb[112].mxu1 }
 0x527   :  { %v3419_v12 = vrot.slane %v3418_v1, 2  ;;  %v3287_v18 = vpop.f32.mrb[113].mxu1 }
 0x528   :  { %v3428_v22 = vrot.slane %v3427_v38, 2  ;;  %v3289_v40 = vpop.f32.mrb[114].mxu1 }
 0x529   :  { %v3420_v42 = vmax.f32 %v3418_v1, %v3419_v12  ;;  %v3432_v55 = vmax.f32 %v3285_v31, %v3289_v40  ;;  %v3291_v3 = vpop.f32.mrb[115].mxu1 }
 0x52a   :  { %v3429_v52 = vmax.f32 %v3427_v38, %v3428_v22  ;;  %v3441_v44 = vmax.f32 %v3287_v18, %v3291_v3 }
 0x52b   :  { %v3421_v61 = vrot.slane %v3420_v42, 1 }
 0x52c   :  { %v3430_v49 = vrot.slane %v3429_v52, 1 }
 0x52d   :  { %v3422_v39 = vmax.f32 %v3420_v42, %v3421_v61 }
 0x52e   :  { %v3431_v23 = vmax.f32 %v3429_v52, %v3430_v49  ;;  %v3295_v14 = vpop.f32.mrb[116].mxu1 }
 0x52f   :  { %v3490_v11 = vadd.f32 %v5735_v28, %v3422_v39  ;;  %v3433_v5 = vmax.f32 %v3432_v55, %v3295_v14  ;;  %v3297_v48 = vpop.f32.mrb[117].mxu1 }
 0x530   :  { %v3491_v32 = vadd.f32 %v5738_v4, %v3431_v23  ;;  %v3442_v19 = vmax.f32 %v3441_v44, %v3297_v48  ;;  %v3299_v29 = vpop.f32.mrb[118].mxu1 }
 0x531   :  { %v3520_v27 = vrot.slane %v3490_v11, 3  ;;  %v3434_v13 = vmax.f32 %v3433_v5, %v3299_v29  ;;  %v3301_v63 = vpop.f32.mrb[119].mxu1 }
 0x532   :  { %v3534_v46 = vrot.slane %v3491_v32, 3  ;;  %v3443_v9 = vmax.f32 %v3442_v19, %v3301_v63 }
 0x533   :  { %v3521_v43 = vsel %vm1583_vm6, %v3520_v27, %v3519_v26  ;;  %v3435_v25 = vrot.slane %v3434_v13, 4 }
 0x534   :  { %v3535_v57 = vsel %vm1583_vm6, %v3534_v46, %v3533_v33  ;;  %v3444_v41 = vrot.slane %v3443_v9, 4 }
 0x535   :  { %v3436_v16 = vmax.f32 %v3434_v13, %v3435_v25 }
 0x536   :  { %v3445_v15 = vmax.f32 %v3443_v9, %v3444_v41  ;;  %v3305_v10 = vpop.f32.mrb[120].mxu1 }
 0x537   :  { %v3437_v2 = vrot.slane %v3436_v16, 2  ;;  %v3307_v37 = vpop.f32.mrb[121].mxu1 }
 0x538   :  { %v3446_v60 = vrot.slane %v3445_v15, 2  ;;  %v3309_v20 = vpop.f32.mrb[122].mxu1 }
 0x539   :  { %v3438_v59 = vmax.f32 %v3436_v16, %v3437_v2  ;;  %v3450_v0 = vmax.f32 %v3305_v10, %v3309_v20  ;;  %v3311_v56 = vpop.f32.mrb[123].mxu1 }
 0x53a   :  { %v3447_v7 = vmax.f32 %v3445_v15, %v3446_v60  ;;  %v3459_v62 = vmax.f32 %v3307_v37, %v3311_v56 }
 0x53b   :  { %v3439_v35 = vrot.slane %v3438_v59, 1 }
 0x53c   :  { %v3448_v34 = vrot.slane %v3447_v7, 1 }
 0x53d   :  { %v3440_v54 = vmax.f32 %v3438_v59, %v3439_v35 }
 0x53e   :  { %v3449_v45 = vmax.f32 %v3447_v7, %v3448_v34  ;;  %v3315_v36 = vpop.f32.mrb[124].mxu1 }
 0x53f   :  { %v3492_v17 = vadd.f32 %v5735_v28, %v3440_v54  ;;  %v3451_v53 = vmax.f32 %v3450_v0, %v3315_v36  ;;  %v3317_v51 = vpop.f32.mrb[125].mxu1 }
 0x540   :  { %v3493_v50 = vadd.f32 %v5738_v4, %v3449_v45  ;;  %v3460_v58 = vmax.f32 %v3459_v62, %v3317_v51  ;;  %v3319_v30 = vpop.f32.mrb[126].mxu1 }
 0x541   :  { %v3522_v21 = vrot.slane %v3492_v17, 2  ;;  %v3452_v24 = vmax.f32 %v3451_v53, %v3319_v30  ;;  %v3321_v6 = vpop.f32.mrb[127].mxu1 }
 0x542   :  { %v3536_v26 = vrot.slane %v3493_v50, 2  ;;  %v3461_v47 = vmax.f32 %v3460_v58, %v3321_v6 }
 0x543   :  { %v3523_v33 = vsel %vm1585_vm7, %v3522_v21, %v3521_v43  ;;  %v3453_v8 = vrot.slane %v3452_v24, 4 }
 0x544   :  { %v3537_v1 = vsel %vm1585_vm7, %v3536_v26, %v3535_v57  ;;  %v3462_v38 = vrot.slane %v3461_v47, 4 }
 0x545   :  { %v3454_v31 = vmax.f32 %v3452_v24, %v3453_v8 }
 0x546   :  { %v3463_v12 = vmax.f32 %v3461_v47, %v3462_v38 }
 0x547   :  { %v3455_v18 = vrot.slane %v3454_v31, 2 }
 0x548   :  { %v3464_v22 = vrot.slane %v3463_v12, 2 }
 0x549   :  { %v3456_v40 = vmax.f32 %v3454_v31, %v3455_v18 }
 0x54a   :  { %v3465_v42 = vmax.f32 %v3463_v12, %v3464_v22 }
 0x54b   :  { %v3457_v55 = vrot.slane %v3456_v40, 1 }
 0x54c   :  { %v3466_v3 = vrot.slane %v3465_v42, 1 }
 0x54d   :  { %v3458_v52 = vmax.f32 %v3456_v40, %v3457_v55 }
 0x54e   :  { %v3467_v44 = vmax.f32 %v3465_v42, %v3466_v3 }
 0x54f   :  { %v3494_v61 = vadd.f32 %v5735_v28, %v3458_v52 }
 0x550   :  { %v3495_v49 = vadd.f32 %v5738_v4, %v3467_v44 }
 0x551   :  { %v3524_v39 = vrot.slane %v3494_v61, 1 }
 0x552   :  { %v3538_v23 = vrot.slane %v3495_v49, 1 }
 0x553   :  { %v3525_v14 = vsel %vm1587_vm8, %v3524_v39, %v3523_v33 }
 0x554   :  { %3542 = vst [vmem:[%s5786_s10] sm:$0xff] %v3525_v14  ;;  %v3539_v11 = vsel %vm1587_vm8, %v3538_v23, %v3537_v1 }
 0x555   :  { %3543 = vst [vmem:[%s5786_s10 + $0x8] sm:$0xff] %v3539_v11 }

</bundles_post_ra>
